<compile_context>
chip_gen: v5e
topology: v5e:2x2
jax: 0.10.0
libtpu: 0.0.40
codegen_flags: <defaults>
</compile_context>

<pallas_src>
import functools

import jax
import jax.numpy as jnp
from jax.experimental import pallas as pl
from jax.experimental.pallas import tpu as pltpu

KSIZE = 7
PAD = 3


def _spatial_attention_kernel(h, w, wp, x_ref, w_ref, o_ref, shift_ref, attn_ref):
    # x_ref:     (1, C, H*W) VMEM block for this batch element (lane-dense)
    # w_ref:     (2*KSIZE*KSIZE,) f32 conv taps in SMEM (mean taps pre-scaled by 1/C)
    # o_ref:     (1, C, H*W) VMEM output block (lane-dense)
    # shift_ref: (2, KSIZE, H+2*PAD, wp) f32 VMEM scratch:
    #            [c, kx] = zero-padded channel-c conv input, lane-shifted left by kx
    # attn_ref:  (1, H*W) f32 VMEM scratch holding the flattened attention map
    hp = h + 2 * PAD

    # ---- channel reductions, straight from the ref (no f32 slab kept live) ----
    xin = x_ref[0]                                                    # (C, H*W)
    ch_sum = jnp.sum(xin, axis=0, keepdims=True, dtype=jnp.float32)   # (1, H*W)
    ch_max = jnp.max(xin, axis=0, keepdims=True).astype(jnp.float32)  # (1, H*W)

    # ---- build the zero-padded 2-channel conv input (ch0 = SUM, ch1 = MAX) ----
    # Per-step zero fill (see header comment about "parallel" + per-core scratch).
    zeros_plane = jnp.zeros((hp, wp), jnp.float32)
    shift_ref[0, 0] = zeros_plane
    shift_ref[1, 0] = zeros_plane
    # Small layout plumbing: (1, H*W) lane-dense row -> (H, W) interior of the
    # padded 2-D scratch, one image row at a time (static slices only).
    for r in range(h):
        lo = r * w
        shift_ref[0, 0, PAD + r:PAD + r + 1, PAD:PAD + w] = ch_sum[:, lo:lo + w]
        shift_ref[1, 0, PAD + r:PAD + r + 1, PAD:PAD + w] = ch_max[:, lo:lo + w]

    # ---- pre-shift the kx = 1..6 lane offsets once per channel -------------
    # shift_ref[c, kx][i, j] == shift_ref[c, 0][i, j + kx] for j < wp - kx.
    # Tail lanes >= wp - kx are never read (taps only use columns < w <= 15).
    for cc in range(2):
        base = shift_ref[cc, 0]                                       # (hp, wp)
        for kx in range(1, KSIZE):
            shift_ref[cc, kx, :, 0:wp - kx] = base[:, kx:]

    # ---- 7x7 conv, 2 in-channels -> 1 out-channel, fully unrolled ----------
    # All 98 tap reads are sublane(row)-offset loads of the full lane width;
    # 4 independent accumulators break the serial add dependency chain.
    accs = [jnp.zeros((h, wp), jnp.float32) for _ in range(4)]
    for cc in range(2):
        base_idx = cc * KSIZE * KSIZE
        for ky in range(KSIZE):
            a = cc * 2 + (ky & 1)
            for kx in range(KSIZE):
                tap = w_ref[base_idx + ky * KSIZE + kx]
                accs[a] = accs[a] + tap * shift_ref[cc, kx, ky:ky + h, :]
    acc = (accs[0] + accs[1]) + (accs[2] + accs[3])                   # (h, wp)

    # ---- sigmoid via EUP exp + approximate reciprocal -----------------------
    logits = acc[:, :w]                                               # (h, w)
    attn2d = pl.reciprocal(1.0 + jnp.exp(-logits), approx=True)       # (h, w) f32

    # Small layout plumbing back: (h, w) -> (1, H*W) lane-dense row.
    for r in range(h):
        attn_ref[:, r * w:(r + 1) * w] = attn2d[r:r + 1, :]

    # ---- gating multiply + store, lane-dense, in the input dtype -----------
    gate = attn_ref[...].astype(o_ref.dtype)                          # (1, H*W)
    o_ref[0] = x_ref[0] * gate


def spatial_attention(x, conv_w, *, donate_input=False):
    """x: (N, C, H, W); conv_w: (1, 2, 7, 7) Conv2d weight (bias=False)."""
    n, c, h, w = x.shape
    assert conv_w.shape == (1, 2, KSIZE, KSIZE)
    hw = h * w
    hp = h + 2 * PAD
    # Lane width of the padded conv scratch: round up to a multiple of 128 so
    # the pre-shifted copies live on native vreg lanes.
    wp = ((w + 2 * PAD + 127) // 128) * 128

    # Fold 1/C into the mean-branch taps: the kernel computes a channel SUM.
    w_flat = jnp.concatenate([
        conv_w[0, 0].reshape(-1).astype(jnp.float32) / float(c),
        conv_w[0, 1].reshape(-1).astype(jnp.float32),
    ])                                                                # (98,)

    # Lane-dense view of the big tensor (free wrapper-side reshape).
    x_flat = x.reshape(n, c, hw)

    kernel = functools.partial(_spatial_attention_kernel, h, w, wp)

    itemsize = jnp.dtype(x.dtype).itemsize
    cost = pl.CostEstimate(
        flops=int(n * hw * (3 * c + 4 * 2 * KSIZE * KSIZE)),
        transcendentals=int(n * hw),
        bytes_accessed=int(2 * x.size * itemsize + w_flat.size * 4),
    )

    out_flat = pl.pallas_call(
        kernel,
        out_shape=jax.ShapeDtypeStruct((n, c, hw), x.dtype),
        grid=(n,),
        in_specs=[
            pl.BlockSpec((1, c, hw), lambda i: (i, 0, 0)),
            # Tiny conv-weight vector: scalars in SMEM.
            pl.BlockSpec(memory_space=pltpu.MemorySpace.SMEM),
        ],
        out_specs=pl.BlockSpec((1, c, hw), lambda i: (i, 0, 0)),
        scratch_shapes=[
            pltpu.VMEM((2, KSIZE, hp, wp), jnp.float32),   # padded + pre-shifted planes
            pltpu.VMEM((1, hw), jnp.float32),              # flattened attention map
        ],
        compiler_params=pltpu.CompilerParams(
            dimension_semantics=("parallel",)),
        cost_estimate=cost,
        # Reuse x's HBM buffer for the output when the caller donates x.
        input_output_aliases=({0: 0} if donate_input else {}),
    )(x_flat, w_flat)

    return out_flat.reshape(n, c, h, w)


if __name__ == "__main__":
    key = jax.random.PRNGKey(0)
    kx_key, kw_key = jax.random.split(key)

    N, C, H, W = 2, 4, 16, 16
    x = jax.random.normal(kx_key, (N, C, H, W), dtype=jnp.float32)

    # Deterministic Conv2d(2, 1, 7, padding=3, bias=False) weight init
    # (uniform in +-1/sqrt(fan_in), like PyTorch's default).
    bound = 1.0 / float((2 * KSIZE * KSIZE) ** 0.5)
    conv_w = jax.random.uniform(
        kw_key, (1, 2, KSIZE, KSIZE), jnp.float32, minval=-bound, maxval=bound)

    out = spatial_attention(x, conv_w)
    out = jax.block_until_ready(out)

    # Pure-JAX reference of the exact PyTorch forward.
    pooled = jnp.concatenate(
        [jnp.mean(x, axis=1, keepdims=True),
         jnp.max(x, axis=1, keepdims=True)], axis=1)          # (N, 2, H, W)
    conv = jax.lax.conv_general_dilated(
        pooled, conv_w, window_strides=(1, 1),
        padding=[(PAD, PAD), (PAD, PAD)],
        dimension_numbers=("NCHW", "OIHW", "NCHW"))           # (N, 1, H, W)
    ref = x * jax.nn.sigmoid(conv)

    assert out.shape == x.shape
    err = float(jnp.max(jnp.abs(out - ref)))
    # Tolerance budget is dominated by the EUP approximate reciprocal in the
    # in-kernel sigmoid (~1e-3-class relative error); everything else matches
    # the reference exactly. Structural bugs produce errors >> 1e-1.
    assert err < 2e-2, err

    print("KERNEL_OK")
</pallas_src>

<mosaic_0001>
module attributes {stable_mosaic.version = 11 : i64} {
  func.func @_spatial_attention_kernel(%arg0: i32, %arg1: memref<1x4x256xf32, #tpu.memory_space<vmem>>, %arg2: memref<98xf32, #tpu.memory_space<smem>>, %arg3: memref<1x4x256xf32, #tpu.memory_space<vmem>>, %arg4: memref<2x7x22x128xf32, #tpu.memory_space<vmem>>, %arg5: memref<1x256xf32, #tpu.memory_space<vmem>>) attributes {dimension_semantics = [#tpu.dimension_semantics<parallel>], iteration_bounds = array<i64: 2>, scalar_prefetch = 0 : i64, scratch_operands = 2 : i64, tpu.core_type = #tpu.core_type<tc>, window_params = [{transform_indices = @transform_0, window_bounds = array<i64: 1, 4, 256>}, {transform_indices = @transform_1, window_bounds = array<i64: 98>}, {transform_indices = @transform_2, window_bounds = array<i64: 1, 4, 256>}]} {
    %c0 = arith.constant 0 : index
    %c0_0 = arith.constant 0 : index
    %c0_1 = arith.constant 0 : index
    %0 = vector.load %arg1[%c0, %c0_0, %c0_1] : memref<1x4x256xf32, #tpu.memory_space<vmem>>, vector<1x4x256xf32>
    %1 = vector.shape_cast %0 : vector<1x4x256xf32> to vector<4x256xf32>
    %cst = arith.constant dense<0.000000e+00> : vector<256xf32>
    %2 = vector.multi_reduction <add>, %1, %cst [0] : vector<4x256xf32> to vector<256xf32>
    %3 = vector.shape_cast %2 : vector<256xf32> to vector<1x256xf32>
    %cst_2 = arith.constant dense<0xFF800000> : vector<256xf32>
    %4 = vector.multi_reduction <maximumf>, %1, %cst_2 [0] : vector<4x256xf32> to vector<256xf32>
    %5 = vector.shape_cast %4 : vector<256xf32> to vector<1x256xf32>
    %cst_3 = arith.constant 0.000000e+00 : f32
    %6 = vector.broadcast %cst_3 : f32 to vector<22x128xf32>
    %c0_4 = arith.constant 0 : index
    %c0_5 = arith.constant 0 : index
    %c0_6 = arith.constant 0 : index
    %c0_7 = arith.constant 0 : index
    %7 = vector.load %arg4[%c0_4, %c0_5, %c0_6, %c0_7] : memref<2x7x22x128xf32, #tpu.memory_space<vmem>>, vector<1x1x22x128xf32>
    %8 = vector.shape_cast %7 : vector<1x1x22x128xf32> to vector<22x128xf32>
    %9 = vector.shape_cast %6 : vector<22x128xf32> to vector<1x1x22x128xf32>
    tpu.vector_store %arg4[%c0_4, %c0_5, %c0_6, %c0_7], %9 {strides = array<i32>} : memref<2x7x22x128xf32, #tpu.memory_space<vmem>>, vector<1x1x22x128xf32>,
    %c1 = arith.constant 1 : index
    %c0_8 = arith.constant 0 : index
    %c0_9 = arith.constant 0 : index
    %c0_10 = arith.constant 0 : index
    %10 = vector.load %arg4[%c1, %c0_8, %c0_9, %c0_10] : memref<2x7x22x128xf32, #tpu.memory_space<vmem>>, vector<1x1x22x128xf32>
    %11 = vector.shape_cast %10 : vector<1x1x22x128xf32> to vector<22x128xf32>
    %12 = vector.shape_cast %6 : vector<22x128xf32> to vector<1x1x22x128xf32>
    tpu.vector_store %arg4[%c1, %c0_8, %c0_9, %c0_10], %12 {strides = array<i32>} : memref<2x7x22x128xf32, #tpu.memory_space<vmem>>, vector<1x1x22x128xf32>,
    %13 = vector.extract_strided_slice %3 {offsets = [0, 0], sizes = [1, 16], strides = [1, 1]} : vector<1x256xf32> to vector<1x16xf32>
    %c0_11 = arith.constant 0 : index
    %c0_12 = arith.constant 0 : index
    %c3 = arith.constant 3 : index
    %c3_13 = arith.constant 3 : index
    %14 = vector.load %arg4[%c0_11, %c0_12, %c3, %c3_13] : memref<2x7x22x128xf32, #tpu.memory_space<vmem>>, vector<1x1x1x16xf32>
    %15 = vector.shape_cast %14 : vector<1x1x1x16xf32> to vector<1x16xf32>
    %16 = vector.shape_cast %13 : vector<1x16xf32> to vector<1x1x1x16xf32>
    tpu.vector_store %arg4[%c0_11, %c0_12, %c3, %c3_13], %16 {strides = array<i32>} : memref<2x7x22x128xf32, #tpu.memory_space<vmem>>, vector<1x1x1x16xf32>,
    %17 = vector.extract_strided_slice %5 {offsets = [0, 0], sizes = [1, 16], strides = [1, 1]} : vector<1x256xf32> to vector<1x16xf32>
    %c1_14 = arith.constant 1 : index
    %c0_15 = arith.constant 0 : index
    %c3_16 = arith.constant 3 : index
    %c3_17 = arith.constant 3 : index
    %18 = vector.load %arg4[%c1_14, %c0_15, %c3_16, %c3_17] : memref<2x7x22x128xf32, #tpu.memory_space<vmem>>, vector<1x1x1x16xf32>
    %19 = vector.shape_cast %18 : vector<1x1x1x16xf32> to vector<1x16xf32>
    %20 = vector.shape_cast %17 : vector<1x16xf32> to vector<1x1x1x16xf32>
    tpu.vector_store %arg4[%c1_14, %c0_15, %c3_16, %c3_17], %20 {strides = array<i32>} : memref<2x7x22x128xf32, #tpu.memory_space<vmem>>, vector<1x1x1x16xf32>,
    %21 = vector.extract_strided_slice %3 {offsets = [0, 16], sizes = [1, 16], strides = [1, 1]} : vector<1x256xf32> to vector<1x16xf32>
    %c0_18 = arith.constant 0 : index
    %c0_19 = arith.constant 0 : index
    %c4 = arith.constant 4 : index
    %c3_20 = arith.constant 3 : index
    %22 = vector.load %arg4[%c0_18, %c0_19, %c4, %c3_20] : memref<2x7x22x128xf32, #tpu.memory_space<vmem>>, vector<1x1x1x16xf32>
    %23 = vector.shape_cast %22 : vector<1x1x1x16xf32> to vector<1x16xf32>
    %24 = vector.shape_cast %21 : vector<1x16xf32> to vector<1x1x1x16xf32>
    tpu.vector_store %arg4[%c0_18, %c0_19, %c4, %c3_20], %24 {strides = array<i32>} : memref<2x7x22x128xf32, #tpu.memory_space<vmem>>, vector<1x1x1x16xf32>,
    %25 = vector.extract_strided_slice %5 {offsets = [0, 16], sizes = [1, 16], strides = [1, 1]} : vector<1x256xf32> to vector<1x16xf32>
    %c1_21 = arith.constant 1 : index
    %c0_22 = arith.constant 0 : index
    %c4_23 = arith.constant 4 : index
    %c3_24 = arith.constant 3 : index
    %26 = vector.load %arg4[%c1_21, %c0_22, %c4_23, %c3_24] : memref<2x7x22x128xf32, #tpu.memory_space<vmem>>, vector<1x1x1x16xf32>
    %27 = vector.shape_cast %26 : vector<1x1x1x16xf32> to vector<1x16xf32>
    %28 = vector.shape_cast %25 : vector<1x16xf32> to vector<1x1x1x16xf32>
    tpu.vector_store %arg4[%c1_21, %c0_22, %c4_23, %c3_24], %28 {strides = array<i32>} : memref<2x7x22x128xf32, #tpu.memory_space<vmem>>, vector<1x1x1x16xf32>,
    %29 = vector.extract_strided_slice %3 {offsets = [0, 32], sizes = [1, 16], strides = [1, 1]} : vector<1x256xf32> to vector<1x16xf32>
    %c0_25 = arith.constant 0 : index
    %c0_26 = arith.constant 0 : index
    %c5 = arith.constant 5 : index
    %c3_27 = arith.constant 3 : index
    %30 = vector.load %arg4[%c0_25, %c0_26, %c5, %c3_27] : memref<2x7x22x128xf32, #tpu.memory_space<vmem>>, vector<1x1x1x16xf32>
    %31 = vector.shape_cast %30 : vector<1x1x1x16xf32> to vector<1x16xf32>
    %32 = vector.shape_cast %29 : vector<1x16xf32> to vector<1x1x1x16xf32>
    tpu.vector_store %arg4[%c0_25, %c0_26, %c5, %c3_27], %32 {strides = array<i32>} : memref<2x7x22x128xf32, #tpu.memory_space<vmem>>, vector<1x1x1x16xf32>,
    %33 = vector.extract_strided_slice %5 {offsets = [0, 32], sizes = [1, 16], strides = [1, 1]} : vector<1x256xf32> to vector<1x16xf32>
    %c1_28 = arith.constant 1 : index
    %c0_29 = arith.constant 0 : index
    %c5_30 = arith.constant 5 : index
    %c3_31 = arith.constant 3 : index
    %34 = vector.load %arg4[%c1_28, %c0_29, %c5_30, %c3_31] : memref<2x7x22x128xf32, #tpu.memory_space<vmem>>, vector<1x1x1x16xf32>
    %35 = vector.shape_cast %34 : vector<1x1x1x16xf32> to vector<1x16xf32>
    %36 = vector.shape_cast %33 : vector<1x16xf32> to vector<1x1x1x16xf32>
    tpu.vector_store %arg4[%c1_28, %c0_29, %c5_30, %c3_31], %36 {strides = array<i32>} : memref<2x7x22x128xf32, #tpu.memory_space<vmem>>, vector<1x1x1x16xf32>,
    %37 = vector.extract_strided_slice %3 {offsets = [0, 48], sizes = [1, 16], strides = [1, 1]} : vector<1x256xf32> to vector<1x16xf32>
    %c0_32 = arith.constant 0 : index
    %c0_33 = arith.constant 0 : index
    %c6 = arith.constant 6 : index
    %c3_34 = arith.constant 3 : index
    %38 = vector.load %arg4[%c0_32, %c0_33, %c6, %c3_34] : memref<2x7x22x128xf32, #tpu.memory_space<vmem>>, vector<1x1x1x16xf32>
    %39 = vector.shape_cast %38 : vector<1x1x1x16xf32> to vector<1x16xf32>
    %40 = vector.shape_cast %37 : vector<1x16xf32> to vector<1x1x1x16xf32>
    tpu.vector_store %arg4[%c0_32, %c0_33, %c6, %c3_34], %40 {strides = array<i32>} : memref<2x7x22x128xf32, #tpu.memory_space<vmem>>, vector<1x1x1x16xf32>,
    %41 = vector.extract_strided_slice %5 {offsets = [0, 48], sizes = [1, 16], strides = [1, 1]} : vector<1x256xf32> to vector<1x16xf32>
    %c1_35 = arith.constant 1 : index
    %c0_36 = arith.constant 0 : index
    %c6_37 = arith.constant 6 : index
    %c3_38 = arith.constant 3 : index
    %42 = vector.load %arg4[%c1_35, %c0_36, %c6_37, %c3_38] : memref<2x7x22x128xf32, #tpu.memory_space<vmem>>, vector<1x1x1x16xf32>
    %43 = vector.shape_cast %42 : vector<1x1x1x16xf32> to vector<1x16xf32>
    %44 = vector.shape_cast %41 : vector<1x16xf32> to vector<1x1x1x16xf32>
    tpu.vector_store %arg4[%c1_35, %c0_36, %c6_37, %c3_38], %44 {strides = array<i32>} : memref<2x7x22x128xf32, #tpu.memory_space<vmem>>, vector<1x1x1x16xf32>,
    %45 = vector.extract_strided_slice %3 {offsets = [0, 64], sizes = [1, 16], strides = [1, 1]} : vector<1x256xf32> to vector<1x16xf32>
    %c0_39 = arith.constant 0 : index
    %c0_40 = arith.constant 0 : index
    %c7 = arith.constant 7 : index
    %c3_41 = arith.constant 3 : index
    %46 = vector.load %arg4[%c0_39, %c0_40, %c7, %c3_41] : memref<2x7x22x128xf32, #tpu.memory_space<vmem>>, vector<1x1x1x16xf32>
    %47 = vector.shape_cast %46 : vector<1x1x1x16xf32> to vector<1x16xf32>
    %48 = vector.shape_cast %45 : vector<1x16xf32> to vector<1x1x1x16xf32>
    tpu.vector_store %arg4[%c0_39, %c0_40, %c7, %c3_41], %48 {strides = array<i32>} : memref<2x7x22x128xf32, #tpu.memory_space<vmem>>, vector<1x1x1x16xf32>,
    %49 = vector.extract_strided_slice %5 {offsets = [0, 64], sizes = [1, 16], strides = [1, 1]} : vector<1x256xf32> to vector<1x16xf32>
    %c1_42 = arith.constant 1 : index
    %c0_43 = arith.constant 0 : index
    %c7_44 = arith.constant 7 : index
    %c3_45 = arith.constant 3 : index
    %50 = vector.load %arg4[%c1_42, %c0_43, %c7_44, %c3_45] : memref<2x7x22x128xf32, #tpu.memory_space<vmem>>, vector<1x1x1x16xf32>
    %51 = vector.shape_cast %50 : vector<1x1x1x16xf32> to vector<1x16xf32>
    %52 = vector.shape_cast %49 : vector<1x16xf32> to vector<1x1x1x16xf32>
    tpu.vector_store %arg4[%c1_42, %c0_43, %c7_44, %c3_45], %52 {strides = array<i32>} : memref<2x7x22x128xf32, #tpu.memory_space<vmem>>, vector<1x1x1x16xf32>,
    %53 = vector.extract_strided_slice %3 {offsets = [0, 80], sizes = [1, 16], strides = [1, 1]} : vector<1x256xf32> to vector<1x16xf32>
    %c0_46 = arith.constant 0 : index
    %c0_47 = arith.constant 0 : index
    %c8 = arith.constant 8 : index
    %c3_48 = arith.constant 3 : index
    %54 = vector.load %arg4[%c0_46, %c0_47, %c8, %c3_48] : memref<2x7x22x128xf32, #tpu.memory_space<vmem>>, vector<1x1x1x16xf32>
    %55 = vector.shape_cast %54 : vector<1x1x1x16xf32> to vector<1x16xf32>
    %56 = vector.shape_cast %53 : vector<1x16xf32> to vector<1x1x1x16xf32>
    tpu.vector_store %arg4[%c0_46, %c0_47, %c8, %c3_48], %56 {strides = array<i32>} : memref<2x7x22x128xf32, #tpu.memory_space<vmem>>, vector<1x1x1x16xf32>,
    %57 = vector.extract_strided_slice %5 {offsets = [0, 80], sizes = [1, 16], strides = [1, 1]} : vector<1x256xf32> to vector<1x16xf32>
    %c1_49 = arith.constant 1 : index
    %c0_50 = arith.constant 0 : index
    %c8_51 = arith.constant 8 : index
    %c3_52 = arith.constant 3 : index
    %58 = vector.load %arg4[%c1_49, %c0_50, %c8_51, %c3_52] : memref<2x7x22x128xf32, #tpu.memory_space<vmem>>, vector<1x1x1x16xf32>
    %59 = vector.shape_cast %58 : vector<1x1x1x16xf32> to vector<1x16xf32>
    %60 = vector.shape_cast %57 : vector<1x16xf32> to vector<1x1x1x16xf32>
    tpu.vector_store %arg4[%c1_49, %c0_50, %c8_51, %c3_52], %60 {strides = array<i32>} : memref<2x7x22x128xf32, #tpu.memory_space<vmem>>, vector<1x1x1x16xf32>,
    %61 = vector.extract_strided_slice %3 {offsets = [0, 96], sizes = [1, 16], strides = [1, 1]} : vector<1x256xf32> to vector<1x16xf32>
    %c0_53 = arith.constant 0 : index
    %c0_54 = arith.constant 0 : index
    %c9 = arith.constant 9 : index
    %c3_55 = arith.constant 3 : index
    %62 = vector.load %arg4[%c0_53, %c0_54, %c9, %c3_55] : memref<2x7x22x128xf32, #tpu.memory_space<vmem>>, vector<1x1x1x16xf32>
    %63 = vector.shape_cast %62 : vector<1x1x1x16xf32> to vector<1x16xf32>
    %64 = vector.shape_cast %61 : vector<1x16xf32> to vector<1x1x1x16xf32>
    tpu.vector_store %arg4[%c0_53, %c0_54, %c9, %c3_55], %64 {strides = array<i32>} : memref<2x7x22x128xf32, #tpu.memory_space<vmem>>, vector<1x1x1x16xf32>,
    %65 = vector.extract_strided_slice %5 {offsets = [0, 96], sizes = [1, 16], strides = [1, 1]} : vector<1x256xf32> to vector<1x16xf32>
    %c1_56 = arith.constant 1 : index
    %c0_57 = arith.constant 0 : index
    %c9_58 = arith.constant 9 : index
    %c3_59 = arith.constant 3 : index
    %66 = vector.load %arg4[%c1_56, %c0_57, %c9_58, %c3_59] : memref<2x7x22x128xf32, #tpu.memory_space<vmem>>, vector<1x1x1x16xf32>
    %67 = vector.shape_cast %66 : vector<1x1x1x16xf32> to vector<1x16xf32>
    %68 = vector.shape_cast %65 : vector<1x16xf32> to vector<1x1x1x16xf32>
    tpu.vector_store %arg4[%c1_56, %c0_57, %c9_58, %c3_59], %68 {strides = array<i32>} : memref<2x7x22x128xf32, #tpu.memory_space<vmem>>, vector<1x1x1x16xf32>,
    %69 = vector.extract_strided_slice %3 {offsets = [0, 112], sizes = [1, 16], strides = [1, 1]} : vector<1x256xf32> to vector<1x16xf32>
    %c0_60 = arith.constant 0 : index
    %c0_61 = arith.constant 0 : index
    %c10 = arith.constant 10 : index
    %c3_62 = arith.constant 3 : index
    %70 = vector.load %arg4[%c0_60, %c0_61, %c10, %c3_62] : memref<2x7x22x128xf32, #tpu.memory_space<vmem>>, vector<1x1x1x16xf32>
    %71 = vector.shape_cast %70 : vector<1x1x1x16xf32> to vector<1x16xf32>
    %72 = vector.shape_cast %69 : vector<1x16xf32> to vector<1x1x1x16xf32>
    tpu.vector_store %arg4[%c0_60, %c0_61, %c10, %c3_62], %72 {strides = array<i32>} : memref<2x7x22x128xf32, #tpu.memory_space<vmem>>, vector<1x1x1x16xf32>,
    %73 = vector.extract_strided_slice %5 {offsets = [0, 112], sizes = [1, 16], strides = [1, 1]} : vector<1x256xf32> to vector<1x16xf32>
    %c1_63 = arith.constant 1 : index
    %c0_64 = arith.constant 0 : index
    %c10_65 = arith.constant 10 : index
    %c3_66 = arith.constant 3 : index
    %74 = vector.load %arg4[%c1_63, %c0_64, %c10_65, %c3_66] : memref<2x7x22x128xf32, #tpu.memory_space<vmem>>, vector<1x1x1x16xf32>
    %75 = vector.shape_cast %74 : vector<1x1x1x16xf32> to vector<1x16xf32>
    %76 = vector.shape_cast %73 : vector<1x16xf32> to vector<1x1x1x16xf32>
    tpu.vector_store %arg4[%c1_63, %c0_64, %c10_65, %c3_66], %76 {strides = array<i32>} : memref<2x7x22x128xf32, #tpu.memory_space<vmem>>, vector<1x1x1x16xf32>,
    %77 = vector.extract_strided_slice %3 {offsets = [0, 128], sizes = [1, 16], strides = [1, 1]} : vector<1x256xf32> to vector<1x16xf32>
    %c0_67 = arith.constant 0 : index
    %c0_68 = arith.constant 0 : index
    %c11 = arith.constant 11 : index
    %c3_69 = arith.constant 3 : index
    %78 = vector.load %arg4[%c0_67, %c0_68, %c11, %c3_69] : memref<2x7x22x128xf32, #tpu.memory_space<vmem>>, vector<1x1x1x16xf32>
    %79 = vector.shape_cast %78 : vector<1x1x1x16xf32> to vector<1x16xf32>
    %80 = vector.shape_cast %77 : vector<1x16xf32> to vector<1x1x1x16xf32>
    tpu.vector_store %arg4[%c0_67, %c0_68, %c11, %c3_69], %80 {strides = array<i32>} : memref<2x7x22x128xf32, #tpu.memory_space<vmem>>, vector<1x1x1x16xf32>,
    %81 = vector.extract_strided_slice %5 {offsets = [0, 128], sizes = [1, 16], strides = [1, 1]} : vector<1x256xf32> to vector<1x16xf32>
    %c1_70 = arith.constant 1 : index
    %c0_71 = arith.constant 0 : index
    %c11_72 = arith.constant 11 : index
    %c3_73 = arith.constant 3 : index
    %82 = vector.load %arg4[%c1_70, %c0_71, %c11_72, %c3_73] : memref<2x7x22x128xf32, #tpu.memory_space<vmem>>, vector<1x1x1x16xf32>
    %83 = vector.shape_cast %82 : vector<1x1x1x16xf32> to vector<1x16xf32>
    %84 = vector.shape_cast %81 : vector<1x16xf32> to vector<1x1x1x16xf32>
    tpu.vector_store %arg4[%c1_70, %c0_71, %c11_72, %c3_73], %84 {strides = array<i32>} : memref<2x7x22x128xf32, #tpu.memory_space<vmem>>, vector<1x1x1x16xf32>,
    %85 = vector.extract_strided_slice %3 {offsets = [0, 144], sizes = [1, 16], strides = [1, 1]} : vector<1x256xf32> to vector<1x16xf32>
    %c0_74 = arith.constant 0 : index
    %c0_75 = arith.constant 0 : index
    %c12 = arith.constant 12 : index
    %c3_76 = arith.constant 3 : index
    %86 = vector.load %arg4[%c0_74, %c0_75, %c12, %c3_76] : memref<2x7x22x128xf32, #tpu.memory_space<vmem>>, vector<1x1x1x16xf32>
    %87 = vector.shape_cast %86 : vector<1x1x1x16xf32> to vector<1x16xf32>
    %88 = vector.shape_cast %85 : vector<1x16xf32> to vector<1x1x1x16xf32>
    tpu.vector_store %arg4[%c0_74, %c0_75, %c12, %c3_76], %88 {strides = array<i32>} : memref<2x7x22x128xf32, #tpu.memory_space<vmem>>, vector<1x1x1x16xf32>,
    %89 = vector.extract_strided_slice %5 {offsets = [0, 144], sizes = [1, 16], strides = [1, 1]} : vector<1x256xf32> to vector<1x16xf32>
    %c1_77 = arith.constant 1 : index
    %c0_78 = arith.constant 0 : index
    %c12_79 = arith.constant 12 : index
    %c3_80 = arith.constant 3 : index
    %90 = vector.load %arg4[%c1_77, %c0_78, %c12_79, %c3_80] : memref<2x7x22x128xf32, #tpu.memory_space<vmem>>, vector<1x1x1x16xf32>
    %91 = vector.shape_cast %90 : vector<1x1x1x16xf32> to vector<1x16xf32>
    %92 = vector.shape_cast %89 : vector<1x16xf32> to vector<1x1x1x16xf32>
    tpu.vector_store %arg4[%c1_77, %c0_78, %c12_79, %c3_80], %92 {strides = array<i32>} : memref<2x7x22x128xf32, #tpu.memory_space<vmem>>, vector<1x1x1x16xf32>,
    %93 = vector.extract_strided_slice %3 {offsets = [0, 160], sizes = [1, 16], strides = [1, 1]} : vector<1x256xf32> to vector<1x16xf32>
    %c0_81 = arith.constant 0 : index
    %c0_82 = arith.constant 0 : index
    %c13 = arith.constant 13 : index
    %c3_83 = arith.constant 3 : index
    %94 = vector.load %arg4[%c0_81, %c0_82, %c13, %c3_83] : memref<2x7x22x128xf32, #tpu.memory_space<vmem>>, vector<1x1x1x16xf32>
    %95 = vector.shape_cast %94 : vector<1x1x1x16xf32> to vector<1x16xf32>
    %96 = vector.shape_cast %93 : vector<1x16xf32> to vector<1x1x1x16xf32>
    tpu.vector_store %arg4[%c0_81, %c0_82, %c13, %c3_83], %96 {strides = array<i32>} : memref<2x7x22x128xf32, #tpu.memory_space<vmem>>, vector<1x1x1x16xf32>,
    %97 = vector.extract_strided_slice %5 {offsets = [0, 160], sizes = [1, 16], strides = [1, 1]} : vector<1x256xf32> to vector<1x16xf32>
    %c1_84 = arith.constant 1 : index
    %c0_85 = arith.constant 0 : index
    %c13_86 = arith.constant 13 : index
    %c3_87 = arith.constant 3 : index
    %98 = vector.load %arg4[%c1_84, %c0_85, %c13_86, %c3_87] : memref<2x7x22x128xf32, #tpu.memory_space<vmem>>, vector<1x1x1x16xf32>
    %99 = vector.shape_cast %98 : vector<1x1x1x16xf32> to vector<1x16xf32>
    %100 = vector.shape_cast %97 : vector<1x16xf32> to vector<1x1x1x16xf32>
    tpu.vector_store %arg4[%c1_84, %c0_85, %c13_86, %c3_87], %100 {strides = array<i32>} : memref<2x7x22x128xf32, #tpu.memory_space<vmem>>, vector<1x1x1x16xf32>,
    %101 = vector.extract_strided_slice %3 {offsets = [0, 176], sizes = [1, 16], strides = [1, 1]} : vector<1x256xf32> to vector<1x16xf32>
    %c0_88 = arith.constant 0 : index
    %c0_89 = arith.constant 0 : index
    %c14 = arith.constant 14 : index
    %c3_90 = arith.constant 3 : index
    %102 = vector.load %arg4[%c0_88, %c0_89, %c14, %c3_90] : memref<2x7x22x128xf32, #tpu.memory_space<vmem>>, vector<1x1x1x16xf32>
    %103 = vector.shape_cast %102 : vector<1x1x1x16xf32> to vector<1x16xf32>
    %104 = vector.shape_cast %101 : vector<1x16xf32> to vector<1x1x1x16xf32>
    tpu.vector_store %arg4[%c0_88, %c0_89, %c14, %c3_90], %104 {strides = array<i32>} : memref<2x7x22x128xf32, #tpu.memory_space<vmem>>, vector<1x1x1x16xf32>,
    %105 = vector.extract_strided_slice %5 {offsets = [0, 176], sizes = [1, 16], strides = [1, 1]} : vector<1x256xf32> to vector<1x16xf32>
    %c1_91 = arith.constant 1 : index
    %c0_92 = arith.constant 0 : index
    %c14_93 = arith.constant 14 : index
    %c3_94 = arith.constant 3 : index
    %106 = vector.load %arg4[%c1_91, %c0_92, %c14_93, %c3_94] : memref<2x7x22x128xf32, #tpu.memory_space<vmem>>, vector<1x1x1x16xf32>
    %107 = vector.shape_cast %106 : vector<1x1x1x16xf32> to vector<1x16xf32>
    %108 = vector.shape_cast %105 : vector<1x16xf32> to vector<1x1x1x16xf32>
    tpu.vector_store %arg4[%c1_91, %c0_92, %c14_93, %c3_94], %108 {strides = array<i32>} : memref<2x7x22x128xf32, #tpu.memory_space<vmem>>, vector<1x1x1x16xf32>,
    %109 = vector.extract_strided_slice %3 {offsets = [0, 192], sizes = [1, 16], strides = [1, 1]} : vector<1x256xf32> to vector<1x16xf32>
    %c0_95 = arith.constant 0 : index
    %c0_96 = arith.constant 0 : index
    %c15 = arith.constant 15 : index
    %c3_97 = arith.constant 3 : index
    %110 = vector.load %arg4[%c0_95, %c0_96, %c15, %c3_97] : memref<2x7x22x128xf32, #tpu.memory_space<vmem>>, vector<1x1x1x16xf32>
    %111 = vector.shape_cast %110 : vector<1x1x1x16xf32> to vector<1x16xf32>
    %112 = vector.shape_cast %109 : vector<1x16xf32> to vector<1x1x1x16xf32>
    tpu.vector_store %arg4[%c0_95, %c0_96, %c15, %c3_97], %112 {strides = array<i32>} : memref<2x7x22x128xf32, #tpu.memory_space<vmem>>, vector<1x1x1x16xf32>,
    %113 = vector.extract_strided_slice %5 {offsets = [0, 192], sizes = [1, 16], strides = [1, 1]} : vector<1x256xf32> to vector<1x16xf32>
    %c1_98 = arith.constant 1 : index
    %c0_99 = arith.constant 0 : index
    %c15_100 = arith.constant 15 : index
    %c3_101 = arith.constant 3 : index
    %114 = vector.load %arg4[%c1_98, %c0_99, %c15_100, %c3_101] : memref<2x7x22x128xf32, #tpu.memory_space<vmem>>, vector<1x1x1x16xf32>
    %115 = vector.shape_cast %114 : vector<1x1x1x16xf32> to vector<1x16xf32>
    %116 = vector.shape_cast %113 : vector<1x16xf32> to vector<1x1x1x16xf32>
    tpu.vector_store %arg4[%c1_98, %c0_99, %c15_100, %c3_101], %116 {strides = array<i32>} : memref<2x7x22x128xf32, #tpu.memory_space<vmem>>, vector<1x1x1x16xf32>,
    %117 = vector.extract_strided_slice %3 {offsets = [0, 208], sizes = [1, 16], strides = [1, 1]} : vector<1x256xf32> to vector<1x16xf32>
    %c0_102 = arith.constant 0 : index
    %c0_103 = arith.constant 0 : index
    %c16 = arith.constant 16 : index
    %c3_104 = arith.constant 3 : index
    %118 = vector.load %arg4[%c0_102, %c0_103, %c16, %c3_104] : memref<2x7x22x128xf32, #tpu.memory_space<vmem>>, vector<1x1x1x16xf32>
    %119 = vector.shape_cast %118 : vector<1x1x1x16xf32> to vector<1x16xf32>
    %120 = vector.shape_cast %117 : vector<1x16xf32> to vector<1x1x1x16xf32>
    tpu.vector_store %arg4[%c0_102, %c0_103, %c16, %c3_104], %120 {strides = array<i32>} : memref<2x7x22x128xf32, #tpu.memory_space<vmem>>, vector<1x1x1x16xf32>,
    %121 = vector.extract_strided_slice %5 {offsets = [0, 208], sizes = [1, 16], strides = [1, 1]} : vector<1x256xf32> to vector<1x16xf32>
    %c1_105 = arith.constant 1 : index
    %c0_106 = arith.constant 0 : index
    %c16_107 = arith.constant 16 : index
    %c3_108 = arith.constant 3 : index
    %122 = vector.load %arg4[%c1_105, %c0_106, %c16_107, %c3_108] : memref<2x7x22x128xf32, #tpu.memory_space<vmem>>, vector<1x1x1x16xf32>
    %123 = vector.shape_cast %122 : vector<1x1x1x16xf32> to vector<1x16xf32>
    %124 = vector.shape_cast %121 : vector<1x16xf32> to vector<1x1x1x16xf32>
    tpu.vector_store %arg4[%c1_105, %c0_106, %c16_107, %c3_108], %124 {strides = array<i32>} : memref<2x7x22x128xf32, #tpu.memory_space<vmem>>, vector<1x1x1x16xf32>,
    %125 = vector.extract_strided_slice %3 {offsets = [0, 224], sizes = [1, 16], strides = [1, 1]} : vector<1x256xf32> to vector<1x16xf32>
    %c0_109 = arith.constant 0 : index
    %c0_110 = arith.constant 0 : index
    %c17 = arith.constant 17 : index
    %c3_111 = arith.constant 3 : index
    %126 = vector.load %arg4[%c0_109, %c0_110, %c17, %c3_111] : memref<2x7x22x128xf32, #tpu.memory_space<vmem>>, vector<1x1x1x16xf32>
    %127 = vector.shape_cast %126 : vector<1x1x1x16xf32> to vector<1x16xf32>
    %128 = vector.shape_cast %125 : vector<1x16xf32> to vector<1x1x1x16xf32>
    tpu.vector_store %arg4[%c0_109, %c0_110, %c17, %c3_111], %128 {strides = array<i32>} : memref<2x7x22x128xf32, #tpu.memory_space<vmem>>, vector<1x1x1x16xf32>,
    %129 = vector.extract_strided_slice %5 {offsets = [0, 224], sizes = [1, 16], strides = [1, 1]} : vector<1x256xf32> to vector<1x16xf32>
    %c1_112 = arith.constant 1 : index
    %c0_113 = arith.constant 0 : index
    %c17_114 = arith.constant 17 : index
    %c3_115 = arith.constant 3 : index
    %130 = vector.load %arg4[%c1_112, %c0_113, %c17_114, %c3_115] : memref<2x7x22x128xf32, #tpu.memory_space<vmem>>, vector<1x1x1x16xf32>
    %131 = vector.shape_cast %130 : vector<1x1x1x16xf32> to vector<1x16xf32>
    %132 = vector.shape_cast %129 : vector<1x16xf32> to vector<1x1x1x16xf32>
    tpu.vector_store %arg4[%c1_112, %c0_113, %c17_114, %c3_115], %132 {strides = array<i32>} : memref<2x7x22x128xf32, #tpu.memory_space<vmem>>, vector<1x1x1x16xf32>,
    %133 = vector.extract_strided_slice %3 {offsets = [0, 240], sizes = [1, 16], strides = [1, 1]} : vector<1x256xf32> to vector<1x16xf32>
    %c0_116 = arith.constant 0 : index
    %c0_117 = arith.constant 0 : index
    %c18 = arith.constant 18 : index
    %c3_118 = arith.constant 3 : index
    %134 = vector.load %arg4[%c0_116, %c0_117, %c18, %c3_118] : memref<2x7x22x128xf32, #tpu.memory_space<vmem>>, vector<1x1x1x16xf32>
    %135 = vector.shape_cast %134 : vector<1x1x1x16xf32> to vector<1x16xf32>
    %136 = vector.shape_cast %133 : vector<1x16xf32> to vector<1x1x1x16xf32>
    tpu.vector_store %arg4[%c0_116, %c0_117, %c18, %c3_118], %136 {strides = array<i32>} : memref<2x7x22x128xf32, #tpu.memory_space<vmem>>, vector<1x1x1x16xf32>,
    %137 = vector.extract_strided_slice %5 {offsets = [0, 240], sizes = [1, 16], strides = [1, 1]} : vector<1x256xf32> to vector<1x16xf32>
    %c1_119 = arith.constant 1 : index
    %c0_120 = arith.constant 0 : index
    %c18_121 = arith.constant 18 : index
    %c3_122 = arith.constant 3 : index
    %138 = vector.load %arg4[%c1_119, %c0_120, %c18_121, %c3_122] : memref<2x7x22x128xf32, #tpu.memory_space<vmem>>, vector<1x1x1x16xf32>
    %139 = vector.shape_cast %138 : vector<1x1x1x16xf32> to vector<1x16xf32>
    %140 = vector.shape_cast %137 : vector<1x16xf32> to vector<1x1x1x16xf32>
    tpu.vector_store %arg4[%c1_119, %c0_120, %c18_121, %c3_122], %140 {strides = array<i32>} : memref<2x7x22x128xf32, #tpu.memory_space<vmem>>, vector<1x1x1x16xf32>,
    %c0_123 = arith.constant 0 : index
    %c0_124 = arith.constant 0 : index
    %c0_125 = arith.constant 0 : index
    %c0_126 = arith.constant 0 : index
    %141 = vector.load %arg4[%c0_123, %c0_124, %c0_125, %c0_126] : memref<2x7x22x128xf32, #tpu.memory_space<vmem>>, vector<1x1x22x128xf32>
    %142 = vector.shape_cast %141 : vector<1x1x22x128xf32> to vector<22x128xf32>
    %143 = vector.extract_strided_slice %142 {offsets = [0, 1], sizes = [22, 127], strides = [1, 1]} : vector<22x128xf32> to vector<22x127xf32>
    %c0_127 = arith.constant 0 : index
    %c1_128 = arith.constant 1 : index
    %c0_129 = arith.constant 0 : index
    %c0_130 = arith.constant 0 : index
    %144 = vector.load %arg4[%c0_127, %c1_128, %c0_129, %c0_130] : memref<2x7x22x128xf32, #tpu.memory_space<vmem>>, vector<1x1x22x127xf32>
    %145 = vector.shape_cast %144 : vector<1x1x22x127xf32> to vector<22x127xf32>
    %146 = vector.shape_cast %143 : vector<22x127xf32> to vector<1x1x22x127xf32>
    tpu.vector_store %arg4[%c0_127, %c1_128, %c0_129, %c0_130], %146 {strides = array<i32>} : memref<2x7x22x128xf32, #tpu.memory_space<vmem>>, vector<1x1x22x127xf32>,
    %147 = vector.extract_strided_slice %142 {offsets = [0, 2], sizes = [22, 126], strides = [1, 1]} : vector<22x128xf32> to vector<22x126xf32>
    %c0_131 = arith.constant 0 : index
    %c2 = arith.constant 2 : index
    %c0_132 = arith.constant 0 : index
    %c0_133 = arith.constant 0 : index
    %148 = vector.load %arg4[%c0_131, %c2, %c0_132, %c0_133] : memref<2x7x22x128xf32, #tpu.memory_space<vmem>>, vector<1x1x22x126xf32>
    %149 = vector.shape_cast %148 : vector<1x1x22x126xf32> to vector<22x126xf32>
    %150 = vector.shape_cast %147 : vector<22x126xf32> to vector<1x1x22x126xf32>
    tpu.vector_store %arg4[%c0_131, %c2, %c0_132, %c0_133], %150 {strides = array<i32>} : memref<2x7x22x128xf32, #tpu.memory_space<vmem>>, vector<1x1x22x126xf32>,
    %151 = vector.extract_strided_slice %142 {offsets = [0, 3], sizes = [22, 125], strides = [1, 1]} : vector<22x128xf32> to vector<22x125xf32>
    %c0_134 = arith.constant 0 : index
    %c3_135 = arith.constant 3 : index
    %c0_136 = arith.constant 0 : index
    %c0_137 = arith.constant 0 : index
    %152 = vector.load %arg4[%c0_134, %c3_135, %c0_136, %c0_137] : memref<2x7x22x128xf32, #tpu.memory_space<vmem>>, vector<1x1x22x125xf32>
    %153 = vector.shape_cast %152 : vector<1x1x22x125xf32> to vector<22x125xf32>
    %154 = vector.shape_cast %151 : vector<22x125xf32> to vector<1x1x22x125xf32>
    tpu.vector_store %arg4[%c0_134, %c3_135, %c0_136, %c0_137], %154 {strides = array<i32>} : memref<2x7x22x128xf32, #tpu.memory_space<vmem>>, vector<1x1x22x125xf32>,
    %155 = vector.extract_strided_slice %142 {offsets = [0, 4], sizes = [22, 124], strides = [1, 1]} : vector<22x128xf32> to vector<22x124xf32>
    %c0_138 = arith.constant 0 : index
    %c4_139 = arith.constant 4 : index
    %c0_140 = arith.constant 0 : index
    %c0_141 = arith.constant 0 : index
    %156 = vector.load %arg4[%c0_138, %c4_139, %c0_140, %c0_141] : memref<2x7x22x128xf32, #tpu.memory_space<vmem>>, vector<1x1x22x124xf32>
    %157 = vector.shape_cast %156 : vector<1x1x22x124xf32> to vector<22x124xf32>
    %158 = vector.shape_cast %155 : vector<22x124xf32> to vector<1x1x22x124xf32>
    tpu.vector_store %arg4[%c0_138, %c4_139, %c0_140, %c0_141], %158 {strides = array<i32>} : memref<2x7x22x128xf32, #tpu.memory_space<vmem>>, vector<1x1x22x124xf32>,
    %159 = vector.extract_strided_slice %142 {offsets = [0, 5], sizes = [22, 123], strides = [1, 1]} : vector<22x128xf32> to vector<22x123xf32>
    %c0_142 = arith.constant 0 : index
    %c5_143 = arith.constant 5 : index
    %c0_144 = arith.constant 0 : index
    %c0_145 = arith.constant 0 : index
    %160 = vector.load %arg4[%c0_142, %c5_143, %c0_144, %c0_145] : memref<2x7x22x128xf32, #tpu.memory_space<vmem>>, vector<1x1x22x123xf32>
    %161 = vector.shape_cast %160 : vector<1x1x22x123xf32> to vector<22x123xf32>
    %162 = vector.shape_cast %159 : vector<22x123xf32> to vector<1x1x22x123xf32>
    tpu.vector_store %arg4[%c0_142, %c5_143, %c0_144, %c0_145], %162 {strides = array<i32>} : memref<2x7x22x128xf32, #tpu.memory_space<vmem>>, vector<1x1x22x123xf32>,
    %163 = vector.extract_strided_slice %142 {offsets = [0, 6], sizes = [22, 122], strides = [1, 1]} : vector<22x128xf32> to vector<22x122xf32>
    %c0_146 = arith.constant 0 : index
    %c6_147 = arith.constant 6 : index
    %c0_148 = arith.constant 0 : index
    %c0_149 = arith.constant 0 : index
    %164 = vector.load %arg4[%c0_146, %c6_147, %c0_148, %c0_149] : memref<2x7x22x128xf32, #tpu.memory_space<vmem>>, vector<1x1x22x122xf32>
    %165 = vector.shape_cast %164 : vector<1x1x22x122xf32> to vector<22x122xf32>
    %166 = vector.shape_cast %163 : vector<22x122xf32> to vector<1x1x22x122xf32>
    tpu.vector_store %arg4[%c0_146, %c6_147, %c0_148, %c0_149], %166 {strides = array<i32>} : memref<2x7x22x128xf32, #tpu.memory_space<vmem>>, vector<1x1x22x122xf32>,
    %c1_150 = arith.constant 1 : index
    %c0_151 = arith.constant 0 : index
    %c0_152 = arith.constant 0 : index
    %c0_153 = arith.constant 0 : index
    %167 = vector.load %arg4[%c1_150, %c0_151, %c0_152, %c0_153] : memref<2x7x22x128xf32, #tpu.memory_space<vmem>>, vector<1x1x22x128xf32>
    %168 = vector.shape_cast %167 : vector<1x1x22x128xf32> to vector<22x128xf32>
    %169 = vector.extract_strided_slice %168 {offsets = [0, 1], sizes = [22, 127], strides = [1, 1]} : vector<22x128xf32> to vector<22x127xf32>
    %c1_154 = arith.constant 1 : index
    %c1_155 = arith.constant 1 : index
    %c0_156 = arith.constant 0 : index
    %c0_157 = arith.constant 0 : index
    %170 = vector.load %arg4[%c1_154, %c1_155, %c0_156, %c0_157] : memref<2x7x22x128xf32, #tpu.memory_space<vmem>>, vector<1x1x22x127xf32>
    %171 = vector.shape_cast %170 : vector<1x1x22x127xf32> to vector<22x127xf32>
    %172 = vector.shape_cast %169 : vector<22x127xf32> to vector<1x1x22x127xf32>
    tpu.vector_store %arg4[%c1_154, %c1_155, %c0_156, %c0_157], %172 {strides = array<i32>} : memref<2x7x22x128xf32, #tpu.memory_space<vmem>>, vector<1x1x22x127xf32>,
    %173 = vector.extract_strided_slice %168 {offsets = [0, 2], sizes = [22, 126], strides = [1, 1]} : vector<22x128xf32> to vector<22x126xf32>
    %c1_158 = arith.constant 1 : index
    %c2_159 = arith.constant 2 : index
    %c0_160 = arith.constant 0 : index
    %c0_161 = arith.constant 0 : index
    %174 = vector.load %arg4[%c1_158, %c2_159, %c0_160, %c0_161] : memref<2x7x22x128xf32, #tpu.memory_space<vmem>>, vector<1x1x22x126xf32>
    %175 = vector.shape_cast %174 : vector<1x1x22x126xf32> to vector<22x126xf32>
    %176 = vector.shape_cast %173 : vector<22x126xf32> to vector<1x1x22x126xf32>
    tpu.vector_store %arg4[%c1_158, %c2_159, %c0_160, %c0_161], %176 {strides = array<i32>} : memref<2x7x22x128xf32, #tpu.memory_space<vmem>>, vector<1x1x22x126xf32>,
    %177 = vector.extract_strided_slice %168 {offsets = [0, 3], sizes = [22, 125], strides = [1, 1]} : vector<22x128xf32> to vector<22x125xf32>
    %c1_162 = arith.constant 1 : index
    %c3_163 = arith.constant 3 : index
    %c0_164 = arith.constant 0 : index
    %c0_165 = arith.constant 0 : index
    %178 = vector.load %arg4[%c1_162, %c3_163, %c0_164, %c0_165] : memref<2x7x22x128xf32, #tpu.memory_space<vmem>>, vector<1x1x22x125xf32>
    %179 = vector.shape_cast %178 : vector<1x1x22x125xf32> to vector<22x125xf32>
    %180 = vector.shape_cast %177 : vector<22x125xf32> to vector<1x1x22x125xf32>
    tpu.vector_store %arg4[%c1_162, %c3_163, %c0_164, %c0_165], %180 {strides = array<i32>} : memref<2x7x22x128xf32, #tpu.memory_space<vmem>>, vector<1x1x22x125xf32>,
    %181 = vector.extract_strided_slice %168 {offsets = [0, 4], sizes = [22, 124], strides = [1, 1]} : vector<22x128xf32> to vector<22x124xf32>
    %c1_166 = arith.constant 1 : index
    %c4_167 = arith.constant 4 : index
    %c0_168 = arith.constant 0 : index
    %c0_169 = arith.constant 0 : index
    %182 = vector.load %arg4[%c1_166, %c4_167, %c0_168, %c0_169] : memref<2x7x22x128xf32, #tpu.memory_space<vmem>>, vector<1x1x22x124xf32>
    %183 = vector.shape_cast %182 : vector<1x1x22x124xf32> to vector<22x124xf32>
    %184 = vector.shape_cast %181 : vector<22x124xf32> to vector<1x1x22x124xf32>
    tpu.vector_store %arg4[%c1_166, %c4_167, %c0_168, %c0_169], %184 {strides = array<i32>} : memref<2x7x22x128xf32, #tpu.memory_space<vmem>>, vector<1x1x22x124xf32>,
    %185 = vector.extract_strided_slice %168 {offsets = [0, 5], sizes = [22, 123], strides = [1, 1]} : vector<22x128xf32> to vector<22x123xf32>
    %c1_170 = arith.constant 1 : index
    %c5_171 = arith.constant 5 : index
    %c0_172 = arith.constant 0 : index
    %c0_173 = arith.constant 0 : index
    %186 = vector.load %arg4[%c1_170, %c5_171, %c0_172, %c0_173] : memref<2x7x22x128xf32, #tpu.memory_space<vmem>>, vector<1x1x22x123xf32>
    %187 = vector.shape_cast %186 : vector<1x1x22x123xf32> to vector<22x123xf32>
    %188 = vector.shape_cast %185 : vector<22x123xf32> to vector<1x1x22x123xf32>
    tpu.vector_store %arg4[%c1_170, %c5_171, %c0_172, %c0_173], %188 {strides = array<i32>} : memref<2x7x22x128xf32, #tpu.memory_space<vmem>>, vector<1x1x22x123xf32>,
    %189 = vector.extract_strided_slice %168 {offsets = [0, 6], sizes = [22, 122], strides = [1, 1]} : vector<22x128xf32> to vector<22x122xf32>
    %c1_174 = arith.constant 1 : index
    %c6_175 = arith.constant 6 : index
    %c0_176 = arith.constant 0 : index
    %c0_177 = arith.constant 0 : index
    %190 = vector.load %arg4[%c1_174, %c6_175, %c0_176, %c0_177] : memref<2x7x22x128xf32, #tpu.memory_space<vmem>>, vector<1x1x22x122xf32>
    %191 = vector.shape_cast %190 : vector<1x1x22x122xf32> to vector<22x122xf32>
    %192 = vector.shape_cast %189 : vector<22x122xf32> to vector<1x1x22x122xf32>
    tpu.vector_store %arg4[%c1_174, %c6_175, %c0_176, %c0_177], %192 {strides = array<i32>} : memref<2x7x22x128xf32, #tpu.memory_space<vmem>>, vector<1x1x22x122xf32>,
    %cst_178 = arith.constant 0.000000e+00 : f32
    %193 = vector.broadcast %cst_178 : f32 to vector<16x128xf32>
    %cst_179 = arith.constant 0.000000e+00 : f32
    %194 = vector.broadcast %cst_179 : f32 to vector<16x128xf32>
    %cst_180 = arith.constant 0.000000e+00 : f32
    %195 = vector.broadcast %cst_180 : f32 to vector<16x128xf32>
    %cst_181 = arith.constant 0.000000e+00 : f32
    %196 = vector.broadcast %cst_181 : f32 to vector<16x128xf32>
    %c0_182 = arith.constant 0 : index
    %197 = memref.load %arg2[%c0_182] : memref<98xf32, #tpu.memory_space<smem>>
    %c0_183 = arith.constant 0 : index
    %c0_184 = arith.constant 0 : index
    %c0_185 = arith.constant 0 : index
    %c0_186 = arith.constant 0 : index
    %198 = vector.load %arg4[%c0_183, %c0_184, %c0_185, %c0_186] : memref<2x7x22x128xf32, #tpu.memory_space<vmem>>, vector<1x1x16x128xf32>
    %199 = vector.shape_cast %198 : vector<1x1x16x128xf32> to vector<16x128xf32>
    %200 = vector.broadcast %197 : f32 to vector<16x128xf32>
    %201 = arith.mulf %200, %199 : vector<16x128xf32>
    %202 = arith.addf %193, %201 : vector<16x128xf32>
    %c1_187 = arith.constant 1 : index
    %203 = memref.load %arg2[%c1_187] : memref<98xf32, #tpu.memory_space<smem>>
    %c0_188 = arith.constant 0 : index
    %c1_189 = arith.constant 1 : index
    %c0_190 = arith.constant 0 : index
    %c0_191 = arith.constant 0 : index
    %204 = vector.load %arg4[%c0_188, %c1_189, %c0_190, %c0_191] : memref<2x7x22x128xf32, #tpu.memory_space<vmem>>, vector<1x1x16x128xf32>
    %205 = vector.shape_cast %204 : vector<1x1x16x128xf32> to vector<16x128xf32>
    %206 = vector.broadcast %203 : f32 to vector<16x128xf32>
    %207 = arith.mulf %206, %205 : vector<16x128xf32>
    %208 = arith.addf %202, %207 : vector<16x128xf32>
    %c2_192 = arith.constant 2 : index
    %209 = memref.load %arg2[%c2_192] : memref<98xf32, #tpu.memory_space<smem>>
    %c0_193 = arith.constant 0 : index
    %c2_194 = arith.constant 2 : index
    %c0_195 = arith.constant 0 : index
    %c0_196 = arith.constant 0 : index
    %210 = vector.load %arg4[%c0_193, %c2_194, %c0_195, %c0_196] : memref<2x7x22x128xf32, #tpu.memory_space<vmem>>, vector<1x1x16x128xf32>
    %211 = vector.shape_cast %210 : vector<1x1x16x128xf32> to vector<16x128xf32>
    %212 = vector.broadcast %209 : f32 to vector<16x128xf32>
    %213 = arith.mulf %212, %211 : vector<16x128xf32>
    %214 = arith.addf %208, %213 : vector<16x128xf32>
    %c3_197 = arith.constant 3 : index
    %215 = memref.load %arg2[%c3_197] : memref<98xf32, #tpu.memory_space<smem>>
    %c0_198 = arith.constant 0 : index
    %c3_199 = arith.constant 3 : index
    %c0_200 = arith.constant 0 : index
    %c0_201 = arith.constant 0 : index
    %216 = vector.load %arg4[%c0_198, %c3_199, %c0_200, %c0_201] : memref<2x7x22x128xf32, #tpu.memory_space<vmem>>, vector<1x1x16x128xf32>
    %217 = vector.shape_cast %216 : vector<1x1x16x128xf32> to vector<16x128xf32>
    %218 = vector.broadcast %215 : f32 to vector<16x128xf32>
    %219 = arith.mulf %218, %217 : vector<16x128xf32>
    %220 = arith.addf %214, %219 : vector<16x128xf32>
    %c4_202 = arith.constant 4 : index
    %221 = memref.load %arg2[%c4_202] : memref<98xf32, #tpu.memory_space<smem>>
    %c0_203 = arith.constant 0 : index
    %c4_204 = arith.constant 4 : index
    %c0_205 = arith.constant 0 : index
    %c0_206 = arith.constant 0 : index
    %222 = vector.load %arg4[%c0_203, %c4_204, %c0_205, %c0_206] : memref<2x7x22x128xf32, #tpu.memory_space<vmem>>, vector<1x1x16x128xf32>
    %223 = vector.shape_cast %222 : vector<1x1x16x128xf32> to vector<16x128xf32>
    %224 = vector.broadcast %221 : f32 to vector<16x128xf32>
    %225 = arith.mulf %224, %223 : vector<16x128xf32>
    %226 = arith.addf %220, %225 : vector<16x128xf32>
    %c5_207 = arith.constant 5 : index
    %227 = memref.load %arg2[%c5_207] : memref<98xf32, #tpu.memory_space<smem>>
    %c0_208 = arith.constant 0 : index
    %c5_209 = arith.constant 5 : index
    %c0_210 = arith.constant 0 : index
    %c0_211 = arith.constant 0 : index
    %228 = vector.load %arg4[%c0_208, %c5_209, %c0_210, %c0_211] : memref<2x7x22x128xf32, #tpu.memory_space<vmem>>, vector<1x1x16x128xf32>
    %229 = vector.shape_cast %228 : vector<1x1x16x128xf32> to vector<16x128xf32>
    %230 = vector.broadcast %227 : f32 to vector<16x128xf32>
    %231 = arith.mulf %230, %229 : vector<16x128xf32>
    %232 = arith.addf %226, %231 : vector<16x128xf32>
    %c6_212 = arith.constant 6 : index
    %233 = memref.load %arg2[%c6_212] : memref<98xf32, #tpu.memory_space<smem>>
    %c0_213 = arith.constant 0 : index
    %c6_214 = arith.constant 6 : index
    %c0_215 = arith.constant 0 : index
    %c0_216 = arith.constant 0 : index
    %234 = vector.load %arg4[%c0_213, %c6_214, %c0_215, %c0_216] : memref<2x7x22x128xf32, #tpu.memory_space<vmem>>, vector<1x1x16x128xf32>
    %235 = vector.shape_cast %234 : vector<1x1x16x128xf32> to vector<16x128xf32>
    %236 = vector.broadcast %233 : f32 to vector<16x128xf32>
    %237 = arith.mulf %236, %235 : vector<16x128xf32>
    %238 = arith.addf %232, %237 : vector<16x128xf32>
    %c7_217 = arith.constant 7 : index
    %239 = memref.load %arg2[%c7_217] : memref<98xf32, #tpu.memory_space<smem>>
    %c0_218 = arith.constant 0 : index
    %c0_219 = arith.constant 0 : index
    %c1_220 = arith.constant 1 : index
    %c0_221 = arith.constant 0 : index
    %240 = vector.load %arg4[%c0_218, %c0_219, %c1_220, %c0_221] : memref<2x7x22x128xf32, #tpu.memory_space<vmem>>, vector<1x1x16x128xf32>
    %241 = vector.shape_cast %240 : vector<1x1x16x128xf32> to vector<16x128xf32>
    %242 = vector.broadcast %239 : f32 to vector<16x128xf32>
    %243 = arith.mulf %242, %241 : vector<16x128xf32>
    %244 = arith.addf %194, %243 : vector<16x128xf32>
    %c8_222 = arith.constant 8 : index
    %245 = memref.load %arg2[%c8_222] : memref<98xf32, #tpu.memory_space<smem>>
    %c0_223 = arith.constant 0 : index
    %c1_224 = arith.constant 1 : index
    %c1_225 = arith.constant 1 : index
    %c0_226 = arith.constant 0 : index
    %246 = vector.load %arg4[%c0_223, %c1_224, %c1_225, %c0_226] : memref<2x7x22x128xf32, #tpu.memory_space<vmem>>, vector<1x1x16x128xf32>
    %247 = vector.shape_cast %246 : vector<1x1x16x128xf32> to vector<16x128xf32>
    %248 = vector.broadcast %245 : f32 to vector<16x128xf32>
    %249 = arith.mulf %248, %247 : vector<16x128xf32>
    %250 = arith.addf %244, %249 : vector<16x128xf32>
    %c9_227 = arith.constant 9 : index
    %251 = memref.load %arg2[%c9_227] : memref<98xf32, #tpu.memory_space<smem>>
    %c0_228 = arith.constant 0 : index
    %c2_229 = arith.constant 2 : index
    %c1_230 = arith.constant 1 : index
    %c0_231 = arith.constant 0 : index
    %252 = vector.load %arg4[%c0_228, %c2_229, %c1_230, %c0_231] : memref<2x7x22x128xf32, #tpu.memory_space<vmem>>, vector<1x1x16x128xf32>
    %253 = vector.shape_cast %252 : vector<1x1x16x128xf32> to vector<16x128xf32>
    %254 = vector.broadcast %251 : f32 to vector<16x128xf32>
    %255 = arith.mulf %254, %253 : vector<16x128xf32>
    %256 = arith.addf %250, %255 : vector<16x128xf32>
    %c10_232 = arith.constant 10 : index
    %257 = memref.load %arg2[%c10_232] : memref<98xf32, #tpu.memory_space<smem>>
    %c0_233 = arith.constant 0 : index
    %c3_234 = arith.constant 3 : index
    %c1_235 = arith.constant 1 : index
    %c0_236 = arith.constant 0 : index
    %258 = vector.load %arg4[%c0_233, %c3_234, %c1_235, %c0_236] : memref<2x7x22x128xf32, #tpu.memory_space<vmem>>, vector<1x1x16x128xf32>
    %259 = vector.shape_cast %258 : vector<1x1x16x128xf32> to vector<16x128xf32>
    %260 = vector.broadcast %257 : f32 to vector<16x128xf32>
    %261 = arith.mulf %260, %259 : vector<16x128xf32>
    %262 = arith.addf %256, %261 : vector<16x128xf32>
    %c11_237 = arith.constant 11 : index
    %263 = memref.load %arg2[%c11_237] : memref<98xf32, #tpu.memory_space<smem>>
    %c0_238 = arith.constant 0 : index
    %c4_239 = arith.constant 4 : index
    %c1_240 = arith.constant 1 : index
    %c0_241 = arith.constant 0 : index
    %264 = vector.load %arg4[%c0_238, %c4_239, %c1_240, %c0_241] : memref<2x7x22x128xf32, #tpu.memory_space<vmem>>, vector<1x1x16x128xf32>
    %265 = vector.shape_cast %264 : vector<1x1x16x128xf32> to vector<16x128xf32>
    %266 = vector.broadcast %263 : f32 to vector<16x128xf32>
    %267 = arith.mulf %266, %265 : vector<16x128xf32>
    %268 = arith.addf %262, %267 : vector<16x128xf32>
    %c12_242 = arith.constant 12 : index
    %269 = memref.load %arg2[%c12_242] : memref<98xf32, #tpu.memory_space<smem>>
    %c0_243 = arith.constant 0 : index
    %c5_244 = arith.constant 5 : index
    %c1_245 = arith.constant 1 : index
    %c0_246 = arith.constant 0 : index
    %270 = vector.load %arg4[%c0_243, %c5_244, %c1_245, %c0_246] : memref<2x7x22x128xf32, #tpu.memory_space<vmem>>, vector<1x1x16x128xf32>
    %271 = vector.shape_cast %270 : vector<1x1x16x128xf32> to vector<16x128xf32>
    %272 = vector.broadcast %269 : f32 to vector<16x128xf32>
    %273 = arith.mulf %272, %271 : vector<16x128xf32>
    %274 = arith.addf %268, %273 : vector<16x128xf32>
    %c13_247 = arith.constant 13 : index
    %275 = memref.load %arg2[%c13_247] : memref<98xf32, #tpu.memory_space<smem>>
    %c0_248 = arith.constant 0 : index
    %c6_249 = arith.constant 6 : index
    %c1_250 = arith.constant 1 : index
    %c0_251 = arith.constant 0 : index
    %276 = vector.load %arg4[%c0_248, %c6_249, %c1_250, %c0_251] : memref<2x7x22x128xf32, #tpu.memory_space<vmem>>, vector<1x1x16x128xf32>
    %277 = vector.shape_cast %276 : vector<1x1x16x128xf32> to vector<16x128xf32>
    %278 = vector.broadcast %275 : f32 to vector<16x128xf32>
    %279 = arith.mulf %278, %277 : vector<16x128xf32>
    %280 = arith.addf %274, %279 : vector<16x128xf32>
    %c14_252 = arith.constant 14 : index
    %281 = memref.load %arg2[%c14_252] : memref<98xf32, #tpu.memory_space<smem>>
    %c0_253 = arith.constant 0 : index
    %c0_254 = arith.constant 0 : index
    %c2_255 = arith.constant 2 : index
    %c0_256 = arith.constant 0 : index
    %282 = vector.load %arg4[%c0_253, %c0_254, %c2_255, %c0_256] : memref<2x7x22x128xf32, #tpu.memory_space<vmem>>, vector<1x1x16x128xf32>
    %283 = vector.shape_cast %282 : vector<1x1x16x128xf32> to vector<16x128xf32>
    %284 = vector.broadcast %281 : f32 to vector<16x128xf32>
    %285 = arith.mulf %284, %283 : vector<16x128xf32>
    %286 = arith.addf %238, %285 : vector<16x128xf32>
    %c15_257 = arith.constant 15 : index
    %287 = memref.load %arg2[%c15_257] : memref<98xf32, #tpu.memory_space<smem>>
    %c0_258 = arith.constant 0 : index
    %c1_259 = arith.constant 1 : index
    %c2_260 = arith.constant 2 : index
    %c0_261 = arith.constant 0 : index
    %288 = vector.load %arg4[%c0_258, %c1_259, %c2_260, %c0_261] : memref<2x7x22x128xf32, #tpu.memory_space<vmem>>, vector<1x1x16x128xf32>
    %289 = vector.shape_cast %288 : vector<1x1x16x128xf32> to vector<16x128xf32>
    %290 = vector.broadcast %287 : f32 to vector<16x128xf32>
    %291 = arith.mulf %290, %289 : vector<16x128xf32>
    %292 = arith.addf %286, %291 : vector<16x128xf32>
    %c16_262 = arith.constant 16 : index
    %293 = memref.load %arg2[%c16_262] : memref<98xf32, #tpu.memory_space<smem>>
    %c0_263 = arith.constant 0 : index
    %c2_264 = arith.constant 2 : index
    %c2_265 = arith.constant 2 : index
    %c0_266 = arith.constant 0 : index
    %294 = vector.load %arg4[%c0_263, %c2_264, %c2_265, %c0_266] : memref<2x7x22x128xf32, #tpu.memory_space<vmem>>, vector<1x1x16x128xf32>
    %295 = vector.shape_cast %294 : vector<1x1x16x128xf32> to vector<16x128xf32>
    %296 = vector.broadcast %293 : f32 to vector<16x128xf32>
    %297 = arith.mulf %296, %295 : vector<16x128xf32>
    %298 = arith.addf %292, %297 : vector<16x128xf32>
    %c17_267 = arith.constant 17 : index
    %299 = memref.load %arg2[%c17_267] : memref<98xf32, #tpu.memory_space<smem>>
    %c0_268 = arith.constant 0 : index
    %c3_269 = arith.constant 3 : index
    %c2_270 = arith.constant 2 : index
    %c0_271 = arith.constant 0 : index
    %300 = vector.load %arg4[%c0_268, %c3_269, %c2_270, %c0_271] : memref<2x7x22x128xf32, #tpu.memory_space<vmem>>, vector<1x1x16x128xf32>
    %301 = vector.shape_cast %300 : vector<1x1x16x128xf32> to vector<16x128xf32>
    %302 = vector.broadcast %299 : f32 to vector<16x128xf32>
    %303 = arith.mulf %302, %301 : vector<16x128xf32>
    %304 = arith.addf %298, %303 : vector<16x128xf32>
    %c18_272 = arith.constant 18 : index
    %305 = memref.load %arg2[%c18_272] : memref<98xf32, #tpu.memory_space<smem>>
    %c0_273 = arith.constant 0 : index
    %c4_274 = arith.constant 4 : index
    %c2_275 = arith.constant 2 : index
    %c0_276 = arith.constant 0 : index
    %306 = vector.load %arg4[%c0_273, %c4_274, %c2_275, %c0_276] : memref<2x7x22x128xf32, #tpu.memory_space<vmem>>, vector<1x1x16x128xf32>
    %307 = vector.shape_cast %306 : vector<1x1x16x128xf32> to vector<16x128xf32>
    %308 = vector.broadcast %305 : f32 to vector<16x128xf32>
    %309 = arith.mulf %308, %307 : vector<16x128xf32>
    %310 = arith.addf %304, %309 : vector<16x128xf32>
    %c19 = arith.constant 19 : index
    %311 = memref.load %arg2[%c19] : memref<98xf32, #tpu.memory_space<smem>>
    %c0_277 = arith.constant 0 : index
    %c5_278 = arith.constant 5 : index
    %c2_279 = arith.constant 2 : index
    %c0_280 = arith.constant 0 : index
    %312 = vector.load %arg4[%c0_277, %c5_278, %c2_279, %c0_280] : memref<2x7x22x128xf32, #tpu.memory_space<vmem>>, vector<1x1x16x128xf32>
    %313 = vector.shape_cast %312 : vector<1x1x16x128xf32> to vector<16x128xf32>
    %314 = vector.broadcast %311 : f32 to vector<16x128xf32>
    %315 = arith.mulf %314, %313 : vector<16x128xf32>
    %316 = arith.addf %310, %315 : vector<16x128xf32>
    %c20 = arith.constant 20 : index
    %317 = memref.load %arg2[%c20] : memref<98xf32, #tpu.memory_space<smem>>
    %c0_281 = arith.constant 0 : index
    %c6_282 = arith.constant 6 : index
    %c2_283 = arith.constant 2 : index
    %c0_284 = arith.constant 0 : index
    %318 = vector.load %arg4[%c0_281, %c6_282, %c2_283, %c0_284] : memref<2x7x22x128xf32, #tpu.memory_space<vmem>>, vector<1x1x16x128xf32>
    %319 = vector.shape_cast %318 : vector<1x1x16x128xf32> to vector<16x128xf32>
    %320 = vector.broadcast %317 : f32 to vector<16x128xf32>
    %321 = arith.mulf %320, %319 : vector<16x128xf32>
    %322 = arith.addf %316, %321 : vector<16x128xf32>
    %c21 = arith.constant 21 : index
    %323 = memref.load %arg2[%c21] : memref<98xf32, #tpu.memory_space<smem>>
    %c0_285 = arith.constant 0 : index
    %c0_286 = arith.constant 0 : index
    %c3_287 = arith.constant 3 : index
    %c0_288 = arith.constant 0 : index
    %324 = vector.load %arg4[%c0_285, %c0_286, %c3_287, %c0_288] : memref<2x7x22x128xf32, #tpu.memory_space<vmem>>, vector<1x1x16x128xf32>
    %325 = vector.shape_cast %324 : vector<1x1x16x128xf32> to vector<16x128xf32>
    %326 = vector.broadcast %323 : f32 to vector<16x128xf32>
    %327 = arith.mulf %326, %325 : vector<16x128xf32>
    %328 = arith.addf %280, %327 : vector<16x128xf32>
    %c22 = arith.constant 22 : index
    %329 = memref.load %arg2[%c22] : memref<98xf32, #tpu.memory_space<smem>>
    %c0_289 = arith.constant 0 : index
    %c1_290 = arith.constant 1 : index
    %c3_291 = arith.constant 3 : index
    %c0_292 = arith.constant 0 : index
    %330 = vector.load %arg4[%c0_289, %c1_290, %c3_291, %c0_292] : memref<2x7x22x128xf32, #tpu.memory_space<vmem>>, vector<1x1x16x128xf32>
    %331 = vector.shape_cast %330 : vector<1x1x16x128xf32> to vector<16x128xf32>
    %332 = vector.broadcast %329 : f32 to vector<16x128xf32>
    %333 = arith.mulf %332, %331 : vector<16x128xf32>
    %334 = arith.addf %328, %333 : vector<16x128xf32>
    %c23 = arith.constant 23 : index
    %335 = memref.load %arg2[%c23] : memref<98xf32, #tpu.memory_space<smem>>
    %c0_293 = arith.constant 0 : index
    %c2_294 = arith.constant 2 : index
    %c3_295 = arith.constant 3 : index
    %c0_296 = arith.constant 0 : index
    %336 = vector.load %arg4[%c0_293, %c2_294, %c3_295, %c0_296] : memref<2x7x22x128xf32, #tpu.memory_space<vmem>>, vector<1x1x16x128xf32>
    %337 = vector.shape_cast %336 : vector<1x1x16x128xf32> to vector<16x128xf32>
    %338 = vector.broadcast %335 : f32 to vector<16x128xf32>
    %339 = arith.mulf %338, %337 : vector<16x128xf32>
    %340 = arith.addf %334, %339 : vector<16x128xf32>
    %c24 = arith.constant 24 : index
    %341 = memref.load %arg2[%c24] : memref<98xf32, #tpu.memory_space<smem>>
    %c0_297 = arith.constant 0 : index
    %c3_298 = arith.constant 3 : index
    %c3_299 = arith.constant 3 : index
    %c0_300 = arith.constant 0 : index
    %342 = vector.load %arg4[%c0_297, %c3_298, %c3_299, %c0_300] : memref<2x7x22x128xf32, #tpu.memory_space<vmem>>, vector<1x1x16x128xf32>
    %343 = vector.shape_cast %342 : vector<1x1x16x128xf32> to vector<16x128xf32>
    %344 = vector.broadcast %341 : f32 to vector<16x128xf32>
    %345 = arith.mulf %344, %343 : vector<16x128xf32>
    %346 = arith.addf %340, %345 : vector<16x128xf32>
    %c25 = arith.constant 25 : index
    %347 = memref.load %arg2[%c25] : memref<98xf32, #tpu.memory_space<smem>>
    %c0_301 = arith.constant 0 : index
    %c4_302 = arith.constant 4 : index
    %c3_303 = arith.constant 3 : index
    %c0_304 = arith.constant 0 : index
    %348 = vector.load %arg4[%c0_301, %c4_302, %c3_303, %c0_304] : memref<2x7x22x128xf32, #tpu.memory_space<vmem>>, vector<1x1x16x128xf32>
    %349 = vector.shape_cast %348 : vector<1x1x16x128xf32> to vector<16x128xf32>
    %350 = vector.broadcast %347 : f32 to vector<16x128xf32>
    %351 = arith.mulf %350, %349 : vector<16x128xf32>
    %352 = arith.addf %346, %351 : vector<16x128xf32>
    %c26 = arith.constant 26 : index
    %353 = memref.load %arg2[%c26] : memref<98xf32, #tpu.memory_space<smem>>
    %c0_305 = arith.constant 0 : index
    %c5_306 = arith.constant 5 : index
    %c3_307 = arith.constant 3 : index
    %c0_308 = arith.constant 0 : index
    %354 = vector.load %arg4[%c0_305, %c5_306, %c3_307, %c0_308] : memref<2x7x22x128xf32, #tpu.memory_space<vmem>>, vector<1x1x16x128xf32>
    %355 = vector.shape_cast %354 : vector<1x1x16x128xf32> to vector<16x128xf32>
    %356 = vector.broadcast %353 : f32 to vector<16x128xf32>
    %357 = arith.mulf %356, %355 : vector<16x128xf32>
    %358 = arith.addf %352, %357 : vector<16x128xf32>
    %c27 = arith.constant 27 : index
    %359 = memref.load %arg2[%c27] : memref<98xf32, #tpu.memory_space<smem>>
    %c0_309 = arith.constant 0 : index
    %c6_310 = arith.constant 6 : index
    %c3_311 = arith.constant 3 : index
    %c0_312 = arith.constant 0 : index
    %360 = vector.load %arg4[%c0_309, %c6_310, %c3_311, %c0_312] : memref<2x7x22x128xf32, #tpu.memory_space<vmem>>, vector<1x1x16x128xf32>
    %361 = vector.shape_cast %360 : vector<1x1x16x128xf32> to vector<16x128xf32>
    %362 = vector.broadcast %359 : f32 to vector<16x128xf32>
    %363 = arith.mulf %362, %361 : vector<16x128xf32>
    %364 = arith.addf %358, %363 : vector<16x128xf32>
    %c28 = arith.constant 28 : index
    %365 = memref.load %arg2[%c28] : memref<98xf32, #tpu.memory_space<smem>>
    %c0_313 = arith.constant 0 : index
    %c0_314 = arith.constant 0 : index
    %c4_315 = arith.constant 4 : index
    %c0_316 = arith.constant 0 : index
    %366 = vector.load %arg4[%c0_313, %c0_314, %c4_315, %c0_316] : memref<2x7x22x128xf32, #tpu.memory_space<vmem>>, vector<1x1x16x128xf32>
    %367 = vector.shape_cast %366 : vector<1x1x16x128xf32> to vector<16x128xf32>
    %368 = vector.broadcast %365 : f32 to vector<16x128xf32>
    %369 = arith.mulf %368, %367 : vector<16x128xf32>
    %370 = arith.addf %322, %369 : vector<16x128xf32>
    %c29 = arith.constant 29 : index
    %371 = memref.load %arg2[%c29] : memref<98xf32, #tpu.memory_space<smem>>
    %c0_317 = arith.constant 0 : index
    %c1_318 = arith.constant 1 : index
    %c4_319 = arith.constant 4 : index
    %c0_320 = arith.constant 0 : index
    %372 = vector.load %arg4[%c0_317, %c1_318, %c4_319, %c0_320] : memref<2x7x22x128xf32, #tpu.memory_space<vmem>>, vector<1x1x16x128xf32>
    %373 = vector.shape_cast %372 : vector<1x1x16x128xf32> to vector<16x128xf32>
    %374 = vector.broadcast %371 : f32 to vector<16x128xf32>
    %375 = arith.mulf %374, %373 : vector<16x128xf32>
    %376 = arith.addf %370, %375 : vector<16x128xf32>
    %c30 = arith.constant 30 : index
    %377 = memref.load %arg2[%c30] : memref<98xf32, #tpu.memory_space<smem>>
    %c0_321 = arith.constant 0 : index
    %c2_322 = arith.constant 2 : index
    %c4_323 = arith.constant 4 : index
    %c0_324 = arith.constant 0 : index
    %378 = vector.load %arg4[%c0_321, %c2_322, %c4_323, %c0_324] : memref<2x7x22x128xf32, #tpu.memory_space<vmem>>, vector<1x1x16x128xf32>
    %379 = vector.shape_cast %378 : vector<1x1x16x128xf32> to vector<16x128xf32>
    %380 = vector.broadcast %377 : f32 to vector<16x128xf32>
    %381 = arith.mulf %380, %379 : vector<16x128xf32>
    %382 = arith.addf %376, %381 : vector<16x128xf32>
    %c31 = arith.constant 31 : index
    %383 = memref.load %arg2[%c31] : memref<98xf32, #tpu.memory_space<smem>>
    %c0_325 = arith.constant 0 : index
    %c3_326 = arith.constant 3 : index
    %c4_327 = arith.constant 4 : index
    %c0_328 = arith.constant 0 : index
    %384 = vector.load %arg4[%c0_325, %c3_326, %c4_327, %c0_328] : memref<2x7x22x128xf32, #tpu.memory_space<vmem>>, vector<1x1x16x128xf32>
    %385 = vector.shape_cast %384 : vector<1x1x16x128xf32> to vector<16x128xf32>
    %386 = vector.broadcast %383 : f32 to vector<16x128xf32>
    %387 = arith.mulf %386, %385 : vector<16x128xf32>
    %388 = arith.addf %382, %387 : vector<16x128xf32>
    %c32 = arith.constant 32 : index
    %389 = memref.load %arg2[%c32] : memref<98xf32, #tpu.memory_space<smem>>
    %c0_329 = arith.constant 0 : index
    %c4_330 = arith.constant 4 : index
    %c4_331 = arith.constant 4 : index
    %c0_332 = arith.constant 0 : index
    %390 = vector.load %arg4[%c0_329, %c4_330, %c4_331, %c0_332] : memref<2x7x22x128xf32, #tpu.memory_space<vmem>>, vector<1x1x16x128xf32>
    %391 = vector.shape_cast %390 : vector<1x1x16x128xf32> to vector<16x128xf32>
    %392 = vector.broadcast %389 : f32 to vector<16x128xf32>
    %393 = arith.mulf %392, %391 : vector<16x128xf32>
    %394 = arith.addf %388, %393 : vector<16x128xf32>
    %c33 = arith.constant 33 : index
    %395 = memref.load %arg2[%c33] : memref<98xf32, #tpu.memory_space<smem>>
    %c0_333 = arith.constant 0 : index
    %c5_334 = arith.constant 5 : index
    %c4_335 = arith.constant 4 : index
    %c0_336 = arith.constant 0 : index
    %396 = vector.load %arg4[%c0_333, %c5_334, %c4_335, %c0_336] : memref<2x7x22x128xf32, #tpu.memory_space<vmem>>, vector<1x1x16x128xf32>
    %397 = vector.shape_cast %396 : vector<1x1x16x128xf32> to vector<16x128xf32>
    %398 = vector.broadcast %395 : f32 to vector<16x128xf32>
    %399 = arith.mulf %398, %397 : vector<16x128xf32>
    %400 = arith.addf %394, %399 : vector<16x128xf32>
    %c34 = arith.constant 34 : index
    %401 = memref.load %arg2[%c34] : memref<98xf32, #tpu.memory_space<smem>>
    %c0_337 = arith.constant 0 : index
    %c6_338 = arith.constant 6 : index
    %c4_339 = arith.constant 4 : index
    %c0_340 = arith.constant 0 : index
    %402 = vector.load %arg4[%c0_337, %c6_338, %c4_339, %c0_340] : memref<2x7x22x128xf32, #tpu.memory_space<vmem>>, vector<1x1x16x128xf32>
    %403 = vector.shape_cast %402 : vector<1x1x16x128xf32> to vector<16x128xf32>
    %404 = vector.broadcast %401 : f32 to vector<16x128xf32>
    %405 = arith.mulf %404, %403 : vector<16x128xf32>
    %406 = arith.addf %400, %405 : vector<16x128xf32>
    %c35 = arith.constant 35 : index
    %407 = memref.load %arg2[%c35] : memref<98xf32, #tpu.memory_space<smem>>
    %c0_341 = arith.constant 0 : index
    %c0_342 = arith.constant 0 : index
    %c5_343 = arith.constant 5 : index
    %c0_344 = arith.constant 0 : index
    %408 = vector.load %arg4[%c0_341, %c0_342, %c5_343, %c0_344] : memref<2x7x22x128xf32, #tpu.memory_space<vmem>>, vector<1x1x16x128xf32>
    %409 = vector.shape_cast %408 : vector<1x1x16x128xf32> to vector<16x128xf32>
    %410 = vector.broadcast %407 : f32 to vector<16x128xf32>
    %411 = arith.mulf %410, %409 : vector<16x128xf32>
    %412 = arith.addf %364, %411 : vector<16x128xf32>
    %c36 = arith.constant 36 : index
    %413 = memref.load %arg2[%c36] : memref<98xf32, #tpu.memory_space<smem>>
    %c0_345 = arith.constant 0 : index
    %c1_346 = arith.constant 1 : index
    %c5_347 = arith.constant 5 : index
    %c0_348 = arith.constant 0 : index
    %414 = vector.load %arg4[%c0_345, %c1_346, %c5_347, %c0_348] : memref<2x7x22x128xf32, #tpu.memory_space<vmem>>, vector<1x1x16x128xf32>
    %415 = vector.shape_cast %414 : vector<1x1x16x128xf32> to vector<16x128xf32>
    %416 = vector.broadcast %413 : f32 to vector<16x128xf32>
    %417 = arith.mulf %416, %415 : vector<16x128xf32>
    %418 = arith.addf %412, %417 : vector<16x128xf32>
    %c37 = arith.constant 37 : index
    %419 = memref.load %arg2[%c37] : memref<98xf32, #tpu.memory_space<smem>>
    %c0_349 = arith.constant 0 : index
    %c2_350 = arith.constant 2 : index
    %c5_351 = arith.constant 5 : index
    %c0_352 = arith.constant 0 : index
    %420 = vector.load %arg4[%c0_349, %c2_350, %c5_351, %c0_352] : memref<2x7x22x128xf32, #tpu.memory_space<vmem>>, vector<1x1x16x128xf32>
    %421 = vector.shape_cast %420 : vector<1x1x16x128xf32> to vector<16x128xf32>
    %422 = vector.broadcast %419 : f32 to vector<16x128xf32>
    %423 = arith.mulf %422, %421 : vector<16x128xf32>
    %424 = arith.addf %418, %423 : vector<16x128xf32>
    %c38 = arith.constant 38 : index
    %425 = memref.load %arg2[%c38] : memref<98xf32, #tpu.memory_space<smem>>
    %c0_353 = arith.constant 0 : index
    %c3_354 = arith.constant 3 : index
    %c5_355 = arith.constant 5 : index
    %c0_356 = arith.constant 0 : index
    %426 = vector.load %arg4[%c0_353, %c3_354, %c5_355, %c0_356] : memref<2x7x22x128xf32, #tpu.memory_space<vmem>>, vector<1x1x16x128xf32>
    %427 = vector.shape_cast %426 : vector<1x1x16x128xf32> to vector<16x128xf32>
    %428 = vector.broadcast %425 : f32 to vector<16x128xf32>
    %429 = arith.mulf %428, %427 : vector<16x128xf32>
    %430 = arith.addf %424, %429 : vector<16x128xf32>
    %c39 = arith.constant 39 : index
    %431 = memref.load %arg2[%c39] : memref<98xf32, #tpu.memory_space<smem>>
    %c0_357 = arith.constant 0 : index
    %c4_358 = arith.constant 4 : index
    %c5_359 = arith.constant 5 : index
    %c0_360 = arith.constant 0 : index
    %432 = vector.load %arg4[%c0_357, %c4_358, %c5_359, %c0_360] : memref<2x7x22x128xf32, #tpu.memory_space<vmem>>, vector<1x1x16x128xf32>
    %433 = vector.shape_cast %432 : vector<1x1x16x128xf32> to vector<16x128xf32>
    %434 = vector.broadcast %431 : f32 to vector<16x128xf32>
    %435 = arith.mulf %434, %433 : vector<16x128xf32>
    %436 = arith.addf %430, %435 : vector<16x128xf32>
    %c40 = arith.constant 40 : index
    %437 = memref.load %arg2[%c40] : memref<98xf32, #tpu.memory_space<smem>>
    %c0_361 = arith.constant 0 : index
    %c5_362 = arith.constant 5 : index
    %c5_363 = arith.constant 5 : index
    %c0_364 = arith.constant 0 : index
    %438 = vector.load %arg4[%c0_361, %c5_362, %c5_363, %c0_364] : memref<2x7x22x128xf32, #tpu.memory_space<vmem>>, vector<1x1x16x128xf32>
    %439 = vector.shape_cast %438 : vector<1x1x16x128xf32> to vector<16x128xf32>
    %440 = vector.broadcast %437 : f32 to vector<16x128xf32>
    %441 = arith.mulf %440, %439 : vector<16x128xf32>
    %442 = arith.addf %436, %441 : vector<16x128xf32>
    %c41 = arith.constant 41 : index
    %443 = memref.load %arg2[%c41] : memref<98xf32, #tpu.memory_space<smem>>
    %c0_365 = arith.constant 0 : index
    %c6_366 = arith.constant 6 : index
    %c5_367 = arith.constant 5 : index
    %c0_368 = arith.constant 0 : index
    %444 = vector.load %arg4[%c0_365, %c6_366, %c5_367, %c0_368] : memref<2x7x22x128xf32, #tpu.memory_space<vmem>>, vector<1x1x16x128xf32>
    %445 = vector.shape_cast %444 : vector<1x1x16x128xf32> to vector<16x128xf32>
    %446 = vector.broadcast %443 : f32 to vector<16x128xf32>
    %447 = arith.mulf %446, %445 : vector<16x128xf32>
    %448 = arith.addf %442, %447 : vector<16x128xf32>
    %c42 = arith.constant 42 : index
    %449 = memref.load %arg2[%c42] : memref<98xf32, #tpu.memory_space<smem>>
    %c0_369 = arith.constant 0 : index
    %c0_370 = arith.constant 0 : index
    %c6_371 = arith.constant 6 : index
    %c0_372 = arith.constant 0 : index
    %450 = vector.load %arg4[%c0_369, %c0_370, %c6_371, %c0_372] : memref<2x7x22x128xf32, #tpu.memory_space<vmem>>, vector<1x1x16x128xf32>
    %451 = vector.shape_cast %450 : vector<1x1x16x128xf32> to vector<16x128xf32>
    %452 = vector.broadcast %449 : f32 to vector<16x128xf32>
    %453 = arith.mulf %452, %451 : vector<16x128xf32>
    %454 = arith.addf %406, %453 : vector<16x128xf32>
    %c43 = arith.constant 43 : index
    %455 = memref.load %arg2[%c43] : memref<98xf32, #tpu.memory_space<smem>>
    %c0_373 = arith.constant 0 : index
    %c1_374 = arith.constant 1 : index
    %c6_375 = arith.constant 6 : index
    %c0_376 = arith.constant 0 : index
    %456 = vector.load %arg4[%c0_373, %c1_374, %c6_375, %c0_376] : memref<2x7x22x128xf32, #tpu.memory_space<vmem>>, vector<1x1x16x128xf32>
    %457 = vector.shape_cast %456 : vector<1x1x16x128xf32> to vector<16x128xf32>
    %458 = vector.broadcast %455 : f32 to vector<16x128xf32>
    %459 = arith.mulf %458, %457 : vector<16x128xf32>
    %460 = arith.addf %454, %459 : vector<16x128xf32>
    %c44 = arith.constant 44 : index
    %461 = memref.load %arg2[%c44] : memref<98xf32, #tpu.memory_space<smem>>
    %c0_377 = arith.constant 0 : index
    %c2_378 = arith.constant 2 : index
    %c6_379 = arith.constant 6 : index
    %c0_380 = arith.constant 0 : index
    %462 = vector.load %arg4[%c0_377, %c2_378, %c6_379, %c0_380] : memref<2x7x22x128xf32, #tpu.memory_space<vmem>>, vector<1x1x16x128xf32>
    %463 = vector.shape_cast %462 : vector<1x1x16x128xf32> to vector<16x128xf32>
    %464 = vector.broadcast %461 : f32 to vector<16x128xf32>
    %465 = arith.mulf %464, %463 : vector<16x128xf32>
    %466 = arith.addf %460, %465 : vector<16x128xf32>
    %c45 = arith.constant 45 : index
    %467 = memref.load %arg2[%c45] : memref<98xf32, #tpu.memory_space<smem>>
    %c0_381 = arith.constant 0 : index
    %c3_382 = arith.constant 3 : index
    %c6_383 = arith.constant 6 : index
    %c0_384 = arith.constant 0 : index
    %468 = vector.load %arg4[%c0_381, %c3_382, %c6_383, %c0_384] : memref<2x7x22x128xf32, #tpu.memory_space<vmem>>, vector<1x1x16x128xf32>
    %469 = vector.shape_cast %468 : vector<1x1x16x128xf32> to vector<16x128xf32>
    %470 = vector.broadcast %467 : f32 to vector<16x128xf32>
    %471 = arith.mulf %470, %469 : vector<16x128xf32>
    %472 = arith.addf %466, %471 : vector<16x128xf32>
    %c46 = arith.constant 46 : index
    %473 = memref.load %arg2[%c46] : memref<98xf32, #tpu.memory_space<smem>>
    %c0_385 = arith.constant 0 : index
    %c4_386 = arith.constant 4 : index
    %c6_387 = arith.constant 6 : index
    %c0_388 = arith.constant 0 : index
    %474 = vector.load %arg4[%c0_385, %c4_386, %c6_387, %c0_388] : memref<2x7x22x128xf32, #tpu.memory_space<vmem>>, vector<1x1x16x128xf32>
    %475 = vector.shape_cast %474 : vector<1x1x16x128xf32> to vector<16x128xf32>
    %476 = vector.broadcast %473 : f32 to vector<16x128xf32>
    %477 = arith.mulf %476, %475 : vector<16x128xf32>
    %478 = arith.addf %472, %477 : vector<16x128xf32>
    %c47 = arith.constant 47 : index
    %479 = memref.load %arg2[%c47] : memref<98xf32, #tpu.memory_space<smem>>
    %c0_389 = arith.constant 0 : index
    %c5_390 = arith.constant 5 : index
    %c6_391 = arith.constant 6 : index
    %c0_392 = arith.constant 0 : index
    %480 = vector.load %arg4[%c0_389, %c5_390, %c6_391, %c0_392] : memref<2x7x22x128xf32, #tpu.memory_space<vmem>>, vector<1x1x16x128xf32>
    %481 = vector.shape_cast %480 : vector<1x1x16x128xf32> to vector<16x128xf32>
    %482 = vector.broadcast %479 : f32 to vector<16x128xf32>
    %483 = arith.mulf %482, %481 : vector<16x128xf32>
    %484 = arith.addf %478, %483 : vector<16x128xf32>
    %c48 = arith.constant 48 : index
    %485 = memref.load %arg2[%c48] : memref<98xf32, #tpu.memory_space<smem>>
    %c0_393 = arith.constant 0 : index
    %c6_394 = arith.constant 6 : index
    %c6_395 = arith.constant 6 : index
    %c0_396 = arith.constant 0 : index
    %486 = vector.load %arg4[%c0_393, %c6_394, %c6_395, %c0_396] : memref<2x7x22x128xf32, #tpu.memory_space<vmem>>, vector<1x1x16x128xf32>
    %487 = vector.shape_cast %486 : vector<1x1x16x128xf32> to vector<16x128xf32>
    %488 = vector.broadcast %485 : f32 to vector<16x128xf32>
    %489 = arith.mulf %488, %487 : vector<16x128xf32>
    %490 = arith.addf %484, %489 : vector<16x128xf32>
    %c49 = arith.constant 49 : index
    %491 = memref.load %arg2[%c49] : memref<98xf32, #tpu.memory_space<smem>>
    %c1_397 = arith.constant 1 : index
    %c0_398 = arith.constant 0 : index
    %c0_399 = arith.constant 0 : index
    %c0_400 = arith.constant 0 : index
    %492 = vector.load %arg4[%c1_397, %c0_398, %c0_399, %c0_400] : memref<2x7x22x128xf32, #tpu.memory_space<vmem>>, vector<1x1x16x128xf32>
    %493 = vector.shape_cast %492 : vector<1x1x16x128xf32> to vector<16x128xf32>
    %494 = vector.broadcast %491 : f32 to vector<16x128xf32>
    %495 = arith.mulf %494, %493 : vector<16x128xf32>
    %496 = arith.addf %195, %495 : vector<16x128xf32>
    %c50 = arith.constant 50 : index
    %497 = memref.load %arg2[%c50] : memref<98xf32, #tpu.memory_space<smem>>
    %c1_401 = arith.constant 1 : index
    %c1_402 = arith.constant 1 : index
    %c0_403 = arith.constant 0 : index
    %c0_404 = arith.constant 0 : index
    %498 = vector.load %arg4[%c1_401, %c1_402, %c0_403, %c0_404] : memref<2x7x22x128xf32, #tpu.memory_space<vmem>>, vector<1x1x16x128xf32>
    %499 = vector.shape_cast %498 : vector<1x1x16x128xf32> to vector<16x128xf32>
    %500 = vector.broadcast %497 : f32 to vector<16x128xf32>
    %501 = arith.mulf %500, %499 : vector<16x128xf32>
    %502 = arith.addf %496, %501 : vector<16x128xf32>
    %c51 = arith.constant 51 : index
    %503 = memref.load %arg2[%c51] : memref<98xf32, #tpu.memory_space<smem>>
    %c1_405 = arith.constant 1 : index
    %c2_406 = arith.constant 2 : index
    %c0_407 = arith.constant 0 : index
    %c0_408 = arith.constant 0 : index
    %504 = vector.load %arg4[%c1_405, %c2_406, %c0_407, %c0_408] : memref<2x7x22x128xf32, #tpu.memory_space<vmem>>, vector<1x1x16x128xf32>
    %505 = vector.shape_cast %504 : vector<1x1x16x128xf32> to vector<16x128xf32>
    %506 = vector.broadcast %503 : f32 to vector<16x128xf32>
    %507 = arith.mulf %506, %505 : vector<16x128xf32>
    %508 = arith.addf %502, %507 : vector<16x128xf32>
    %c52 = arith.constant 52 : index
    %509 = memref.load %arg2[%c52] : memref<98xf32, #tpu.memory_space<smem>>
    %c1_409 = arith.constant 1 : index
    %c3_410 = arith.constant 3 : index
    %c0_411 = arith.constant 0 : index
    %c0_412 = arith.constant 0 : index
    %510 = vector.load %arg4[%c1_409, %c3_410, %c0_411, %c0_412] : memref<2x7x22x128xf32, #tpu.memory_space<vmem>>, vector<1x1x16x128xf32>
    %511 = vector.shape_cast %510 : vector<1x1x16x128xf32> to vector<16x128xf32>
    %512 = vector.broadcast %509 : f32 to vector<16x128xf32>
    %513 = arith.mulf %512, %511 : vector<16x128xf32>
    %514 = arith.addf %508, %513 : vector<16x128xf32>
    %c53 = arith.constant 53 : index
    %515 = memref.load %arg2[%c53] : memref<98xf32, #tpu.memory_space<smem>>
    %c1_413 = arith.constant 1 : index
    %c4_414 = arith.constant 4 : index
    %c0_415 = arith.constant 0 : index
    %c0_416 = arith.constant 0 : index
    %516 = vector.load %arg4[%c1_413, %c4_414, %c0_415, %c0_416] : memref<2x7x22x128xf32, #tpu.memory_space<vmem>>, vector<1x1x16x128xf32>
    %517 = vector.shape_cast %516 : vector<1x1x16x128xf32> to vector<16x128xf32>
    %518 = vector.broadcast %515 : f32 to vector<16x128xf32>
    %519 = arith.mulf %518, %517 : vector<16x128xf32>
    %520 = arith.addf %514, %519 : vector<16x128xf32>
    %c54 = arith.constant 54 : index
    %521 = memref.load %arg2[%c54] : memref<98xf32, #tpu.memory_space<smem>>
    %c1_417 = arith.constant 1 : index
    %c5_418 = arith.constant 5 : index
    %c0_419 = arith.constant 0 : index
    %c0_420 = arith.constant 0 : index
    %522 = vector.load %arg4[%c1_417, %c5_418, %c0_419, %c0_420] : memref<2x7x22x128xf32, #tpu.memory_space<vmem>>, vector<1x1x16x128xf32>
    %523 = vector.shape_cast %522 : vector<1x1x16x128xf32> to vector<16x128xf32>
    %524 = vector.broadcast %521 : f32 to vector<16x128xf32>
    %525 = arith.mulf %524, %523 : vector<16x128xf32>
    %526 = arith.addf %520, %525 : vector<16x128xf32>
    %c55 = arith.constant 55 : index
    %527 = memref.load %arg2[%c55] : memref<98xf32, #tpu.memory_space<smem>>
    %c1_421 = arith.constant 1 : index
    %c6_422 = arith.constant 6 : index
    %c0_423 = arith.constant 0 : index
    %c0_424 = arith.constant 0 : index
    %528 = vector.load %arg4[%c1_421, %c6_422, %c0_423, %c0_424] : memref<2x7x22x128xf32, #tpu.memory_space<vmem>>, vector<1x1x16x128xf32>
    %529 = vector.shape_cast %528 : vector<1x1x16x128xf32> to vector<16x128xf32>
    %530 = vector.broadcast %527 : f32 to vector<16x128xf32>
    %531 = arith.mulf %530, %529 : vector<16x128xf32>
    %532 = arith.addf %526, %531 : vector<16x128xf32>
    %c56 = arith.constant 56 : index
    %533 = memref.load %arg2[%c56] : memref<98xf32, #tpu.memory_space<smem>>
    %c1_425 = arith.constant 1 : index
    %c0_426 = arith.constant 0 : index
    %c1_427 = arith.constant 1 : index
    %c0_428 = arith.constant 0 : index
    %534 = vector.load %arg4[%c1_425, %c0_426, %c1_427, %c0_428] : memref<2x7x22x128xf32, #tpu.memory_space<vmem>>, vector<1x1x16x128xf32>
    %535 = vector.shape_cast %534 : vector<1x1x16x128xf32> to vector<16x128xf32>
    %536 = vector.broadcast %533 : f32 to vector<16x128xf32>
    %537 = arith.mulf %536, %535 : vector<16x128xf32>
    %538 = arith.addf %196, %537 : vector<16x128xf32>
    %c57 = arith.constant 57 : index
    %539 = memref.load %arg2[%c57] : memref<98xf32, #tpu.memory_space<smem>>
    %c1_429 = arith.constant 1 : index
    %c1_430 = arith.constant 1 : index
    %c1_431 = arith.constant 1 : index
    %c0_432 = arith.constant 0 : index
    %540 = vector.load %arg4[%c1_429, %c1_430, %c1_431, %c0_432] : memref<2x7x22x128xf32, #tpu.memory_space<vmem>>, vector<1x1x16x128xf32>
    %541 = vector.shape_cast %540 : vector<1x1x16x128xf32> to vector<16x128xf32>
    %542 = vector.broadcast %539 : f32 to vector<16x128xf32>
    %543 = arith.mulf %542, %541 : vector<16x128xf32>
    %544 = arith.addf %538, %543 : vector<16x128xf32>
    %c58 = arith.constant 58 : index
    %545 = memref.load %arg2[%c58] : memref<98xf32, #tpu.memory_space<smem>>
    %c1_433 = arith.constant 1 : index
    %c2_434 = arith.constant 2 : index
    %c1_435 = arith.constant 1 : index
    %c0_436 = arith.constant 0 : index
    %546 = vector.load %arg4[%c1_433, %c2_434, %c1_435, %c0_436] : memref<2x7x22x128xf32, #tpu.memory_space<vmem>>, vector<1x1x16x128xf32>
    %547 = vector.shape_cast %546 : vector<1x1x16x128xf32> to vector<16x128xf32>
    %548 = vector.broadcast %545 : f32 to vector<16x128xf32>
    %549 = arith.mulf %548, %547 : vector<16x128xf32>
    %550 = arith.addf %544, %549 : vector<16x128xf32>
    %c59 = arith.constant 59 : index
    %551 = memref.load %arg2[%c59] : memref<98xf32, #tpu.memory_space<smem>>
    %c1_437 = arith.constant 1 : index
    %c3_438 = arith.constant 3 : index
    %c1_439 = arith.constant 1 : index
    %c0_440 = arith.constant 0 : index
    %552 = vector.load %arg4[%c1_437, %c3_438, %c1_439, %c0_440] : memref<2x7x22x128xf32, #tpu.memory_space<vmem>>, vector<1x1x16x128xf32>
    %553 = vector.shape_cast %552 : vector<1x1x16x128xf32> to vector<16x128xf32>
    %554 = vector.broadcast %551 : f32 to vector<16x128xf32>
    %555 = arith.mulf %554, %553 : vector<16x128xf32>
    %556 = arith.addf %550, %555 : vector<16x128xf32>
    %c60 = arith.constant 60 : index
    %557 = memref.load %arg2[%c60] : memref<98xf32, #tpu.memory_space<smem>>
    %c1_441 = arith.constant 1 : index
    %c4_442 = arith.constant 4 : index
    %c1_443 = arith.constant 1 : index
    %c0_444 = arith.constant 0 : index
    %558 = vector.load %arg4[%c1_441, %c4_442, %c1_443, %c0_444] : memref<2x7x22x128xf32, #tpu.memory_space<vmem>>, vector<1x1x16x128xf32>
    %559 = vector.shape_cast %558 : vector<1x1x16x128xf32> to vector<16x128xf32>
    %560 = vector.broadcast %557 : f32 to vector<16x128xf32>
    %561 = arith.mulf %560, %559 : vector<16x128xf32>
    %562 = arith.addf %556, %561 : vector<16x128xf32>
    %c61 = arith.constant 61 : index
    %563 = memref.load %arg2[%c61] : memref<98xf32, #tpu.memory_space<smem>>
    %c1_445 = arith.constant 1 : index
    %c5_446 = arith.constant 5 : index
    %c1_447 = arith.constant 1 : index
    %c0_448 = arith.constant 0 : index
    %564 = vector.load %arg4[%c1_445, %c5_446, %c1_447, %c0_448] : memref<2x7x22x128xf32, #tpu.memory_space<vmem>>, vector<1x1x16x128xf32>
    %565 = vector.shape_cast %564 : vector<1x1x16x128xf32> to vector<16x128xf32>
    %566 = vector.broadcast %563 : f32 to vector<16x128xf32>
    %567 = arith.mulf %566, %565 : vector<16x128xf32>
    %568 = arith.addf %562, %567 : vector<16x128xf32>
    %c62 = arith.constant 62 : index
    %569 = memref.load %arg2[%c62] : memref<98xf32, #tpu.memory_space<smem>>
    %c1_449 = arith.constant 1 : index
    %c6_450 = arith.constant 6 : index
    %c1_451 = arith.constant 1 : index
    %c0_452 = arith.constant 0 : index
    %570 = vector.load %arg4[%c1_449, %c6_450, %c1_451, %c0_452] : memref<2x7x22x128xf32, #tpu.memory_space<vmem>>, vector<1x1x16x128xf32>
    %571 = vector.shape_cast %570 : vector<1x1x16x128xf32> to vector<16x128xf32>
    %572 = vector.broadcast %569 : f32 to vector<16x128xf32>
    %573 = arith.mulf %572, %571 : vector<16x128xf32>
    %574 = arith.addf %568, %573 : vector<16x128xf32>
    %c63 = arith.constant 63 : index
    %575 = memref.load %arg2[%c63] : memref<98xf32, #tpu.memory_space<smem>>
    %c1_453 = arith.constant 1 : index
    %c0_454 = arith.constant 0 : index
    %c2_455 = arith.constant 2 : index
    %c0_456 = arith.constant 0 : index
    %576 = vector.load %arg4[%c1_453, %c0_454, %c2_455, %c0_456] : memref<2x7x22x128xf32, #tpu.memory_space<vmem>>, vector<1x1x16x128xf32>
    %577 = vector.shape_cast %576 : vector<1x1x16x128xf32> to vector<16x128xf32>
    %578 = vector.broadcast %575 : f32 to vector<16x128xf32>
    %579 = arith.mulf %578, %577 : vector<16x128xf32>
    %580 = arith.addf %532, %579 : vector<16x128xf32>
    %c64 = arith.constant 64 : index
    %581 = memref.load %arg2[%c64] : memref<98xf32, #tpu.memory_space<smem>>
    %c1_457 = arith.constant 1 : index
    %c1_458 = arith.constant 1 : index
    %c2_459 = arith.constant 2 : index
    %c0_460 = arith.constant 0 : index
    %582 = vector.load %arg4[%c1_457, %c1_458, %c2_459, %c0_460] : memref<2x7x22x128xf32, #tpu.memory_space<vmem>>, vector<1x1x16x128xf32>
    %583 = vector.shape_cast %582 : vector<1x1x16x128xf32> to vector<16x128xf32>
    %584 = vector.broadcast %581 : f32 to vector<16x128xf32>
    %585 = arith.mulf %584, %583 : vector<16x128xf32>
    %586 = arith.addf %580, %585 : vector<16x128xf32>
    %c65 = arith.constant 65 : index
    %587 = memref.load %arg2[%c65] : memref<98xf32, #tpu.memory_space<smem>>
    %c1_461 = arith.constant 1 : index
    %c2_462 = arith.constant 2 : index
    %c2_463 = arith.constant 2 : index
    %c0_464 = arith.constant 0 : index
    %588 = vector.load %arg4[%c1_461, %c2_462, %c2_463, %c0_464] : memref<2x7x22x128xf32, #tpu.memory_space<vmem>>, vector<1x1x16x128xf32>
    %589 = vector.shape_cast %588 : vector<1x1x16x128xf32> to vector<16x128xf32>
    %590 = vector.broadcast %587 : f32 to vector<16x128xf32>
    %591 = arith.mulf %590, %589 : vector<16x128xf32>
    %592 = arith.addf %586, %591 : vector<16x128xf32>
    %c66 = arith.constant 66 : index
    %593 = memref.load %arg2[%c66] : memref<98xf32, #tpu.memory_space<smem>>
    %c1_465 = arith.constant 1 : index
    %c3_466 = arith.constant 3 : index
    %c2_467 = arith.constant 2 : index
    %c0_468 = arith.constant 0 : index
    %594 = vector.load %arg4[%c1_465, %c3_466, %c2_467, %c0_468] : memref<2x7x22x128xf32, #tpu.memory_space<vmem>>, vector<1x1x16x128xf32>
    %595 = vector.shape_cast %594 : vector<1x1x16x128xf32> to vector<16x128xf32>
    %596 = vector.broadcast %593 : f32 to vector<16x128xf32>
    %597 = arith.mulf %596, %595 : vector<16x128xf32>
    %598 = arith.addf %592, %597 : vector<16x128xf32>
    %c67 = arith.constant 67 : index
    %599 = memref.load %arg2[%c67] : memref<98xf32, #tpu.memory_space<smem>>
    %c1_469 = arith.constant 1 : index
    %c4_470 = arith.constant 4 : index
    %c2_471 = arith.constant 2 : index
    %c0_472 = arith.constant 0 : index
    %600 = vector.load %arg4[%c1_469, %c4_470, %c2_471, %c0_472] : memref<2x7x22x128xf32, #tpu.memory_space<vmem>>, vector<1x1x16x128xf32>
    %601 = vector.shape_cast %600 : vector<1x1x16x128xf32> to vector<16x128xf32>
    %602 = vector.broadcast %599 : f32 to vector<16x128xf32>
    %603 = arith.mulf %602, %601 : vector<16x128xf32>
    %604 = arith.addf %598, %603 : vector<16x128xf32>
    %c68 = arith.constant 68 : index
    %605 = memref.load %arg2[%c68] : memref<98xf32, #tpu.memory_space<smem>>
    %c1_473 = arith.constant 1 : index
    %c5_474 = arith.constant 5 : index
    %c2_475 = arith.constant 2 : index
    %c0_476 = arith.constant 0 : index
    %606 = vector.load %arg4[%c1_473, %c5_474, %c2_475, %c0_476] : memref<2x7x22x128xf32, #tpu.memory_space<vmem>>, vector<1x1x16x128xf32>
    %607 = vector.shape_cast %606 : vector<1x1x16x128xf32> to vector<16x128xf32>
    %608 = vector.broadcast %605 : f32 to vector<16x128xf32>
    %609 = arith.mulf %608, %607 : vector<16x128xf32>
    %610 = arith.addf %604, %609 : vector<16x128xf32>
    %c69 = arith.constant 69 : index
    %611 = memref.load %arg2[%c69] : memref<98xf32, #tpu.memory_space<smem>>
    %c1_477 = arith.constant 1 : index
    %c6_478 = arith.constant 6 : index
    %c2_479 = arith.constant 2 : index
    %c0_480 = arith.constant 0 : index
    %612 = vector.load %arg4[%c1_477, %c6_478, %c2_479, %c0_480] : memref<2x7x22x128xf32, #tpu.memory_space<vmem>>, vector<1x1x16x128xf32>
    %613 = vector.shape_cast %612 : vector<1x1x16x128xf32> to vector<16x128xf32>
    %614 = vector.broadcast %611 : f32 to vector<16x128xf32>
    %615 = arith.mulf %614, %613 : vector<16x128xf32>
    %616 = arith.addf %610, %615 : vector<16x128xf32>
    %c70 = arith.constant 70 : index
    %617 = memref.load %arg2[%c70] : memref<98xf32, #tpu.memory_space<smem>>
    %c1_481 = arith.constant 1 : index
    %c0_482 = arith.constant 0 : index
    %c3_483 = arith.constant 3 : index
    %c0_484 = arith.constant 0 : index
    %618 = vector.load %arg4[%c1_481, %c0_482, %c3_483, %c0_484] : memref<2x7x22x128xf32, #tpu.memory_space<vmem>>, vector<1x1x16x128xf32>
    %619 = vector.shape_cast %618 : vector<1x1x16x128xf32> to vector<16x128xf32>
    %620 = vector.broadcast %617 : f32 to vector<16x128xf32>
    %621 = arith.mulf %620, %619 : vector<16x128xf32>
    %622 = arith.addf %574, %621 : vector<16x128xf32>
    %c71 = arith.constant 71 : index
    %623 = memref.load %arg2[%c71] : memref<98xf32, #tpu.memory_space<smem>>
    %c1_485 = arith.constant 1 : index
    %c1_486 = arith.constant 1 : index
    %c3_487 = arith.constant 3 : index
    %c0_488 = arith.constant 0 : index
    %624 = vector.load %arg4[%c1_485, %c1_486, %c3_487, %c0_488] : memref<2x7x22x128xf32, #tpu.memory_space<vmem>>, vector<1x1x16x128xf32>
    %625 = vector.shape_cast %624 : vector<1x1x16x128xf32> to vector<16x128xf32>
    %626 = vector.broadcast %623 : f32 to vector<16x128xf32>
    %627 = arith.mulf %626, %625 : vector<16x128xf32>
    %628 = arith.addf %622, %627 : vector<16x128xf32>
    %c72 = arith.constant 72 : index
    %629 = memref.load %arg2[%c72] : memref<98xf32, #tpu.memory_space<smem>>
    %c1_489 = arith.constant 1 : index
    %c2_490 = arith.constant 2 : index
    %c3_491 = arith.constant 3 : index
    %c0_492 = arith.constant 0 : index
    %630 = vector.load %arg4[%c1_489, %c2_490, %c3_491, %c0_492] : memref<2x7x22x128xf32, #tpu.memory_space<vmem>>, vector<1x1x16x128xf32>
    %631 = vector.shape_cast %630 : vector<1x1x16x128xf32> to vector<16x128xf32>
    %632 = vector.broadcast %629 : f32 to vector<16x128xf32>
    %633 = arith.mulf %632, %631 : vector<16x128xf32>
    %634 = arith.addf %628, %633 : vector<16x128xf32>
    %c73 = arith.constant 73 : index
    %635 = memref.load %arg2[%c73] : memref<98xf32, #tpu.memory_space<smem>>
    %c1_493 = arith.constant 1 : index
    %c3_494 = arith.constant 3 : index
    %c3_495 = arith.constant 3 : index
    %c0_496 = arith.constant 0 : index
    %636 = vector.load %arg4[%c1_493, %c3_494, %c3_495, %c0_496] : memref<2x7x22x128xf32, #tpu.memory_space<vmem>>, vector<1x1x16x128xf32>
    %637 = vector.shape_cast %636 : vector<1x1x16x128xf32> to vector<16x128xf32>
    %638 = vector.broadcast %635 : f32 to vector<16x128xf32>
    %639 = arith.mulf %638, %637 : vector<16x128xf32>
    %640 = arith.addf %634, %639 : vector<16x128xf32>
    %c74 = arith.constant 74 : index
    %641 = memref.load %arg2[%c74] : memref<98xf32, #tpu.memory_space<smem>>
    %c1_497 = arith.constant 1 : index
    %c4_498 = arith.constant 4 : index
    %c3_499 = arith.constant 3 : index
    %c0_500 = arith.constant 0 : index
    %642 = vector.load %arg4[%c1_497, %c4_498, %c3_499, %c0_500] : memref<2x7x22x128xf32, #tpu.memory_space<vmem>>, vector<1x1x16x128xf32>
    %643 = vector.shape_cast %642 : vector<1x1x16x128xf32> to vector<16x128xf32>
    %644 = vector.broadcast %641 : f32 to vector<16x128xf32>
    %645 = arith.mulf %644, %643 : vector<16x128xf32>
    %646 = arith.addf %640, %645 : vector<16x128xf32>
    %c75 = arith.constant 75 : index
    %647 = memref.load %arg2[%c75] : memref<98xf32, #tpu.memory_space<smem>>
    %c1_501 = arith.constant 1 : index
    %c5_502 = arith.constant 5 : index
    %c3_503 = arith.constant 3 : index
    %c0_504 = arith.constant 0 : index
    %648 = vector.load %arg4[%c1_501, %c5_502, %c3_503, %c0_504] : memref<2x7x22x128xf32, #tpu.memory_space<vmem>>, vector<1x1x16x128xf32>
    %649 = vector.shape_cast %648 : vector<1x1x16x128xf32> to vector<16x128xf32>
    %650 = vector.broadcast %647 : f32 to vector<16x128xf32>
    %651 = arith.mulf %650, %649 : vector<16x128xf32>
    %652 = arith.addf %646, %651 : vector<16x128xf32>
    %c76 = arith.constant 76 : index
    %653 = memref.load %arg2[%c76] : memref<98xf32, #tpu.memory_space<smem>>
    %c1_505 = arith.constant 1 : index
    %c6_506 = arith.constant 6 : index
    %c3_507 = arith.constant 3 : index
    %c0_508 = arith.constant 0 : index
    %654 = vector.load %arg4[%c1_505, %c6_506, %c3_507, %c0_508] : memref<2x7x22x128xf32, #tpu.memory_space<vmem>>, vector<1x1x16x128xf32>
    %655 = vector.shape_cast %654 : vector<1x1x16x128xf32> to vector<16x128xf32>
    %656 = vector.broadcast %653 : f32 to vector<16x128xf32>
    %657 = arith.mulf %656, %655 : vector<16x128xf32>
    %658 = arith.addf %652, %657 : vector<16x128xf32>
    %c77 = arith.constant 77 : index
    %659 = memref.load %arg2[%c77] : memref<98xf32, #tpu.memory_space<smem>>
    %c1_509 = arith.constant 1 : index
    %c0_510 = arith.constant 0 : index
    %c4_511 = arith.constant 4 : index
    %c0_512 = arith.constant 0 : index
    %660 = vector.load %arg4[%c1_509, %c0_510, %c4_511, %c0_512] : memref<2x7x22x128xf32, #tpu.memory_space<vmem>>, vector<1x1x16x128xf32>
    %661 = vector.shape_cast %660 : vector<1x1x16x128xf32> to vector<16x128xf32>
    %662 = vector.broadcast %659 : f32 to vector<16x128xf32>
    %663 = arith.mulf %662, %661 : vector<16x128xf32>
    %664 = arith.addf %616, %663 : vector<16x128xf32>
    %c78 = arith.constant 78 : index
    %665 = memref.load %arg2[%c78] : memref<98xf32, #tpu.memory_space<smem>>
    %c1_513 = arith.constant 1 : index
    %c1_514 = arith.constant 1 : index
    %c4_515 = arith.constant 4 : index
    %c0_516 = arith.constant 0 : index
    %666 = vector.load %arg4[%c1_513, %c1_514, %c4_515, %c0_516] : memref<2x7x22x128xf32, #tpu.memory_space<vmem>>, vector<1x1x16x128xf32>
    %667 = vector.shape_cast %666 : vector<1x1x16x128xf32> to vector<16x128xf32>
    %668 = vector.broadcast %665 : f32 to vector<16x128xf32>
    %669 = arith.mulf %668, %667 : vector<16x128xf32>
    %670 = arith.addf %664, %669 : vector<16x128xf32>
    %c79 = arith.constant 79 : index
    %671 = memref.load %arg2[%c79] : memref<98xf32, #tpu.memory_space<smem>>
    %c1_517 = arith.constant 1 : index
    %c2_518 = arith.constant 2 : index
    %c4_519 = arith.constant 4 : index
    %c0_520 = arith.constant 0 : index
    %672 = vector.load %arg4[%c1_517, %c2_518, %c4_519, %c0_520] : memref<2x7x22x128xf32, #tpu.memory_space<vmem>>, vector<1x1x16x128xf32>
    %673 = vector.shape_cast %672 : vector<1x1x16x128xf32> to vector<16x128xf32>
    %674 = vector.broadcast %671 : f32 to vector<16x128xf32>
    %675 = arith.mulf %674, %673 : vector<16x128xf32>
    %676 = arith.addf %670, %675 : vector<16x128xf32>
    %c80 = arith.constant 80 : index
    %677 = memref.load %arg2[%c80] : memref<98xf32, #tpu.memory_space<smem>>
    %c1_521 = arith.constant 1 : index
    %c3_522 = arith.constant 3 : index
    %c4_523 = arith.constant 4 : index
    %c0_524 = arith.constant 0 : index
    %678 = vector.load %arg4[%c1_521, %c3_522, %c4_523, %c0_524] : memref<2x7x22x128xf32, #tpu.memory_space<vmem>>, vector<1x1x16x128xf32>
    %679 = vector.shape_cast %678 : vector<1x1x16x128xf32> to vector<16x128xf32>
    %680 = vector.broadcast %677 : f32 to vector<16x128xf32>
    %681 = arith.mulf %680, %679 : vector<16x128xf32>
    %682 = arith.addf %676, %681 : vector<16x128xf32>
    %c81 = arith.constant 81 : index
    %683 = memref.load %arg2[%c81] : memref<98xf32, #tpu.memory_space<smem>>
    %c1_525 = arith.constant 1 : index
    %c4_526 = arith.constant 4 : index
    %c4_527 = arith.constant 4 : index
    %c0_528 = arith.constant 0 : index
    %684 = vector.load %arg4[%c1_525, %c4_526, %c4_527, %c0_528] : memref<2x7x22x128xf32, #tpu.memory_space<vmem>>, vector<1x1x16x128xf32>
    %685 = vector.shape_cast %684 : vector<1x1x16x128xf32> to vector<16x128xf32>
    %686 = vector.broadcast %683 : f32 to vector<16x128xf32>
    %687 = arith.mulf %686, %685 : vector<16x128xf32>
    %688 = arith.addf %682, %687 : vector<16x128xf32>
    %c82 = arith.constant 82 : index
    %689 = memref.load %arg2[%c82] : memref<98xf32, #tpu.memory_space<smem>>
    %c1_529 = arith.constant 1 : index
    %c5_530 = arith.constant 5 : index
    %c4_531 = arith.constant 4 : index
    %c0_532 = arith.constant 0 : index
    %690 = vector.load %arg4[%c1_529, %c5_530, %c4_531, %c0_532] : memref<2x7x22x128xf32, #tpu.memory_space<vmem>>, vector<1x1x16x128xf32>
    %691 = vector.shape_cast %690 : vector<1x1x16x128xf32> to vector<16x128xf32>
    %692 = vector.broadcast %689 : f32 to vector<16x128xf32>
    %693 = arith.mulf %692, %691 : vector<16x128xf32>
    %694 = arith.addf %688, %693 : vector<16x128xf32>
    %c83 = arith.constant 83 : index
    %695 = memref.load %arg2[%c83] : memref<98xf32, #tpu.memory_space<smem>>
    %c1_533 = arith.constant 1 : index
    %c6_534 = arith.constant 6 : index
    %c4_535 = arith.constant 4 : index
    %c0_536 = arith.constant 0 : index
    %696 = vector.load %arg4[%c1_533, %c6_534, %c4_535, %c0_536] : memref<2x7x22x128xf32, #tpu.memory_space<vmem>>, vector<1x1x16x128xf32>
    %697 = vector.shape_cast %696 : vector<1x1x16x128xf32> to vector<16x128xf32>
    %698 = vector.broadcast %695 : f32 to vector<16x128xf32>
    %699 = arith.mulf %698, %697 : vector<16x128xf32>
    %700 = arith.addf %694, %699 : vector<16x128xf32>
    %c84 = arith.constant 84 : index
    %701 = memref.load %arg2[%c84] : memref<98xf32, #tpu.memory_space<smem>>
    %c1_537 = arith.constant 1 : index
    %c0_538 = arith.constant 0 : index
    %c5_539 = arith.constant 5 : index
    %c0_540 = arith.constant 0 : index
    %702 = vector.load %arg4[%c1_537, %c0_538, %c5_539, %c0_540] : memref<2x7x22x128xf32, #tpu.memory_space<vmem>>, vector<1x1x16x128xf32>
    %703 = vector.shape_cast %702 : vector<1x1x16x128xf32> to vector<16x128xf32>
    %704 = vector.broadcast %701 : f32 to vector<16x128xf32>
    %705 = arith.mulf %704, %703 : vector<16x128xf32>
    %706 = arith.addf %658, %705 : vector<16x128xf32>
    %c85 = arith.constant 85 : index
    %707 = memref.load %arg2[%c85] : memref<98xf32, #tpu.memory_space<smem>>
    %c1_541 = arith.constant 1 : index
    %c1_542 = arith.constant 1 : index
    %c5_543 = arith.constant 5 : index
    %c0_544 = arith.constant 0 : index
    %708 = vector.load %arg4[%c1_541, %c1_542, %c5_543, %c0_544] : memref<2x7x22x128xf32, #tpu.memory_space<vmem>>, vector<1x1x16x128xf32>
    %709 = vector.shape_cast %708 : vector<1x1x16x128xf32> to vector<16x128xf32>
    %710 = vector.broadcast %707 : f32 to vector<16x128xf32>
    %711 = arith.mulf %710, %709 : vector<16x128xf32>
    %712 = arith.addf %706, %711 : vector<16x128xf32>
    %c86 = arith.constant 86 : index
    %713 = memref.load %arg2[%c86] : memref<98xf32, #tpu.memory_space<smem>>
    %c1_545 = arith.constant 1 : index
    %c2_546 = arith.constant 2 : index
    %c5_547 = arith.constant 5 : index
    %c0_548 = arith.constant 0 : index
    %714 = vector.load %arg4[%c1_545, %c2_546, %c5_547, %c0_548] : memref<2x7x22x128xf32, #tpu.memory_space<vmem>>, vector<1x1x16x128xf32>
    %715 = vector.shape_cast %714 : vector<1x1x16x128xf32> to vector<16x128xf32>
    %716 = vector.broadcast %713 : f32 to vector<16x128xf32>
    %717 = arith.mulf %716, %715 : vector<16x128xf32>
    %718 = arith.addf %712, %717 : vector<16x128xf32>
    %c87 = arith.constant 87 : index
    %719 = memref.load %arg2[%c87] : memref<98xf32, #tpu.memory_space<smem>>
    %c1_549 = arith.constant 1 : index
    %c3_550 = arith.constant 3 : index
    %c5_551 = arith.constant 5 : index
    %c0_552 = arith.constant 0 : index
    %720 = vector.load %arg4[%c1_549, %c3_550, %c5_551, %c0_552] : memref<2x7x22x128xf32, #tpu.memory_space<vmem>>, vector<1x1x16x128xf32>
    %721 = vector.shape_cast %720 : vector<1x1x16x128xf32> to vector<16x128xf32>
    %722 = vector.broadcast %719 : f32 to vector<16x128xf32>
    %723 = arith.mulf %722, %721 : vector<16x128xf32>
    %724 = arith.addf %718, %723 : vector<16x128xf32>
    %c88 = arith.constant 88 : index
    %725 = memref.load %arg2[%c88] : memref<98xf32, #tpu.memory_space<smem>>
    %c1_553 = arith.constant 1 : index
    %c4_554 = arith.constant 4 : index
    %c5_555 = arith.constant 5 : index
    %c0_556 = arith.constant 0 : index
    %726 = vector.load %arg4[%c1_553, %c4_554, %c5_555, %c0_556] : memref<2x7x22x128xf32, #tpu.memory_space<vmem>>, vector<1x1x16x128xf32>
    %727 = vector.shape_cast %726 : vector<1x1x16x128xf32> to vector<16x128xf32>
    %728 = vector.broadcast %725 : f32 to vector<16x128xf32>
    %729 = arith.mulf %728, %727 : vector<16x128xf32>
    %730 = arith.addf %724, %729 : vector<16x128xf32>
    %c89 = arith.constant 89 : index
    %731 = memref.load %arg2[%c89] : memref<98xf32, #tpu.memory_space<smem>>
    %c1_557 = arith.constant 1 : index
    %c5_558 = arith.constant 5 : index
    %c5_559 = arith.constant 5 : index
    %c0_560 = arith.constant 0 : index
    %732 = vector.load %arg4[%c1_557, %c5_558, %c5_559, %c0_560] : memref<2x7x22x128xf32, #tpu.memory_space<vmem>>, vector<1x1x16x128xf32>
    %733 = vector.shape_cast %732 : vector<1x1x16x128xf32> to vector<16x128xf32>
    %734 = vector.broadcast %731 : f32 to vector<16x128xf32>
    %735 = arith.mulf %734, %733 : vector<16x128xf32>
    %736 = arith.addf %730, %735 : vector<16x128xf32>
    %c90 = arith.constant 90 : index
    %737 = memref.load %arg2[%c90] : memref<98xf32, #tpu.memory_space<smem>>
    %c1_561 = arith.constant 1 : index
    %c6_562 = arith.constant 6 : index
    %c5_563 = arith.constant 5 : index
    %c0_564 = arith.constant 0 : index
    %738 = vector.load %arg4[%c1_561, %c6_562, %c5_563, %c0_564] : memref<2x7x22x128xf32, #tpu.memory_space<vmem>>, vector<1x1x16x128xf32>
    %739 = vector.shape_cast %738 : vector<1x1x16x128xf32> to vector<16x128xf32>
    %740 = vector.broadcast %737 : f32 to vector<16x128xf32>
    %741 = arith.mulf %740, %739 : vector<16x128xf32>
    %742 = arith.addf %736, %741 : vector<16x128xf32>
    %c91 = arith.constant 91 : index
    %743 = memref.load %arg2[%c91] : memref<98xf32, #tpu.memory_space<smem>>
    %c1_565 = arith.constant 1 : index
    %c0_566 = arith.constant 0 : index
    %c6_567 = arith.constant 6 : index
    %c0_568 = arith.constant 0 : index
    %744 = vector.load %arg4[%c1_565, %c0_566, %c6_567, %c0_568] : memref<2x7x22x128xf32, #tpu.memory_space<vmem>>, vector<1x1x16x128xf32>
    %745 = vector.shape_cast %744 : vector<1x1x16x128xf32> to vector<16x128xf32>
    %746 = vector.broadcast %743 : f32 to vector<16x128xf32>
    %747 = arith.mulf %746, %745 : vector<16x128xf32>
    %748 = arith.addf %700, %747 : vector<16x128xf32>
    %c92 = arith.constant 92 : index
    %749 = memref.load %arg2[%c92] : memref<98xf32, #tpu.memory_space<smem>>
    %c1_569 = arith.constant 1 : index
    %c1_570 = arith.constant 1 : index
    %c6_571 = arith.constant 6 : index
    %c0_572 = arith.constant 0 : index
    %750 = vector.load %arg4[%c1_569, %c1_570, %c6_571, %c0_572] : memref<2x7x22x128xf32, #tpu.memory_space<vmem>>, vector<1x1x16x128xf32>
    %751 = vector.shape_cast %750 : vector<1x1x16x128xf32> to vector<16x128xf32>
    %752 = vector.broadcast %749 : f32 to vector<16x128xf32>
    %753 = arith.mulf %752, %751 : vector<16x128xf32>
    %754 = arith.addf %748, %753 : vector<16x128xf32>
    %c93 = arith.constant 93 : index
    %755 = memref.load %arg2[%c93] : memref<98xf32, #tpu.memory_space<smem>>
    %c1_573 = arith.constant 1 : index
    %c2_574 = arith.constant 2 : index
    %c6_575 = arith.constant 6 : index
    %c0_576 = arith.constant 0 : index
    %756 = vector.load %arg4[%c1_573, %c2_574, %c6_575, %c0_576] : memref<2x7x22x128xf32, #tpu.memory_space<vmem>>, vector<1x1x16x128xf32>
    %757 = vector.shape_cast %756 : vector<1x1x16x128xf32> to vector<16x128xf32>
    %758 = vector.broadcast %755 : f32 to vector<16x128xf32>
    %759 = arith.mulf %758, %757 : vector<16x128xf32>
    %760 = arith.addf %754, %759 : vector<16x128xf32>
    %c94 = arith.constant 94 : index
    %761 = memref.load %arg2[%c94] : memref<98xf32, #tpu.memory_space<smem>>
    %c1_577 = arith.constant 1 : index
    %c3_578 = arith.constant 3 : index
    %c6_579 = arith.constant 6 : index
    %c0_580 = arith.constant 0 : index
    %762 = vector.load %arg4[%c1_577, %c3_578, %c6_579, %c0_580] : memref<2x7x22x128xf32, #tpu.memory_space<vmem>>, vector<1x1x16x128xf32>
    %763 = vector.shape_cast %762 : vector<1x1x16x128xf32> to vector<16x128xf32>
    %764 = vector.broadcast %761 : f32 to vector<16x128xf32>
    %765 = arith.mulf %764, %763 : vector<16x128xf32>
    %766 = arith.addf %760, %765 : vector<16x128xf32>
    %c95 = arith.constant 95 : index
    %767 = memref.load %arg2[%c95] : memref<98xf32, #tpu.memory_space<smem>>
    %c1_581 = arith.constant 1 : index
    %c4_582 = arith.constant 4 : index
    %c6_583 = arith.constant 6 : index
    %c0_584 = arith.constant 0 : index
    %768 = vector.load %arg4[%c1_581, %c4_582, %c6_583, %c0_584] : memref<2x7x22x128xf32, #tpu.memory_space<vmem>>, vector<1x1x16x128xf32>
    %769 = vector.shape_cast %768 : vector<1x1x16x128xf32> to vector<16x128xf32>
    %770 = vector.broadcast %767 : f32 to vector<16x128xf32>
    %771 = arith.mulf %770, %769 : vector<16x128xf32>
    %772 = arith.addf %766, %771 : vector<16x128xf32>
    %c96 = arith.constant 96 : index
    %773 = memref.load %arg2[%c96] : memref<98xf32, #tpu.memory_space<smem>>
    %c1_585 = arith.constant 1 : index
    %c5_586 = arith.constant 5 : index
    %c6_587 = arith.constant 6 : index
    %c0_588 = arith.constant 0 : index
    %774 = vector.load %arg4[%c1_585, %c5_586, %c6_587, %c0_588] : memref<2x7x22x128xf32, #tpu.memory_space<vmem>>, vector<1x1x16x128xf32>
    %775 = vector.shape_cast %774 : vector<1x1x16x128xf32> to vector<16x128xf32>
    %776 = vector.broadcast %773 : f32 to vector<16x128xf32>
    %777 = arith.mulf %776, %775 : vector<16x128xf32>
    %778 = arith.addf %772, %777 : vector<16x128xf32>
    %c97 = arith.constant 97 : index
    %779 = memref.load %arg2[%c97] : memref<98xf32, #tpu.memory_space<smem>>
    %c1_589 = arith.constant 1 : index
    %c6_590 = arith.constant 6 : index
    %c6_591 = arith.constant 6 : index
    %c0_592 = arith.constant 0 : index
    %780 = vector.load %arg4[%c1_589, %c6_590, %c6_591, %c0_592] : memref<2x7x22x128xf32, #tpu.memory_space<vmem>>, vector<1x1x16x128xf32>
    %781 = vector.shape_cast %780 : vector<1x1x16x128xf32> to vector<16x128xf32>
    %782 = vector.broadcast %779 : f32 to vector<16x128xf32>
    %783 = arith.mulf %782, %781 : vector<16x128xf32>
    %784 = arith.addf %778, %783 : vector<16x128xf32>
    %785 = arith.addf %490, %448 : vector<16x128xf32>
    %786 = arith.addf %784, %742 : vector<16x128xf32>
    %787 = arith.addf %785, %786 : vector<16x128xf32>
    %788 = vector.extract_strided_slice %787 {offsets = [0, 0], sizes = [16, 16], strides = [1, 1]} : vector<16x128xf32> to vector<16x16xf32>
    %cst_593 = arith.constant 0.000000e+00 : f32
    %789 = vector.broadcast %cst_593 : f32 to vector<16x16xf32>
    %790 = arith.subf %789, %788 : vector<16x16xf32>
    %791 = math.exp %790 : vector<16x16xf32>
    %cst_594 = arith.constant 1.000000e+00 : f32
    %792 = vector.broadcast %cst_594 : f32 to vector<16x16xf32>
    %793 = arith.addf %792, %791 : vector<16x16xf32>
    %794 = tpu.reciprocal %793 {approx = true} : vector<16x16xf32> -> vector<16x16xf32>
    %795 = vector.extract_strided_slice %794 {offsets = [0, 0], sizes = [1, 16], strides = [1, 1]} : vector<16x16xf32> to vector<1x16xf32>
    %c0_595 = arith.constant 0 : index
    %c0_596 = arith.constant 0 : index
    %796 = vector.load %arg5[%c0_595, %c0_596] : memref<1x256xf32, #tpu.memory_space<vmem>>, vector<1x16xf32>
    tpu.vector_store %arg5[%c0_595, %c0_596], %795 {strides = array<i32>} : memref<1x256xf32, #tpu.memory_space<vmem>>, vector<1x16xf32>,
    %797 = vector.extract_strided_slice %794 {offsets = [1, 0], sizes = [1, 16], strides = [1, 1]} : vector<16x16xf32> to vector<1x16xf32>
    %c0_597 = arith.constant 0 : index
    %c16_598 = arith.constant 16 : index
    %798 = vector.load %arg5[%c0_597, %c16_598] : memref<1x256xf32, #tpu.memory_space<vmem>>, vector<1x16xf32>
    tpu.vector_store %arg5[%c0_597, %c16_598], %797 {strides = array<i32>} : memref<1x256xf32, #tpu.memory_space<vmem>>, vector<1x16xf32>,
    %799 = vector.extract_strided_slice %794 {offsets = [2, 0], sizes = [1, 16], strides = [1, 1]} : vector<16x16xf32> to vector<1x16xf32>
    %c0_599 = arith.constant 0 : index
    %c32_600 = arith.constant 32 : index
    %800 = vector.load %arg5[%c0_599, %c32_600] : memref<1x256xf32, #tpu.memory_space<vmem>>, vector<1x16xf32>
    tpu.vector_store %arg5[%c0_599, %c32_600], %799 {strides = array<i32>} : memref<1x256xf32, #tpu.memory_space<vmem>>, vector<1x16xf32>,
    %801 = vector.extract_strided_slice %794 {offsets = [3, 0], sizes = [1, 16], strides = [1, 1]} : vector<16x16xf32> to vector<1x16xf32>
    %c0_601 = arith.constant 0 : index
    %c48_602 = arith.constant 48 : index
    %802 = vector.load %arg5[%c0_601, %c48_602] : memref<1x256xf32, #tpu.memory_space<vmem>>, vector<1x16xf32>
    tpu.vector_store %arg5[%c0_601, %c48_602], %801 {strides = array<i32>} : memref<1x256xf32, #tpu.memory_space<vmem>>, vector<1x16xf32>,
    %803 = vector.extract_strided_slice %794 {offsets = [4, 0], sizes = [1, 16], strides = [1, 1]} : vector<16x16xf32> to vector<1x16xf32>
    %c0_603 = arith.constant 0 : index
    %c64_604 = arith.constant 64 : index
    %804 = vector.load %arg5[%c0_603, %c64_604] : memref<1x256xf32, #tpu.memory_space<vmem>>, vector<1x16xf32>
    tpu.vector_store %arg5[%c0_603, %c64_604], %803 {strides = array<i32>} : memref<1x256xf32, #tpu.memory_space<vmem>>, vector<1x16xf32>,
    %805 = vector.extract_strided_slice %794 {offsets = [5, 0], sizes = [1, 16], strides = [1, 1]} : vector<16x16xf32> to vector<1x16xf32>
    %c0_605 = arith.constant 0 : index
    %c80_606 = arith.constant 80 : index
    %806 = vector.load %arg5[%c0_605, %c80_606] : memref<1x256xf32, #tpu.memory_space<vmem>>, vector<1x16xf32>
    tpu.vector_store %arg5[%c0_605, %c80_606], %805 {strides = array<i32>} : memref<1x256xf32, #tpu.memory_space<vmem>>, vector<1x16xf32>,
    %807 = vector.extract_strided_slice %794 {offsets = [6, 0], sizes = [1, 16], strides = [1, 1]} : vector<16x16xf32> to vector<1x16xf32>
    %c0_607 = arith.constant 0 : index
    %c96_608 = arith.constant 96 : index
    %808 = vector.load %arg5[%c0_607, %c96_608] : memref<1x256xf32, #tpu.memory_space<vmem>>, vector<1x16xf32>
    tpu.vector_store %arg5[%c0_607, %c96_608], %807 {strides = array<i32>} : memref<1x256xf32, #tpu.memory_space<vmem>>, vector<1x16xf32>,
    %809 = vector.extract_strided_slice %794 {offsets = [7, 0], sizes = [1, 16], strides = [1, 1]} : vector<16x16xf32> to vector<1x16xf32>
    %c0_609 = arith.constant 0 : index
    %c112 = arith.constant 112 : index
    %810 = vector.load %arg5[%c0_609, %c112] : memref<1x256xf32, #tpu.memory_space<vmem>>, vector<1x16xf32>
    tpu.vector_store %arg5[%c0_609, %c112], %809 {strides = array<i32>} : memref<1x256xf32, #tpu.memory_space<vmem>>, vector<1x16xf32>,
    %811 = vector.extract_strided_slice %794 {offsets = [8, 0], sizes = [1, 16], strides = [1, 1]} : vector<16x16xf32> to vector<1x16xf32>
    %c0_610 = arith.constant 0 : index
    %c128 = arith.constant 128 : index
    %812 = vector.load %arg5[%c0_610, %c128] : memref<1x256xf32, #tpu.memory_space<vmem>>, vector<1x16xf32>
    tpu.vector_store %arg5[%c0_610, %c128], %811 {strides = array<i32>} : memref<1x256xf32, #tpu.memory_space<vmem>>, vector<1x16xf32>,
    %813 = vector.extract_strided_slice %794 {offsets = [9, 0], sizes = [1, 16], strides = [1, 1]} : vector<16x16xf32> to vector<1x16xf32>
    %c0_611 = arith.constant 0 : index
    %c144 = arith.constant 144 : index
    %814 = vector.load %arg5[%c0_611, %c144] : memref<1x256xf32, #tpu.memory_space<vmem>>, vector<1x16xf32>
    tpu.vector_store %arg5[%c0_611, %c144], %813 {strides = array<i32>} : memref<1x256xf32, #tpu.memory_space<vmem>>, vector<1x16xf32>,
    %815 = vector.extract_strided_slice %794 {offsets = [10, 0], sizes = [1, 16], strides = [1, 1]} : vector<16x16xf32> to vector<1x16xf32>
    %c0_612 = arith.constant 0 : index
    %c160 = arith.constant 160 : index
    %816 = vector.load %arg5[%c0_612, %c160] : memref<1x256xf32, #tpu.memory_space<vmem>>, vector<1x16xf32>
    tpu.vector_store %arg5[%c0_612, %c160], %815 {strides = array<i32>} : memref<1x256xf32, #tpu.memory_space<vmem>>, vector<1x16xf32>,
    %817 = vector.extract_strided_slice %794 {offsets = [11, 0], sizes = [1, 16], strides = [1, 1]} : vector<16x16xf32> to vector<1x16xf32>
    %c0_613 = arith.constant 0 : index
    %c176 = arith.constant 176 : index
    %818 = vector.load %arg5[%c0_613, %c176] : memref<1x256xf32, #tpu.memory_space<vmem>>, vector<1x16xf32>
    tpu.vector_store %arg5[%c0_613, %c176], %817 {strides = array<i32>} : memref<1x256xf32, #tpu.memory_space<vmem>>, vector<1x16xf32>,
    %819 = vector.extract_strided_slice %794 {offsets = [12, 0], sizes = [1, 16], strides = [1, 1]} : vector<16x16xf32> to vector<1x16xf32>
    %c0_614 = arith.constant 0 : index
    %c192 = arith.constant 192 : index
    %820 = vector.load %arg5[%c0_614, %c192] : memref<1x256xf32, #tpu.memory_space<vmem>>, vector<1x16xf32>
    tpu.vector_store %arg5[%c0_614, %c192], %819 {strides = array<i32>} : memref<1x256xf32, #tpu.memory_space<vmem>>, vector<1x16xf32>,
    %821 = vector.extract_strided_slice %794 {offsets = [13, 0], sizes = [1, 16], strides = [1, 1]} : vector<16x16xf32> to vector<1x16xf32>
    %c0_615 = arith.constant 0 : index
    %c208 = arith.constant 208 : index
    %822 = vector.load %arg5[%c0_615, %c208] : memref<1x256xf32, #tpu.memory_space<vmem>>, vector<1x16xf32>
    tpu.vector_store %arg5[%c0_615, %c208], %821 {strides = array<i32>} : memref<1x256xf32, #tpu.memory_space<vmem>>, vector<1x16xf32>,
    %823 = vector.extract_strided_slice %794 {offsets = [14, 0], sizes = [1, 16], strides = [1, 1]} : vector<16x16xf32> to vector<1x16xf32>
    %c0_616 = arith.constant 0 : index
    %c224 = arith.constant 224 : index
    %824 = vector.load %arg5[%c0_616, %c224] : memref<1x256xf32, #tpu.memory_space<vmem>>, vector<1x16xf32>
    tpu.vector_store %arg5[%c0_616, %c224], %823 {strides = array<i32>} : memref<1x256xf32, #tpu.memory_space<vmem>>, vector<1x16xf32>,
    %825 = vector.extract_strided_slice %794 {offsets = [15, 0], sizes = [1, 16], strides = [1, 1]} : vector<16x16xf32> to vector<1x16xf32>
    %c0_617 = arith.constant 0 : index
    %c240 = arith.constant 240 : index
    %826 = vector.load %arg5[%c0_617, %c240] : memref<1x256xf32, #tpu.memory_space<vmem>>, vector<1x16xf32>
    tpu.vector_store %arg5[%c0_617, %c240], %825 {strides = array<i32>} : memref<1x256xf32, #tpu.memory_space<vmem>>, vector<1x16xf32>,
    %c0_618 = arith.constant 0 : index
    %c0_619 = arith.constant 0 : index
    %827 = vector.load %arg5[%c0_618, %c0_619] : memref<1x256xf32, #tpu.memory_space<vmem>>, vector<1x256xf32>
    %c0_620 = arith.constant 0 : index
    %c0_621 = arith.constant 0 : index
    %c0_622 = arith.constant 0 : index
    %828 = vector.load %arg1[%c0_620, %c0_621, %c0_622] : memref<1x4x256xf32, #tpu.memory_space<vmem>>, vector<1x4x256xf32>
    %829 = vector.shape_cast %828 : vector<1x4x256xf32> to vector<4x256xf32>
    %830 = vector.broadcast %827 : vector<1x256xf32> to vector<4x256xf32>
    %831 = arith.mulf %829, %830 : vector<4x256xf32>
    %c0_623 = arith.constant 0 : index
    %c0_624 = arith.constant 0 : index
    %c0_625 = arith.constant 0 : index
    %832 = vector.load %arg3[%c0_623, %c0_624, %c0_625] : memref<1x4x256xf32, #tpu.memory_space<vmem>>, vector<1x4x256xf32>
    %833 = vector.shape_cast %832 : vector<1x4x256xf32> to vector<4x256xf32>
    %834 = vector.shape_cast %831 : vector<4x256xf32> to vector<1x4x256xf32>
    tpu.vector_store %arg3[%c0_623, %c0_624, %c0_625], %834 {strides = array<i32>} : memref<1x4x256xf32, #tpu.memory_space<vmem>>, vector<1x4x256xf32>,
    return
  }
  func.func @transform_0(%arg0: i32) -> (i32, i32, i32) {
    %c0_i32 = arith.constant 0 : i32
    %c0_i32_0 = arith.constant 0 : i32
    %c0_i32_1 = arith.constant 0 : i32
    return %arg0, %c0_i32, %c0_i32_0 : i32, i32, i32
  }
  func.func @transform_1(%arg0: i32) -> i32 {
    %c0_i32 = arith.constant 0 : i32
    %c0_i32_0 = arith.constant 0 : i32
    return %c0_i32 : i32
  }
  func.func @transform_2(%arg0: i32) -> (i32, i32, i32) {
    %c0_i32 = arith.constant 0 : i32
    %c0_i32_0 = arith.constant 0 : i32
    %c0_i32_1 = arith.constant 0 : i32
    return %arg0, %c0_i32, %c0_i32_0 : i32, i32, i32
  }
}

</mosaic_0001>

<bundles_post_ra>
// kernel: tpu_custom_call.1
= control target key start
LH: loop header
LB: loop body
LE: loop exit
PB: predicated region body
PF: predicated region fallthrough
CT: control target
= control target key end

     0   :  { %s3226_s0 = inlined_call_operand.hbm [shape: f32[2,4,256], index: 0, kind: input, shape index: {}]   ;;  %s3227_s1 = inlined_call_operand.hbm [shape: f32[98], index: 1, kind: input, shape index: {}]   ;;  %s3228_s2 = inlined_call_operand.hbm [shape: f32[2,4,256], index: 2, kind: output, shape index: {}]  }
   0x1   :  { %3398 = sst [smem:[#allocation79_spill]] %s3226_s0 }
   0x2   :  { %3399 = sst [smem:[#allocation80_spill]] %s3227_s1 }
   0x3   :  { %3400 = sst [smem:[#allocation81_spill]] %s3228_s2 }
   0x4   :  { %7 = vsyncpa [#allocation5], 0 }
   0x5   :  { %9 = vsyncpa [#allocation5 + $0x1], 0 }
   0x6   :  { %10 = vsyncpa [#allocation7], 0 }
   0x7   :  { %11 = vsyncpa [#allocation6], 0 }
   0x8   :  { %13 = vsyncpa [#allocation6 + $0x1], 0  ;;  %s1931_s9 = smov 0   ;;  %s1933_s10 = smov 0  }
   0x9   :  { %s1935_s11 = smov 0   ;;  %s1937_s12 = smov 0  }
   0xa LB: > { %3401 = sst [smem:[#allocation13_spill]] %s1879_s9  ;;  %s1952_s13 = sadd.s32 4294967295, %s1891_s12   ;;  %s1891_s12 = sphi %s1937_s12, %s3741_s12   ;;  %s1887_s11 = sphi %s1935_s11, %s3744_s11   ;;  %s1883_s10 = sphi %s1933_s10, %s3743_s10   ;;  %s1879_s9 = sphi %s1931_s9, %s3742_s9  }
   0xb   : > { %3402 = sst [smem:[#allocation14_spill]] %s1883_s10  ;;  %s1573_s14 = sadd.s32 4294967294, %s1891_s12  }
   0xc   : > { %3403 = sst [smem:[#allocation15_spill]] %s1887_s11  ;;  %p39_p0 = scmp.ne.s32.totalorder %s1883_s10, %s1879_s9 }
   0xd   : > { %3404 = sst [smem:[#allocation16_spill]] %s1891_s12  ;;  %p40_p1 = scmp.eq.s32.totalorder %s1952_s13, 0 }
   0xe   : > { %3405 = sst [smem:[#allocation17_spill]] %s1952_s13  ;;  %p84_p2 = scmp.eq.s32.totalorder %s1952_s13, 1 }
   0xf   : > { %p90_p3 = scmp.eq.s32.totalorder %s1573_s14, 1  ;;  %p1961_p4 = por %p40_p1, %p39_p0 }
  0x10   : > { %p1574_p5 = scmp.ge.s32.totalorder %s1891_s12, 1  ;;  %p97_p7 = scmp.lt.s32.totalorder %s1891_s12, 3 }
  0x11   : > { %p1966_p6 = por %p90_p3, %p39_p0  ;;  %s3409_s1 = sld [smem:[#allocation80_spill]] }
  0x12   : > { %p1974_p8 = pnand %p1574_p5, %p97_p7  ;;  %s1982_s21 = sadd.s32 1, %s1891_s12  }
  0x13   : > { %s3407_s16 = scalar_select %p1966_p6, 1, 0 }
  0x14   : > { %p1696_p10 = pneg %p1974_p8  ;;  %3411 = sst [smem:[#allocation19_spill]] %s1982_s21 }
  0x15   : > { %3408 = sst [smem:[#allocation18_spill]] %s3407_s16  ;;  %s23_s22 = ssub.s32 %s1891_s12, %s1982_s21 }
  0x16   : > { %p1697_p11 = pnand %p1696_p10, %p40_p1  ;;  %p24_p12 = scmp.eq.s32.totalorder %s23_s22, 0 }
  0x17   : > { %s109_s19 = sshll.u32 %s3409_s1, 4  ;;  %s26_s23 = sadd.s32 1, %s1887_s11  ;;  %s110_s19 = int_to_ptr.hbm [resolvable:$true] %s109_s19 }
  0x18   : > { %p33_p13 = scmp.ne.s32.totalorder %s1887_s11, %s1883_s10  ;;  %s1893_s24 = smov [#allocation8]  }
  0x19   : > { %1699 = dma.hbm_to_smem (!%p1697_p11), %s110_s19, 16, %s1893_s24, [#allocation7]  }
  0x1a   : > { %s1992_s25 = scalar_select %p24_p12, %s1887_s11, %s26_s23  }
  0x1b   : > { %p34_p0 = scmp.eq.s32.totalorder %s1891_s12, 0  ;;  %p1997_p3 = por %p84_p2, %p33_p13 }
  0x1c   : > { %3412 = sst [smem:[#allocation20_spill]] %s1992_s25  ;;  %s120_s27 = sand.u32 1, %s1887_s11  }
  0x1d   : > { %s3413_s26 = scalar_select %p1997_p3, 1, 0 }
  0x1e   : > { %p35_p5 = por %p34_p0, %p33_p13  ;;  %p1709_p7 = scmp.lt.s32.totalorder %s1891_s12, 2 }
  0x1f   : > { %3414 = sst [smem:[#allocation21_spill]] %s3413_s26  ;;  %s1577_s28 = sshll.u32 %s120_s27, 3 }
  0x20   : > { %s1686_s29 = sshll.u32 %s1891_s12, 3  ;;  %s3415_s0 = sld [smem:[#allocation79_spill]] }
  0x21   : > { %s124_s6 = scalar_lea.vmem [#allocation4], %s1577_s28  ;;  %p2007_p10 = pnand %p1709_p7, %p35_p5 }
  0x22   : > { %s133_s7 = sshll.u32 %s124_s6, 4  ;;  %s121_s14 = scalar_lea.sflag [#allocation5], %s120_s27  ;;  %s134_s7 = int_to_ptr.vmem [resolvable:$true] %s133_s7 }
  0x23   : > { %p1795_p11 = pneg %p2007_p10 }
  0x26   : > { %s129_s4 = scalar_lea.hbm %s3415_s0, %s1686_s29  ;;  %s1798_s23 = scalar_lea.hbm %s3415_s0, 16 }
  0x27   : > { %s131_s5 = sshll.u32 %s129_s4, 4  ;;  %s132_s5 = int_to_ptr.hbm [resolvable:$true] %s131_s5 }
  0x28   : > { %s1791_s17 = sshra.s32 %s132_s5, 4  ;;  %s1792_s17 = int_to_ptr.hbm [resolvable:$true] %s1791_s17 }
  0x29   : > { %s1793_s18 = scalar_lea.hbm %s1792_s17, 8  ;;  %p1799_p0 = scmp.lt.s32.totalorder %s1792_s17, %s3415_s0 }
  0x2a   : > { %p1794_p2 = scmp.ne.s32.totalorder %s1792_s17, %s1793_s18  ;;  %p1800_p5 = scmp.lt.s32.totalorder %s1798_s23, %s1793_s18 }
  0x2c   : > { %p1796_p12 = pnand %p1795_p11, %p1794_p2  ;;  %p1801_p7 = por %p1800_p5, %p1799_p0 }
  0x2e   : > { %p1797_p13 = pneg %p1796_p12 }
  0x30   : > { %p1802_p9 = pnand %p1801_p7, %p1797_p13 }
  0x32   : > { %1805 = shalt.err (!%p1802_p9)
}
  0x33   : > { %1703 = dma.hbm_to_vmem [thread:$0]  (!%p2007_p10), %s132_s5, 128, %s134_s7, %s121_s14  }
  0x34   : > { %142 = sbr.rel (%p1974_p8) target bundleno = 826 (0x33a), region = 28 }
  0x39   : > { %s2024_s27 = sand.u32 1, %s1883_s10  }
  0x3a   : > { %3417 = sst [smem:[#allocation22_spill]] %s2024_s27  ;;  %s3229_s29 = sshll.u32 %s2024_s27, 3 }
  0x3b   : > { %s145_s30 = scalar_lea.sflag [#allocation5], %s2024_s27  ;;  %s2030_s3 = scalar_lea.vmem [#allocation4], %s3229_s29 }
  0x3c   : > { %3418 = sst [smem:[#allocation23_spill]] %s2030_s3 }
  0x3d   : > { %1866 = dma.done.wait (%p1961_p4), %s145_s30, 128  }
  0x3e   : > { %1868 = vsyncadd (%p1961_p4), %s145_s30, 4294967168 }
  0x3f   : > { %1870 = dma.done.wait (%p40_p1), [#allocation7], 16  }
  0x40   : > { %1872 = vsyncadd (%p40_p1), [#allocation7], 4294967280 }
  0x41   : > { %159 = sfence }
  0x42   : > { %v176_v0 = vld [vmem:[%s2030_s3] sm:$0xff]  ;;  %vm3392_vm0 = vcmask 1043456   ;;  %s1894_s15 = smov 115   ;;  %s1895_s20 = smov 3   ;;  %v1902_v33 = vmov 0.0   ;;  %vm228_vm1 = vcmask 147480  }
  0x43   : > { %178 = vst [vmem:[#allocation1] ss:$2 sm:$0xff] %v176_v0  ;;  %s1896_s4 = smov 99   ;;  %s1897_s5 = smov 51   ;;  %vm373_vm2 = vcmask 1039360   ;;  %vm418_vm3 = vcmask 1014784  }
  0x44   : > { %s1898_s6 = smov 83   ;;  %s1899_s7 = smov 67   ;;  %217 = vst [vmem:[#allocation2] sm:$0xff] %v1902_v33  ;;  %vm388_vm4 = vcmask 1031168   ;;  %vm403_vm5 = vcmask 1022976   ;;  %vm433_vm6 = vcmask 1006592  }
  0x45   : > { %s1900_s8 = smov 35   ;;  %s1901_s14 = smov 19   ;;  %218 = vst [vmem:[#allocation2 + $0x8] sm:$0xff] %v1902_v33  ;;  %vm448_vm7 = vcmask 998400   ;;  %vm376_vm8 = vcmask 1037312   ;;  %vm391_vm9 = vcmask 1029120  }
  0x46   : > { %219 = vst [vmem:[#allocation2 + $0x10] sm:$0x3f] %v1902_v33  ;;  %s3238_s17 = smov 125   ;;  %s3237_s18 = smov 126   ;;  %vm421_vm11 = vcmask 1012736   ;;  %vm436_vm12 = vcmask 1004544  }
  0x47   : > { %221 = vst [vmem:[#allocation2 + $0xa8] sm:$0xff] %v1902_v33  ;;  %s3236_s19 = smov 127   ;;  %s3230_s22 = smov 122   ;;  %vm406_vm13 = vcmask 1020928   ;;  %vm451_vm14 = vcmask 996352  }
  0x48   : > { %222 = vst [vmem:[#allocation2 + $0xb0] sm:$0xff] %v1902_v33  ;;  %s3234_s23 = smov 123   ;;  %s3232_s24 = smov 124  }
  0x49   : > { %223 = vst [vmem:[#allocation2 + $0xb8] sm:$0x3f] %v1902_v33  ;;  %s2124_s28 = sld [smem:[#allocation8 + $0x31]] }
  0x4a   : > { %v179_v1 = vld.sshfl [vmem:[#allocation1] sm:$0xff pattern:$0x75316420]  ;;  %v180_v2 = vld.sshfl [vmem:[#allocation1 + $0x8] sm:$0xff pattern:$0x75316420] }
  0x4b   : > { %v184_v3 = vsel %vm3392_vm0, %v179_v1, 0.0  ;;  %198 = vst [vmem:[#allocation1] ss:$2 sm:$0xff] %v176_v0  ;;  %v191_v18 = vsel %vm3392_vm0, %v180_v2, 0.0  ;;  %s2126_s30 = sld [smem:[#allocation8]] }
  0x4c   : > { %v185_v4 = vrot.slane %v184_v3, 4  ;;  %v192_v20 = vrot.slane %v191_v18, 4  ;;  %s2200_s29 = sld [smem:[#allocation8 + $0x54]] }
  0x4d   : > { %s2214_s0 = sld [smem:[#allocation8 + $0x3]] }
  0x4e   : > { %v186_v5 = vadd.f32 %v185_v4, %v184_v3  ;;  %v193_v23 = vadd.f32 %v192_v20, %v191_v18  ;;  %s2216_s1 = sld [smem:[#allocation8 + $0x5]] }
  0x4f   : > { %v932_v62 = vstv %s2124_s28  ;;  %s2218_s25 = sld [smem:[#allocation8 + $0x6]] }
  0x50   : > { %v187_v6 = vrot.slane %v186_v5, 2  ;;  %v194_v25 = vrot.slane %v193_v23, 2  ;;  %s2220_s11 = sld [smem:[#allocation8 + $0x8]] }
  0x51   : > { %v540_v2 = vstv %s2126_s30  ;;  %s2222_s10 = sld [smem:[#allocation8 + $0xf]] }
  0x52   : > { %v188_v7 = vadd.f32 %v187_v6, %v186_v5  ;;  %v199_v8 = vld.sshfl [vmem:[#allocation1] sm:$0xff pattern:$0x75316420]  ;;  %v200_v19 = vld.sshfl [vmem:[#allocation1 + $0x8] sm:$0xff pattern:$0x75316420]  ;;  %v195_v27 = vadd.f32 %v194_v25, %v193_v23 }
  0x53   : > { %v203_v9 = vsel %vm3392_vm0, %v199_v8, -inf  ;;  %v210_v21 = vsel %vm3392_vm0, %v200_v19, -inf  ;;  %3424 = sst [smem:[#allocation29_spill]] %s2200_s29 }
  0x54   : > { %v189_v10 = vrot.slane %v188_v7, 1  ;;  %v204_v11 = vrot.slane %v203_v9, 4  ;;  %v211_v22 = vrot.slane %v210_v21, 4  ;;  %v196_v29 = vrot.slane %v195_v27, 1  ;;  %s2224_s21 = sld [smem:[#allocation8 + $0x16]] }
  0x55   : > { %3428 = sst [smem:[#allocation33_spill]] %s2218_s25 }
  0x56   : > { %v190_v12 = vadd.f32 %v189_v10, %v188_v7  ;;  %v205_v13 = vmax.f32 %v203_v9, %v204_v11  ;;  %v212_v24 = vmax.f32 %v210_v21, %v211_v22  ;;  %v197_v31 = vadd.f32 %v196_v29, %v195_v27  ;;  %3429 = sst [smem:[#allocation34_spill]] %s2220_s11 }
  0x57   : > { %3430 = sst [smem:[#allocation35_spill]] %s2222_s10 }
  0x58   : > { %235 = vrot.lane.b32.xlu1 %v190_v12, %s1894_s15  ;;  %225 = vrot.lane.b32.xlu0 %v190_v12, %s1895_s20  ;;  %v206_v14 = vrot.slane %v205_v13, 2  ;;  %v213_v26 = vrot.slane %v212_v24, 2  ;;  %s2226_s12 = sld [smem:[#allocation8 + $0x1d]] }
  0x59   : > { %243 = vrot.lane.b32.xlu2 %v190_v12, %s1896_s4  ;;  %s2228_s16 = sld [smem:[#allocation8 + $0x24]] }
  0x5a   : > { %v207_v15 = vmax.f32 %v205_v13, %v206_v14  ;;  %v214_v28 = vmax.f32 %v212_v24, %v213_v26  ;;  %3431 = sst [smem:[#allocation36_spill]] %s2224_s21 }
  0x5b   : > { %s2230_s9 = sld [smem:[#allocation8 + $0x2b]] }
  0x5c   : > { %v208_v16 = vrot.slane %v207_v15, 1  ;;  %v215_v30 = vrot.slane %v214_v28, 1  ;;  %s2232_s26 = sld [smem:[#allocation8 + $0xb]] }
  0x5d   : > { %s2235_s2 = sld [smem:[#allocation8 + $0x12]] }
  0x5e   : > { %v209_v17 = vmax.f32 %v207_v15, %v208_v16  ;;  %v2060_v32 = vmax.f32 %v214_v28, %v215_v30  ;;  %3432 = sst [smem:[#allocation37_spill]] %s2226_s12  ;;  %v564_v30 = vstv %s2214_s0 }
  0x5f   : > { %3433 = sst [smem:[#allocation38_spill]] %s2228_s16 }
  0x60   : > { %267 = vrot.lane.b32.xlu1 %v190_v12, %s1897_s5  ;;  %251 = vrot.lane.b32.xlu0 %v190_v12, %s1898_s6  ;;  %s2237_s27 = sld [smem:[#allocation8 + $0x19]] }
  0x61   : > { %259 = vrot.lane.b32.xlu2 %v190_v12, %s1899_s7  ;;  %3434 = sst [smem:[#allocation39_spill]] %s2230_s9 }
  0x62   : > { %3435 = sst [smem:[#allocation40_spill]] %s2232_s26 }
  0x63   : > { %3436 = sst [smem:[#allocation41_spill]] %s2235_s2 }
  0x64   : > { %s2239_s3 = sld [smem:[#allocation8 + $0x20]] }
  0x65   : > { %s2241_s13 = sld [smem:[#allocation8 + $0x27]] }
  0x66   : > { %3437 = sst [smem:[#allocation42_spill]] %s2237_s27 }
  0x67   : > { %s2243_s21 = sld [smem:[#allocation8 + $0x2e]] }
  0x68   : > { %239 = vrot.lane.b32.xlu1 %v209_v17, %s1894_s15  ;;  %231 = vrot.lane.b32.xlu0 %v209_v17, %s1895_s20  ;;  %s2245_s12 = sld [smem:[#allocation8 + $0x33]] }
  0x69   : > { %247 = vrot.lane.b32.xlu2 %v209_v17, %s1896_s4  ;;  %s2247_s16 = sld [smem:[#allocation8 + $0x9]] }
  0x6a   : > { %3438 = sst [smem:[#allocation43_spill]] %s2239_s3 }
  0x6b   : > { %3439 = sst [smem:[#allocation44_spill]] %s2241_s13 }
  0x6c   : > { %s2250_s26 = sld [smem:[#allocation8 + $0x10]] }
  0x6d   : > { %3440 = sst [smem:[#allocation45_spill]] %s2243_s21 }
  0x6e   : > { %3441 = sst [smem:[#allocation46_spill]] %s2245_s12 }
  0x6f   : > { %3442 = sst [smem:[#allocation47_spill]] %s2247_s16 }
  0x70   : > { %255 = vrot.lane.b32.xlu1 %v209_v17, %s1898_s6  ;;  %263 = vrot.lane.b32.xlu0 %v209_v17, %s1899_s7  ;;  %s2253_s3 = sld [smem:[#allocation8 + $0x17]] }
  0x71   : > { %271 = vrot.lane.b32.xlu2 %v209_v17, %s1897_s5  ;;  %s2255_s13 = sld [smem:[#allocation8 + $0x1e]] }
  0x72   : > { %3443 = sst [smem:[#allocation48_spill]] %s2250_s26 }
  0x73   : > { %s2260_s12 = sld [smem:[#allocation8 + $0x25]] }
  0x74   : > { %s2264_s16 = sld [smem:[#allocation8 + $0x36]] }
  0x75   : > { %s2267_s26 = sld [smem:[#allocation8 + $0xa]] }
  0x76   : > { %3444 = sst [smem:[#allocation49_spill]] %s2253_s3 }
  0x77   : > { %3445 = sst [smem:[#allocation50_spill]] %s2255_s13 }
  0x78   : > { %279 = vrot.lane.b32.xlu1 %v209_v17, %s1900_s8  ;;  %275 = vrot.lane.b32.xlu0 %v190_v12, %s1900_s8  ;;  %s2269_s21 = sld [smem:[#allocation8 + $0x11]] }
  0x79   : > { %283 = vrot.lane.b32.xlu2 %v190_v12, %s1901_s14  ;;  %3446 = sst [smem:[#allocation51_spill]] %s2260_s12 }
  0x7a   : > { %3448 = sst [smem:[#allocation53_spill]] %s2264_s16 }
  0x7b   : > { %3449 = sst [smem:[#allocation54_spill]] %s2267_s26 }
  0x7c   : > { %s2271_s13 = sld [smem:[#allocation8 + $0x18]] }
  0x7d   : > { %s2279_s16 = sld [smem:[#allocation8 + $0x1f]] }
  0x7e   : > { %3450 = sst [smem:[#allocation55_spill]] %s2269_s21 }
  0x7f   : > { %s2283_s26 = sld [smem:[#allocation8 + $0x2d]] }
  0x80   : > { %292 = vrot.lane.b32.xlu1 %v197_v31, %s1895_s20  ;;  %287 = vrot.lane.b32.xlu0 %v209_v17, %s1901_s14  ;;  %s2288_s30 = sld [smem:[#allocation8 + $0x13]] }
  0x81   : > { %297 = vrot.lane.b32.xlu2 %v2060_v32, %s1895_s20  ;;  %s2185_s20 = sld [smem:[#allocation8 + $0x38]] }
  0x82   : > { %3451 = sst [smem:[#allocation56_spill]] %s2271_s13 }
  0x83   : > { %3452 = sst [smem:[#allocation57_spill]] %s2279_s16 }
  0x84   : > { %s2286_s13 = sld [smem:[#allocation8 + $0xc]] }
  0x85   : > { %3454 = sst [smem:[#allocation59_spill]] %s2283_s26 }
  0x86   : > { %3456 = sst [smem:[#allocation61_spill]] %s2288_s30 }
  0x87   : > { %3419 = sst [smem:[#allocation24_spill]] %s2185_s20 }
  0x88   : > { %305 = vrot.lane.b32.xlu1 %v2060_v32, %s1894_s15  ;;  %301 = vrot.lane.b32.xlu0 %v197_v31, %s1894_s15  ;;  %s2182_s15 = sld [smem:[#allocation8 + $0x7]] }
  0x89   : > { %309 = vrot.lane.b32.xlu2 %v197_v31, %s1896_s4  ;;  %s2290_s21 = sld [smem:[#allocation8 + $0x1a]] }
  0x8a   : > { %3455 = sst [smem:[#allocation60_spill]] %s2286_s13 }
  0x8b   : > { %s2299_s30 = sld [smem:[#allocation8 + $0x28]] }
  0x8c   : > { %s2345_s28 = sld [smem:[#allocation8 + $0x56]] }
  0x8d   : > { %s3482_s0 = sld [smem:[#allocation50_spill]] }
  0x8e   : > { %s2474_s26 = sld [smem:[#allocation8 + $0x4e]] }
  0x8f   : > { %3457 = sst [smem:[#allocation62_spill]] %s2290_s21 }
  0x90   : > { %317 = vrot.lane.b32.xlu1 %v197_v31, %s1898_s6  ;;  %313 = vrot.lane.b32.xlu0 %v2060_v32, %s1896_s4  ;;  %s2188_s4 = sld [smem:[#allocation8 + $0x3f]] }
  0x91   : > { %321 = vrot.lane.b32.xlu2 %v2060_v32, %s1898_s6  ;;  %s2192_s6 = sld [smem:[#allocation8 + $0x15]] }
  0x92   : > { %3459 = sst [smem:[#allocation64_spill]] %s2299_s30 }
  0x93   : > { %s2310_s30 = sld [smem:[#allocation8 + $0x3a]] }
  0x94   : > { %3465 = sst [smem:[#allocation70_spill]] %s2345_s28 }
  0x95   : > { %s3478_s28 = sld [smem:[#allocation47_spill]] }
  0x96   : > { %s2575_s21 = sld [smem:[#allocation8 + $0x4a]] }
  0x97   : > { %3420 = sst [smem:[#allocation25_spill]] %s2192_s6 }
  0x98   : > { %329 = vrot.lane.b32.xlu1 %v2060_v32, %s1899_s7  ;;  %325 = vrot.lane.b32.xlu0 %v197_v31, %s1899_s7  ;;  %s2194_s7 = sld [smem:[#allocation8 + $0x1c]] }
  0x99   : > { %341 = vrot.lane.b32.xlu2 %v197_v31, %s1900_s8  ;;  %3461 = sst [smem:[#allocation66_spill]] %s2310_s30 }
  0x9a   : > { %s3516_s12 = sld [smem:[#allocation66_spill]] }
  0x9e   : > { %3421 = sst [smem:[#allocation26_spill]] %s2194_s7 }
  0xa0   : > { %337 = vrot.lane.b32.xlu1 %v2060_v32, %s1897_s5  ;;  %333 = vrot.lane.b32.xlu0 %v197_v31, %s1897_s5  ;;  %s2190_s5 = sld [smem:[#allocation8 + $0xe]] }
  0xa8   : > { %349 = vrot.lane.b32.xlu1 %v197_v31, %s1901_s14  ;;  %345 = vrot.lane.b32.xlu0 %v2060_v32, %s1900_s8  ;;  %s2196_s8 = sld [smem:[#allocation8 + $0x46]] }
  0xae   : > { %3422 = sst [smem:[#allocation27_spill]] %s2196_s8 }
  0xb3   : > { %v244_v34 = vpop.permute.xlu2 %243 }
  0xb4   : > { %246 = vst.msk [vmem:[#allocation2 + $0x5] sm:$0x1] %vm228_vm1, %v244_v34 }
  0xbb   : > { %v260_v35 = vpop.permute.xlu2 %259 }
  0xbc   : > { %262 = vst.msk [vmem:[#allocation2 + $0x7] sm:$0x1] %vm228_vm1, %v260_v35 }
  0xc3   : > { %v248_v36 = vpop.permute.xlu2 %247 }
  0xc4   : > { %250 = vst.msk [vmem:[#allocation2 + $0xad] sm:$0x1] %vm228_vm1, %v248_v36 }
  0xca   : > { %v236_v37 = vpop.permute.xlu1 %235  ;;  %v226_v38 = vpop.permute.xlu0 %225 }
  0xcb   : > { %238 = vst.msk [vmem:[#allocation2 + $0x4] sm:$0x1] %vm228_vm1, %v236_v37  ;;  %v272_v39 = vpop.permute.xlu2 %271 }
  0xcc   : > { %229 = vst.msk [vmem:[#allocation2 + $0x3] sm:$0x1] %vm228_vm1, %v226_v38  ;;  %v580_v38 = vstv %s2216_s1  ;;  %s3491_s1 = sld [smem:[#allocation61_spill]] }
  0xcd   : > { %274 = vst.msk [vmem:[#allocation2 + $0xb0] sm:$0x1] %vm228_vm1, %v272_v39 }
  0xd2   : > { %v268_v40 = vpop.permute.xlu1 %267  ;;  %v252_v41 = vpop.permute.xlu0 %251 }
  0xd3   : > { %270 = vst.msk [vmem:[#allocation2 + $0x8] sm:$0x1] %vm228_vm1, %v268_v40  ;;  %v284_v42 = vpop.permute.xlu2 %283 }
  0xd4   : > { %254 = vst.msk [vmem:[#allocation2 + $0x6] sm:$0x1] %vm228_vm1, %v252_v41  ;;  %v596_v41 = vstv %s2182_s15  ;;  %s2402_s15 = sld [smem:[#allocation8 + $0x3d]] }
  0xd5   : > { %286 = vst.msk [vmem:[#allocation2 + $0xa] sm:$0x1] %vm228_vm1, %v284_v42 }
  0xda   : > { %v240_v43 = vpop.permute.xlu1 %239  ;;  %v232_v44 = vpop.permute.xlu0 %231  ;;  %3472 = sst [smem:[#allocation73_spill]] %s2402_s15 }
  0xdb   : > { %v2094_v45 = vld [vmem:[#allocation2] sm:$0xff]  ;;  %242 = vst.msk [vmem:[#allocation2 + $0xac] sm:$0x1] %vm228_vm1, %v240_v43  ;;  %v298_v46 = vpop.permute.xlu2 %297  ;;  %s2420_s15 = sld [smem:[#allocation8 + $0x52]] }
  0xdc   : > { %234 = vst.msk [vmem:[#allocation2 + $0xab] sm:$0x1] %vm228_vm1, %v232_v44  ;;  %393 = vrot.lane.b32.xlu0 %v2094_v45, %s3238_s17  ;;  %378 = vrot.lane.b32.xlu1 %v2094_v45, %s3237_s18  ;;  %v541_v27 = vmul.f32 %v540_v2, %v2094_v45  ;;  %v594_v42 = vld [vmem:[#allocation2 + $0x1] sm:$0xff]  ;;  %v3314_v44 = vstv %s2185_s20  ;;  %s2359_s20 = sld [smem:[#allocation8 + $0x5d]] }
  0xdd   : > { %363 = vrot.lane.b32.xlu2 %v2094_v45, %s3236_s19  ;;  %300 = vst.msk [vmem:[#allocation2 + $0xb3] sm:$0x1] %vm228_vm1, %v298_v46  ;;  %v1044_v46 = vstv %s2188_s4  ;;  %s2318_s4 = sld [smem:[#allocation8 + $0x41]] }
  0xe2   : > { %v256_v47 = vpop.permute.xlu1 %255  ;;  %v264_v48 = vpop.permute.xlu0 %263  ;;  %3466 = sst [smem:[#allocation71_spill]] %s2359_s20 }
  0xe3   : > { %258 = vst.msk [vmem:[#allocation2 + $0xae] sm:$0x1] %vm228_vm1, %v256_v47  ;;  %v310_v49 = vpop.permute.xlu2 %309  ;;  %v652_v47 = vstv %s2190_s5  ;;  %3462 = sst [smem:[#allocation67_spill]] %s2318_s4 }
  0xe4   : > { %266 = vst.msk [vmem:[#allocation2 + $0xaf] sm:$0x1] %vm228_vm1, %v264_v48  ;;  %438 = vrot.lane.b32.xlu0 %v2094_v45, %s3230_s22  ;;  %423 = vrot.lane.b32.xlu1 %v2094_v45, %s3234_s23  ;;  %v3311_v48 = vstv %s2192_s6  ;;  %s2327_s5 = sld [smem:[#allocation8 + $0x48]] }
  0xe5   : > { %408 = vrot.lane.b32.xlu2 %v2094_v45, %s3232_s24  ;;  %312 = vst.msk [vmem:[#allocation2 + $0xd] sm:$0x1] %vm228_vm1, %v310_v49  ;;  %s2336_s4 = sld [smem:[#allocation8 + $0x4f]] }
  0xe6   : > { %s3475_s6 = sld [smem:[#allocation45_spill]] }
  0xe7   : > { %s2408_s20 = sld [smem:[#allocation8 + $0x44]] }
  0xea   : > { %v280_v50 = vpop.permute.xlu1 %279  ;;  %v276_v51 = vpop.permute.xlu0 %275  ;;  %3463 = sst [smem:[#allocation68_spill]] %s2327_s5 }
  0xeb   : > { %282 = vst.msk [vmem:[#allocation2 + $0xb1] sm:$0x1] %vm228_vm1, %v280_v50  ;;  %v322_v52 = vpop.permute.xlu2 %321  ;;  %v2145_v8 = vld [vmem:[#allocation2 + $0xa8] sm:$0xff]  ;;  %3464 = sst [smem:[#allocation69_spill]] %s2336_s4 }
  0xec   : > { %278 = vst.msk [vmem:[#allocation2 + $0x9] sm:$0x1] %vm228_vm1, %v276_v51  ;;  %v986_v45 = vld [vmem:[#allocation2 + $0xa9] sm:$0xff]  ;;  %s3479_s4 = sld [smem:[#allocation48_spill]] }
  0xed   : > { %324 = vst.msk [vmem:[#allocation2 + $0xb6] sm:$0x1] %vm228_vm1, %v322_v52  ;;  %v3310_v52 = vstv %s2194_s7  ;;  %s3474_s7 = sld [smem:[#allocation44_spill]] }
  0xee   : > { %s2414_s5 = sld [smem:[#allocation8 + $0x4b]] }
  0xef   : > { %3481 = sst [smem:[#allocation48_spill]] %s2420_s15 }
  0xf0   : > { %s2430_s15 = sld [smem:[#allocation8 + $0x60]] }
  0xf2   : > { %v293_v53 = vpop.permute.xlu1 %292  ;;  %v288_v54 = vpop.permute.xlu0 %287  ;;  %v1042_v49 = vld [vmem:[#allocation2 + $0xaa] sm:$0xff] }
  0xf3   : > { %295 = vst.msk [vmem:[#allocation2 + $0xb] sm:$0x1] %vm228_vm1, %v293_v53  ;;  %v342_v55 = vpop.permute.xlu2 %341  ;;  %v650_v50 = vld [vmem:[#allocation2 + $0x2] sm:$0xff]  ;;  %v3309_v53 = vstv %s2196_s8  ;;  %s2376_s8 = sld [smem:[#allocation8 + $0x32]] }
  0xf4   : > { %290 = vst.msk [vmem:[#allocation2 + $0xb2] sm:$0x1] %vm228_vm1, %v288_v54  ;;  %v706_v51 = vld [vmem:[#allocation2 + $0x3] sm:$0xff]  ;;  %3480 = sst [smem:[#allocation47_spill]] %s2414_s5 }
  0xf5   : > { %344 = vst.msk [vmem:[#allocation2 + $0x11] sm:$0x1] %vm228_vm1, %v342_v55  ;;  %s2453_s5 = sld [smem:[#allocation8 + $0x39]] }
  0xfa   : > { %v306_v56 = vpop.permute.xlu1 %305  ;;  %v302_v57 = vpop.permute.xlu0 %301 }
  0xfb   : > { %308 = vst.msk [vmem:[#allocation2 + $0xb4] sm:$0x1] %vm228_vm1, %v306_v56  ;;  %v2322_v56 = vmul.f32 %v596_v41, %v594_v42  ;;  %3492 = sst [smem:[#allocation75_spill]] %s2453_s5 }
  0xfc   : > { %304 = vst.msk [vmem:[#allocation2 + $0xc] sm:$0x1] %vm228_vm1, %v302_v57  ;;  %v762_v57 = vld [vmem:[#allocation2 + $0x4] sm:$0xff] }
 0x102   : > { %v318_v58 = vpop.permute.xlu1 %317  ;;  %v314_v59 = vpop.permute.xlu0 %313 }
 0x103   : > { %320 = vst.msk [vmem:[#allocation2 + $0xe] sm:$0x1] %vm228_vm1, %v318_v58 }
 0x104   : > { %316 = vst.msk [vmem:[#allocation2 + $0xb5] sm:$0x1] %vm228_vm1, %v314_v59  ;;  %v1098_v59 = vld [vmem:[#allocation2 + $0xab] sm:$0xff] }
 0x10a   : > { %v330_v60 = vpop.permute.xlu1 %329  ;;  %v326_v61 = vpop.permute.xlu0 %325 }
 0x10b   : > { %332 = vst.msk [vmem:[#allocation2 + $0xb7] sm:$0x1] %vm228_vm1, %v330_v60  ;;  %v1154_v60 = vld [vmem:[#allocation2 + $0xac] sm:$0xff] }
 0x10c   : > { %328 = vst.msk [vmem:[#allocation2 + $0xf] sm:$0x1] %vm228_vm1, %v326_v61  ;;  %v3302_v61 = vstv %s2200_s29  ;;  %s3469_s29 = sld [smem:[#allocation38_spill]] }
 0x112   : > { %v931_v63 = vld [vmem:[#allocation2 + $0xb0] sm:$0xff]  ;;  %v338_v0 = vpop.permute.xlu1 %337  ;;  %v334_v1 = vpop.permute.xlu0 %333 }
 0x113   : > { %v2134_v3 = vmul.f32 %v932_v62, %v931_v63  ;;  %v539_v4 = vld [vmem:[#allocation2 + $0x8] sm:$0xff]  ;;  %340 = vst.msk [vmem:[#allocation2 + $0xb8] sm:$0x1] %vm228_vm1, %v338_v0  ;;  %v2332_v0 = vmul.f32 %v932_v62, %v2145_v8 }
 0x114   : > { %v2139_v5 = vmul.f32 %v540_v2, %v539_v4  ;;  %336 = vst.msk [vmem:[#allocation2 + $0x10] sm:$0x1] %vm228_vm1, %v334_v1  ;;  %395 = vrot.lane.b32.xlu0 %v539_v4, %s3238_s17  ;;  %380 = vrot.lane.b32.xlu1 %v539_v4, %s3237_s18  ;;  %v1210_v1 = vld [vmem:[#allocation2 + $0xad] sm:$0xff] }
 0x115   : > { %365 = vrot.lane.b32.xlu2 %v539_v4, %s3236_s19  ;;  %v1266_v62 = vld [vmem:[#allocation2 + $0xae] sm:$0xff] }
 0x11a   : > { %v350_v6 = vpop.permute.xlu1 %349  ;;  %v346_v7 = vpop.permute.xlu0 %345 }
 0x11b   : > { %352 = vst.msk [vmem:[#allocation2 + $0x12] sm:$0x1] %vm228_vm1, %v350_v6 }
 0x11c   : > { %348 = vst.msk [vmem:[#allocation2 + $0xb9] sm:$0x1] %vm228_vm1, %v346_v7  ;;  %459 = vrot.lane.b32.xlu0 %v2145_v8, %s3236_s19  ;;  %425 = vrot.lane.b32.xlu1 %v539_v4, %s3234_s23 }
 0x11d   : > { %410 = vrot.lane.b32.xlu2 %v539_v4, %s3232_s24 }
 0x122   : > { %v2172_v11 = vld [vmem:[#allocation2 + $0x10] sm:$0x3f] }
 0x124   : > { %498 = vrot.lane.b32.xlu0 %v2145_v8, %s3232_s24  ;;  %485 = vrot.lane.b32.xlu1 %v2145_v8, %s3238_s17 }
 0x125   : > { %472 = vrot.lane.b32.xlu2 %v2145_v8, %s3237_s18 }
 0x12c   : > { %461 = vrot.lane.b32.xlu0 %v931_v63, %s3236_s19  ;;  %524 = vrot.lane.b32.xlu1 %v2145_v8, %s3230_s22 }
 0x12d   : > { %511 = vrot.lane.b32.xlu2 %v2145_v8, %s3234_s23  ;;  %v595_v8 = vld [vmem:[#allocation2 + $0x9] sm:$0xff] }
 0x134   : > { %500 = vrot.lane.b32.xlu0 %v931_v63, %s3232_s24  ;;  %487 = vrot.lane.b32.xlu1 %v931_v63, %s3238_s17  ;;  %s2204_s24 = sld [smem:[#allocation8 + $0x2a]] }
 0x135   : > { %474 = vrot.lane.b32.xlu2 %v931_v63, %s3237_s18  ;;  %s2212_s17 = sld [smem:[#allocation8 + $0x2]] }
 0x137   : > { %v364_v9 = vpop.permute.xlu2 %363 }
 0x138   : > { %374 = vst.msk [vmem:[#allocation2 + $0x18] sm:$0xff] %vm373_vm2, %v364_v9  ;;  %v2340_v9 = vmul.f32 %v3314_v44, %v986_v45  ;;  %v3328_v45 = vstv %s2222_s10  ;;  %s2468_s10 = sld [smem:[#allocation8 + $0x47]] }
 0x13a   : > { %3426 = sst [smem:[#allocation31_spill]] %s2204_s24  ;;  %v3305_v2 = vstv %s2204_s24 }
 0x13b   : > { %v556_v23 = vstv %s2212_s17  ;;  %s3468_s17 = sld [smem:[#allocation37_spill]] }
 0x13c   : > { %440 = vrot.lane.b32.xlu0 %v539_v4, %s3230_s22  ;;  %526 = vrot.lane.b32.xlu1 %v931_v63, %s3230_s22  ;;  %s2202_s22 = sld [smem:[#allocation8 + $0x23]]  ;;  %v818_v4 = vld [vmem:[#allocation2 + $0x5] sm:$0xff] }
 0x13d   : > { %513 = vrot.lane.b32.xlu2 %v931_v63, %s3234_s23  ;;  %s2206_s23 = sld [smem:[#allocation8 + $0x5b]] }
 0x13e   : > { %s2393_s24 = sld [smem:[#allocation8 + $0x34]] }
 0x13f   : > { %v409_v10 = vpop.permute.xlu2 %408  ;;  %v546_v22 = vld [vmem:[#allocation2 + $0x18] sm:$0xff] }
 0x140   : > { %419 = vst.msk [vmem:[#allocation2 + $0x60] sm:$0xff] %vm418_vm3, %v409_v10  ;;  %v2342_v10 = vmul.f32 %v1044_v46, %v1042_v49 }
 0x141   : > { %v3317_v49 = vstv %s3468_s17  ;;  %s3497_s17 = sld [smem:[#allocation67_spill]] }
 0x142   : > { %3425 = sst [smem:[#allocation30_spill]] %s2202_s22  ;;  %v3306_v63 = vstv %s2202_s22 }
 0x143   : > { %3427 = sst [smem:[#allocation32_spill]] %s2206_s23  ;;  %v3301_v6 = vstv %s2206_s23 }
 0x144   : > { %382 = vrot.lane.b32.xlu1 %v2172_v11, %s3237_s18  ;;  %s2210_s18 = sld [smem:[#allocation8 + $0x4]] }
 0x145   : > { %353 = vrot.lane.b32.xlu2 %v2060_v32, %s1901_s14  ;;  %s2198_s14 = sld [smem:[#allocation8 + $0x4d]] }
 0x146   : > { %3470 = sst [smem:[#allocation72_spill]] %s2393_s24 }
 0x147   : > { %v570_v37 = vld [vmem:[#allocation2 + $0x60] sm:$0xff]  ;;  %s3471_s22 = sld [smem:[#allocation40_spill]] }
 0x148   : > { %s3473_s23 = sld [smem:[#allocation43_spill]] }
 0x14a   : > { %v572_v36 = vstv %s2210_s18  ;;  %s3486_s18 = sld [smem:[#allocation54_spill]] }
 0x14b   : > { %3423 = sst [smem:[#allocation28_spill]] %s2198_s14  ;;  %v573_v54 = vmul.f32 %v572_v36, %v570_v37  ;;  %v3308_v58 = vstv %s2198_s14 }
 0x14c   : > { %s3467_s14 = sld [smem:[#allocation36_spill]] }
 0x14d   : > { %367 = vrot.lane.b32.xlu2 %v2172_v11, %s3236_s19  ;;  %s2208_s19 = sld [smem:[#allocation8 + $0x1]] }
 0x14e   : > { %v379_v12 = vpop.permute.xlu1 %378  ;;  %v394_v13 = vpop.permute.xlu0 %393 }
 0x14f   : > { %389 = vst.msk [vmem:[#allocation2 + $0x30] sm:$0xff] %vm388_vm4, %v379_v12  ;;  %v653_v12 = vmul.f32 %v652_v47, %v650_v50  ;;  %v3322_v50 = vstv %s3469_s29  ;;  %s2542_s29 = sld [smem:[#allocation8 + $0x49]] }
 0x150   : > { %404 = vst.msk [vmem:[#allocation2 + $0x48] sm:$0xff] %vm403_vm5, %v394_v13  ;;  %v3329_v13 = vstv %s2218_s25  ;;  %s3476_s25 = sld [smem:[#allocation46_spill]] }
 0x151   : > { %3477 = sst [smem:[#allocation46_spill]] %s2408_s20 }
 0x152   : > { %s2426_s20 = sld [smem:[#allocation8 + $0x59]] }
 0x153   : > { %v548_v17 = vstv %s2208_s19  ;;  %s2262_s19 = sld [smem:[#allocation8 + $0x2c]] }
 0x154   : > { %v549_v25 = vmul.f32 %v548_v17, %v546_v22 }
 0x156   : > { %v424_v14 = vpop.permute.xlu1 %423  ;;  %v439_v15 = vpop.permute.xlu0 %438  ;;  %v554_v24 = vld [vmem:[#allocation2 + $0x30] sm:$0xff]  ;;  %v551_v29 = vadd.f32 %v549_v25, %v541_v27  ;;  %v2367_v27 = vmul.f32 %v3302_v61, %v1210_v1  ;;  %v3342_v1 = vstv %s3475_s6  ;;  %s3489_s6 = sld [smem:[#allocation56_spill]] }
 0x157   : > { %434 = vst.msk [vmem:[#allocation2 + $0x78] sm:$0xff] %vm433_vm6, %v424_v14  ;;  %v557_v28 = vmul.f32 %v556_v23, %v554_v24  ;;  %v562_v31 = vld [vmem:[#allocation2 + $0x48] sm:$0xff] }
 0x158   : > { %449 = vst.msk [vmem:[#allocation2 + $0x90] sm:$0xff] %vm448_vm7, %v439_v15  ;;  %v565_v33 = vmul.f32 %v564_v30, %v562_v31  ;;  %v2349_v15 = vmul.f32 %v3311_v48, %v706_v51  ;;  %v3337_v51 = vstv %s3471_s22  ;;  %3483 = sst [smem:[#allocation74_spill]] %s2426_s20  ;;  %v956_v48 = vstv %s2393_s24 }
 0x159   : > { %3447 = sst [smem:[#allocation52_spill]] %s2262_s19  ;;  %v559_v32 = vadd.f32 %v557_v28, %v551_v29  ;;  %v2371_v28 = vmul.f32 %v3306_v63, %v818_v4  ;;  %v948_v4 = vstv %s3476_s25  ;;  %s3518_s25 = smov 125  }
 0x15a   : > { %s2281_s19 = sld [smem:[#allocation8 + $0x26]] }
 0x15b   : > { %v567_v43 = vadd.f32 %v565_v33, %v559_v32  ;;  %v2384_v33 = vmul.f32 %v3301_v6, %v1266_v62  ;;  %v3344_v62 = vstv %s3479_s4  ;;  %s2438_s20 = sld [smem:[#allocation8 + $0x35]] }
 0x15c   : > { %s3506_s24 = sld [smem:[#allocation73_spill]] }
 0x15d   : > { %v575_v7 = vadd.f32 %v573_v54, %v567_v43  ;;  %v3336_v54 = vstv %s2235_s2  ;;  %s2582_s22 = sld [smem:[#allocation8 + $0x51]] }
 0x15e   : > { %v578_v39 = vld [vmem:[#allocation2 + $0x78] sm:$0xff]  ;;  %s2623_s2 = sld [smem:[#allocation8 + $0xd]] }
 0x15f   : > { %v581_v55 = vmul.f32 %v580_v38, %v578_v39  ;;  %v586_v14 = vld [vmem:[#allocation2 + $0x90] sm:$0xff] }
 0x160   : > { %3453 = sst [smem:[#allocation58_spill]] %s2281_s19 }
 0x161   : > { %s2294_s19 = sld [smem:[#allocation8 + $0x21]] }
 0x163   : > { %3514 = sst [smem:[#allocation78_spill]] %s2582_s22 }
 0x167   : > { %3458 = sst [smem:[#allocation63_spill]] %s2294_s19 }
 0x168   : > { %s2303_s19 = sld [smem:[#allocation8 + $0x2f]] }
 0x16e   : > { %3460 = sst [smem:[#allocation65_spill]] %s2303_s19 }
 0x16f   : > { %v366_v16 = vpop.permute.xlu2 %365  ;;  %s2668_s19 = sld [smem:[#allocation8 + $0x4c]] }
 0x170   : > { %375 = vst.msk [vmem:[#allocation2 + $0x20] sm:$0xff] %vm373_vm2, %v366_v16  ;;  %v2353_v16 = vmul.f32 %v3310_v52, %v762_v57 }
 0x175   : > { %3531 = sst [smem:[#allocation66_spill]] %s2668_s19 }
 0x177   : > { %v547_v18 = vld [vmem:[#allocation2 + $0x20] sm:$0xff]  ;;  %v411_v19 = vpop.permute.xlu2 %410 }
 0x178   : > { %v550_v20 = vmul.f32 %v548_v17, %v547_v18  ;;  %420 = vst.msk [vmem:[#allocation2 + $0x68] sm:$0xff] %vm418_vm3, %v411_v19  ;;  %v2357_v17 = vmul.f32 %v3309_v53, %v1098_v59  ;;  %v651_v18 = vld [vmem:[#allocation2 + $0xa] sm:$0xff]  ;;  %v1043_v19 = vld [vmem:[#allocation2 + $0xb2] sm:$0xff] }
 0x179   : > { %v2395_v37 = vmul.f32 %v652_v47, %v651_v18  ;;  %v2397_v39 = vmul.f32 %v1044_v46, %v1043_v19  ;;  %v3315_v47 = vstv %s3467_s14  ;;  %v602_v19 = vld [vmem:[#allocation2 + $0x19] sm:$0xff]  ;;  %s3498_s14 = sld [smem:[#allocation68_spill]] }
 0x17a   : > { %v2258_v21 = vadd.f32 %v550_v20, %v2139_v5  ;;  %v874_v5 = vld [vmem:[#allocation2 + $0x6] sm:$0xff]  ;;  %v583_v20 = vadd.f32 %v581_v55, %v575_v7  ;;  %v3341_v55 = vstv %s2237_s27  ;;  %v3345_v7 = vstv %s3478_s28  ;;  %s3485_s27 = sld [smem:[#allocation53_spill]] }
 0x17b   : > { %v2380_v32 = vmul.f32 %v3305_v2, %v874_v5  ;;  %3487 = sst [smem:[#allocation53_spill]] %s2430_s15  ;;  %v3368_v2 = vstv %s3491_s1 }
 0x17c   : > { %s2487_s15 = sld [smem:[#allocation8 + $0x55]] }
 0x17d   : > { %s2562_s1 = sld [smem:[#allocation8 + $0x3c]] }
 0x17f   : > { %v473_v26 = vpop.permute.xlu2 %472 }
 0x180   : > { %482 = vst.msk [vmem:[#allocation2 + $0xd8] sm:$0xff] %vm388_vm4, %v473_v26  ;;  %v2363_v26 = vmul.f32 %v3308_v58, %v1154_v60  ;;  %v3340_v60 = vstv %s3473_s23  ;;  %v906_v58 = vld [vmem:[#allocation2 + $0x66] sm:$0xff]  ;;  %s2568_s23 = sld [smem:[#allocation8 + $0x43]] }
 0x182   : > { %3496 = sst [smem:[#allocation77_spill]] %s2487_s15 }
 0x183   : > { %s2619_s15 = sld [smem:[#allocation8 + $0x45]] }
 0x186   : > { %v381_v34 = vpop.permute.xlu1 %380  ;;  %v396_v35 = vpop.permute.xlu0 %395 }
 0x187   : > { %390 = vst.msk [vmem:[#allocation2 + $0x38] sm:$0xff] %vm388_vm4, %v381_v34  ;;  %v512_v40 = vpop.permute.xlu2 %511  ;;  %v2388_v34 = vmul.f32 %v596_v41, %v595_v8  ;;  %v571_v41 = vld [vmem:[#allocation2 + $0x68] sm:$0xff] }
 0x188   : > { %521 = vst.msk [vmem:[#allocation2 + $0x120] sm:$0xff] %vm433_vm6, %v512_v40  ;;  %v3349_v40 = vstv %s2220_s11  ;;  %v574_v57 = vmul.f32 %v572_v36, %v571_v41  ;;  %v940_v41 = vstv %s2376_s8  ;;  %s2509_s11 = sld [smem:[#allocation8 + $0x3b]] }
 0x189   : > { %405 = vst.msk [vmem:[#allocation2 + $0x50] sm:$0xff] %vm403_vm5, %v396_v35  ;;  %v589_v35 = vmul.f32 %v3329_v13, %v586_v14  ;;  %s3527_s8 = sld [smem:[#allocation62_spill]] }
 0x18b   : > { %v591_v43 = vadd.f32 %v589_v35, %v583_v20  ;;  %v658_v20 = vld [vmem:[#allocation2 + $0x1a] sm:$0xff]  ;;  %v3346_v35 = vstv %s3485_s27 }
 0x18d   : > { %v655_v5 = vadd.f32 %v653_v12, %v591_v43  ;;  %v3359_v43 = vstv %s3489_s6  ;;  %s3507_s6 = sld [smem:[#allocation46_spill]] }
 0x18e   : > { %v555_v22 = vld [vmem:[#allocation2 + $0x38] sm:$0xff]  ;;  %v426_v24 = vpop.permute.xlu1 %425  ;;  %v460_v25 = vpop.permute.xlu0 %459  ;;  %3513 = sst [smem:[#allocation46_spill]] %s2575_s21 }
 0x18f   : > { %v558_v29 = vmul.f32 %v556_v23, %v555_v22  ;;  %435 = vst.msk [vmem:[#allocation2 + $0x80] sm:$0xff] %vm433_vm6, %v426_v24  ;;  %v475_v31 = vpop.permute.xlu2 %474  ;;  %v3361_v22 = vstv %s2253_s3  ;;  %v3360_v24 = vstv %s3482_s0  ;;  %s2445_s3 = sld [smem:[#allocation8 + $0x37]] }
 0x190   : > { %v563_v23 = vld [vmem:[#allocation2 + $0x50] sm:$0xff]  ;;  %483 = vst.msk [vmem:[#allocation2 + $0xe0] sm:$0xff] %vm388_vm4, %v475_v31  ;;  %s2499_s0 = sld [smem:[#allocation8 + $0x5c]] }
 0x191   : > { %v560_v42 = vadd.f32 %v558_v29, %v2258_v21  ;;  %469 = vst.msk [vmem:[#allocation2 + $0xc0] sm:$0xff] %vm373_vm2, %v460_v25  ;;  %v566_v46 = vmul.f32 %v564_v30, %v563_v23  ;;  %v3327_v21 = vstv %s2230_s9  ;;  %v3339_v30 = vstv %s3474_s7  ;;  %s3488_s7 = sld [smem:[#allocation55_spill]] }
 0x192   : > { %v3365_v23 = vstv %s3486_s18  ;;  %s2555_s9 = sld [smem:[#allocation8 + $0x50]]  ;;  %s3532_s18 = smov 123  }
 0x193   : > { %v568_v59 = vadd.f32 %v566_v46, %v560_v42  ;;  %v714_v42 = vld [vmem:[#allocation2 + $0x1b] sm:$0xff]  ;;  %v3358_v46 = vstv %s2279_s16  ;;  %s2461_s16 = sld [smem:[#allocation8 + $0x40]] }
 0x194   : > { %v2478_v44 = vmul.f32 %v3315_v47, %v714_v42  ;;  %v626_v42 = vld [vmem:[#allocation2 + $0x61] sm:$0xff] }
 0x195   : > { %v576_v8 = vadd.f32 %v574_v57, %v568_v59  ;;  %v605_v59 = vmul.f32 %v3349_v40, %v602_v19  ;;  %v682_v47 = vld [vmem:[#allocation2 + $0x62] sm:$0xff] }
 0x196   : > { %v579_v36 = vld [vmem:[#allocation2 + $0x80] sm:$0xff]  ;;  %v486_v14 = vpop.permute.xlu1 %485  ;;  %v499_v18 = vpop.permute.xlu0 %498  ;;  %3500 = sst [smem:[#allocation67_spill]] %s2499_s0  ;;  %s3521_s0 = smov 126  }
 0x197   : > { %v582_v25 = vmul.f32 %v580_v38, %v579_v36  ;;  %495 = vst.msk [vmem:[#allocation2 + $0xf0] sm:$0xff] %vm403_vm5, %v486_v14  ;;  %v514_v29 = vpop.permute.xlu2 %513  ;;  %v3364_v38 = vstv %s3488_s7  ;;  %v661_v36 = vmul.f32 %v3328_v45, %v658_v20  ;;  %v770_v14 = vld [vmem:[#allocation2 + $0x1c] sm:$0xff]  ;;  %v2490_v53 = vadd.f32 %v605_v59, %v2322_v56  ;;  %v794_v59 = vld [vmem:[#allocation2 + $0x64] sm:$0xff]  ;;  %s3526_s7 = sld [smem:[#allocation34_spill]] }
 0x198   : > { %522 = vst.msk [vmem:[#allocation2 + $0x128] sm:$0xff] %vm433_vm6, %v514_v29  ;;  %v946_v29 = vld [vmem:[#allocation2 + $0xd8] sm:$0xff]  ;;  %v2482_v61 = vmul.f32 %v3317_v49, %v770_v14  ;;  %v3367_v14 = vstv %s2310_s30  ;;  %s3508_s30 = sld [smem:[#allocation47_spill]] }
 0x199   : > { %v2450_v57 = vadd.f32 %v582_v25, %v576_v8  ;;  %508 = vst.msk [vmem:[#allocation2 + $0x108] sm:$0xff] %vm418_vm3, %v499_v18  ;;  %v938_v8 = vld [vmem:[#allocation2 + $0xc0] sm:$0xff]  ;;  %3495 = sst [smem:[#allocation76_spill]] %s2461_s16  ;;  %v3369_v25 = vstv %s2286_s13  ;;  %v949_v6 = vmul.f32 %v948_v4, %v946_v29  ;;  %v2492_v52 = vadd.f32 %v661_v36, %v655_v5 }
 0x19a   : > { %v826_v18 = vld [vmem:[#allocation2 + $0x1d] sm:$0xff]  ;;  %v941_v19 = vmul.f32 %v940_v41, %v938_v8  ;;  %v850_v36 = vld [vmem:[#allocation2 + $0x65] sm:$0xff]  ;;  %s2516_s13 = sld [smem:[#allocation8 + $0x42]] }
 0x19b   : > { %v882_v20 = vld [vmem:[#allocation2 + $0x1e] sm:$0xff]  ;;  %v2496_v31 = vmul.f32 %v3322_v50, %v826_v18  ;;  %v3347_v50 = vstv %s2438_s20  ;;  %3512 = sst [smem:[#allocation73_spill]] %s2555_s9 }
 0x19c   : > { %v943_v8 = vadd.f32 %v941_v19, %v2332_v0  ;;  %v2503_v56 = vmul.f32 %v3327_v21, %v882_v20  ;;  %v738_v5 = vld [vmem:[#allocation2 + $0x63] sm:$0xff]  ;;  %v3366_v20 = vstv %s3497_s17  ;;  %v996_v21 = vstv %s2453_s5  ;;  %s2606_s5 = sld [smem:[#allocation8 + $0x3e]] }
 0x19e   : > { %v954_v49 = vld [vmem:[#allocation2 + $0xf0] sm:$0xff]  ;;  %v525_v29 = vpop.permute.xlu1 %524  ;;  %v462_v0 = vpop.permute.xlu0 %461  ;;  %v951_v18 = vadd.f32 %v949_v6, %v943_v8  ;;  %v2520_v6 = vmul.f32 %v3337_v51, %v626_v42  ;;  %v2534_v42 = vmul.f32 %v3340_v60, %v794_v59  ;;  %v970_v51 = vld [vmem:[#allocation2 + $0x120] sm:$0xff] }
 0x19f   : > { %v957_v19 = vmul.f32 %v956_v48, %v954_v49  ;;  %534 = vst.msk [vmem:[#allocation2 + $0x138] sm:$0xff] %vm448_vm7, %v525_v29  ;;  %v354_v12 = vpop.permute.xlu2 %353  ;;  %v2524_v49 = vmul.f32 %v3336_v54, %v682_v47  ;;  %v610_v8 = vld [vmem:[#allocation2 + $0x31] sm:$0xff]  ;;  %v2538_v47 = vmul.f32 %v3339_v30, %v850_v36  ;;  %v973_v29 = vmul.f32 %v3346_v35, %v970_v51  ;;  %v618_v51 = vld [vmem:[#allocation2 + $0x49] sm:$0xff] }
 0x1a0   : > { %356 = vst.msk [vmem:[#allocation2 + $0xba] sm:$0x1] %vm228_vm1, %v354_v12  ;;  %v962_v13 = vld [vmem:[#allocation2 + $0x108] sm:$0xff]  ;;  %v2530_v12 = vmul.f32 %v3341_v55, %v738_v5  ;;  %v666_v54 = vld [vmem:[#allocation2 + $0x32] sm:$0xff]  ;;  %v613_v36 = vmul.f32 %v3345_v7, %v610_v8  ;;  %v3348_v55 = vstv %s2445_s3  ;;  %v1052_v8 = vstv %s2461_s16  ;;  %s3522_s16 = smov 127  }
 0x1a1   : > { %v959_v45 = vadd.f32 %v957_v19, %v951_v18  ;;  %470 = vst.msk [vmem:[#allocation2 + $0xc8] sm:$0xff] %vm373_vm2, %v462_v0  ;;  %v965_v18 = vmul.f32 %v3347_v50, %v962_v13  ;;  %v2546_v0 = vmul.f32 %v3342_v1, %v906_v58  ;;  %v669_v13 = vmul.f32 %v3344_v62, %v666_v54  ;;  %v674_v30 = vld [vmem:[#allocation2 + $0x4a] sm:$0xff]  ;;  %v947_v58 = vld [vmem:[#allocation2 + $0xe0] sm:$0xff] }
 0x1a2   : > { %v1002_v5 = vld [vmem:[#allocation2 + $0xd9] sm:$0xff]  ;;  %v950_v40 = vmul.f32 %v948_v4, %v947_v58 }
 0x1a3   : > { %v967_v60 = vadd.f32 %v965_v18, %v959_v45  ;;  %v615_v45 = vadd.f32 %v613_v36, %v2490_v53 }
 0x1a5   : > { %v975_v62 = vadd.f32 %v973_v29, %v967_v60  ;;  %v3363_v60 = vstv %s2509_s11  ;;  %v3362_v29 = vstv %s2516_s13 }
 0x1a6   : > { %v978_v19 = vld [vmem:[#allocation2 + $0x138] sm:$0xff]  ;;  %v488_v18 = vpop.permute.xlu1 %487  ;;  %v501_v54 = vpop.permute.xlu0 %500 }
 0x1a7   : > { %v981_v7 = vmul.f32 %v3348_v55, %v978_v19  ;;  %496 = vst.msk [vmem:[#allocation2 + $0xf8] sm:$0xff] %vm403_vm5, %v488_v18  ;;  %v368_v1 = vpop.permute.xlu2 %367  ;;  %v671_v19 = vadd.f32 %v669_v13, %v2492_v52  ;;  %v722_v18 = vld [vmem:[#allocation2 + $0x33] sm:$0xff]  ;;  %v621_v55 = vmul.f32 %v3365_v23, %v618_v51  ;;  %v1124_v13 = vstv %s2542_s29  ;;  %s3645_s29 = sld [smem:[#allocation42_spill]] }
 0x1a8   : > { %v939_v50 = vld [vmem:[#allocation2 + $0xc8] sm:$0xff]  ;;  %377 = vst.msk [vmem:[#allocation2 + $0x28] sm:$0x3f] %vm376_vm8, %v368_v1  ;;  %v677_v1 = vmul.f32 %v3364_v38, %v674_v30  ;;  %v1058_v52 = vld [vmem:[#allocation2 + $0xda] sm:$0xff]  ;;  %v2610_v4 = vmul.f32 %v3361_v22, %v722_v18  ;;  %v1188_v22 = vstv %s2582_s22  ;;  %v3528_v38 = vstv %s3526_s7  ;;  %s3533_s7 = smov 124   ;;  %s3564_s22 = sld [smem:[#allocation58_spill]] }
 0x1a9   : > { %v994_v63 = vld [vmem:[#allocation2 + $0xc1] sm:$0xff]  ;;  %v983_v59 = vadd.f32 %v981_v7, %v975_v62  ;;  %v942_v53 = vmul.f32 %v940_v41, %v939_v50  ;;  %509 = vst.msk [vmem:[#allocation2 + $0x110] sm:$0xff] %vm418_vm3, %v501_v54  ;;  %v2597_v7 = vld [vmem:[#allocation2 + $0xb8] sm:$0x3f]  ;;  %v730_v62 = vld [vmem:[#allocation2 + $0x4b] sm:$0xff]  ;;  %v623_v58 = vadd.f32 %v621_v55, %v615_v45 }
 0x1aa   : > { %v997_v36 = vmul.f32 %v996_v21, %v994_v63  ;;  %v1050_v35 = vld [vmem:[#allocation2 + $0xc2] sm:$0xff]  ;;  %v778_v50 = vld [vmem:[#allocation2 + $0x34] sm:$0xff]  ;;  %v786_v63 = vld [vmem:[#allocation2 + $0x4c] sm:$0xff]  ;;  %489 = vrot.lane.b32.xlu1 %v2597_v7, %s3518_s25  ;;  %476 = vrot.lane.b32.xlu2 %v2597_v7, %s3521_s0  ;;  %s3524_s0 = sld [smem:[#allocation60_spill]] }
 0x1ab   : > { %v1047_v41 = vadd.f32 %v2342_v10, %v983_v59  ;;  %v944_v54 = vadd.f32 %v942_v53, %v2134_v3  ;;  %v1053_v30 = vmul.f32 %v1052_v8, %v1050_v35  ;;  %v1005_v10 = vmul.f32 %v3367_v14, %v1002_v5  ;;  %463 = vrot.lane.b32.xlu0 %v2597_v7, %s3522_s16  ;;  %s2637_s16 = sld [smem:[#allocation8 + $0x14]] }
 0x1ac   : > { %v999_v51 = vadd.f32 %v997_v36, %v2340_v9  ;;  %v1180_v59 = vstv %s2555_s9  ;;  %v679_v3 = vadd.f32 %v677_v1, %v671_v19  ;;  %v1061_v9 = vmul.f32 %v3366_v20, %v1058_v52  ;;  %s2800_s9 = sld [smem:[#allocation8 + $0x29]] }
 0x1ad   : > { %v1055_v35 = vadd.f32 %v1053_v30, %v1047_v41  ;;  %v952_v18 = vadd.f32 %v950_v40, %v944_v54  ;;  %v2627_v55 = vmul.f32 %v3360_v24, %v778_v50  ;;  %v2631_v5 = vmul.f32 %v3359_v43, %v730_v62  ;;  %v634_v50 = vld [vmem:[#allocation2 + $0x79] sm:$0xff] }
 0x1ae   : > { %v2635_v45 = vmul.f32 %v3358_v46, %v786_v63  ;;  %v955_v53 = vld [vmem:[#allocation2 + $0xf8] sm:$0xff]  ;;  %v1007_v19 = vadd.f32 %v1005_v10, %v999_v51  ;;  %v527_v40 = vpop.permute.xlu1 %526  ;;  %v441_v52 = vpop.permute.xlu0 %440  ;;  %v3371_v46 = vstv %s2562_s1  ;;  %v3370_v43 = vstv %s2568_s23 }
 0x1af   : > { %v1010_v36 = vld [vmem:[#allocation2 + $0xf1] sm:$0xff]  ;;  %v690_v41 = vld [vmem:[#allocation2 + $0x7a] sm:$0xff]  ;;  %v958_v62 = vmul.f32 %v956_v48, %v955_v53  ;;  %v1063_v63 = vadd.f32 %v1061_v9, %v1055_v35  ;;  %535 = vst.msk [vmem:[#allocation2 + $0x140] sm:$0xff] %vm448_vm7, %v527_v40  ;;  %v1132_v24 = vstv %s2575_s21  ;;  %v631_v48 = vadd.f32 %v2520_v6, %v623_v58  ;;  %v971_v35 = vld [vmem:[#allocation2 + $0x128] sm:$0xff]  ;;  %s3565_s21 = sld [smem:[#allocation70_spill]] }
 0x1b0   : > { %v1066_v1 = vld [vmem:[#allocation2 + $0xf2] sm:$0xff]  ;;  %v1013_v54 = vmul.f32 %v3363_v60, %v1010_v36  ;;  %v746_v30 = vld [vmem:[#allocation2 + $0x7b] sm:$0xff]  ;;  %450 = vst.msk [vmem:[#allocation2 + $0x98] sm:$0xff] %vm448_vm7, %v441_v52  ;;  %v687_v9 = vadd.f32 %v2524_v49, %v679_v3  ;;  %v693_v40 = vmul.f32 %v3368_v2, %v690_v41  ;;  %v1018_v20 = vld [vmem:[#allocation2 + $0x109] sm:$0xff]  ;;  %v3529_v14 = vstv %s3527_s8  ;;  %s2715_s8 = sld [smem:[#allocation8 + $0x1b]] }
 0x1b1   : > { %v1069_v51 = vmul.f32 %v3362_v29, %v1066_v1  ;;  %v603_v10 = vld [vmem:[#allocation2 + $0x21] sm:$0xff]  ;;  %v960_v53 = vadd.f32 %v958_v62, %v952_v18  ;;  %v637_v1 = vmul.f32 %v3369_v25, %v634_v50  ;;  %v963_v52 = vld [vmem:[#allocation2 + $0x110] sm:$0xff]  ;;  %v2661_v6 = vmul.f32 %v3529_v14, %v746_v30 }
 0x1b2   : > { %v1015_v36 = vadd.f32 %v1013_v54, %v1007_v19  ;;  %v1026_v29 = vld [vmem:[#allocation2 + $0x121] sm:$0xff]  ;;  %v606_v23 = vmul.f32 %v3528_v38, %v603_v10  ;;  %v3530_v58 = vstv %s2438_s20  ;;  %v1021_v18 = vmul.f32 %v3371_v46, %v1018_v20  ;;  %v1074_v19 = vld [vmem:[#allocation2 + $0x10a] sm:$0xff]  ;;  %427 = vrot.lane.b32.xlu1 %v2172_v11, %s3532_s18  ;;  %412 = vrot.lane.b32.xlu2 %v2172_v11, %s3533_s7  ;;  %s3539_s20 = sld [smem:[#allocation33_spill]] }
 0x1b3   : > { %v1071_v60 = vadd.f32 %v1069_v51, %v1063_v63  ;;  %v1082_v49 = vld [vmem:[#allocation2 + $0x122] sm:$0xff]  ;;  %v966_v3 = vmul.f32 %v3530_v58, %v963_v52  ;;  %v1036_v50 = vstv %s2606_s5  ;;  %v1077_v14 = vmul.f32 %v3370_v43, %v1074_v19  ;;  %397 = vrot.lane.b32.xlu0 %v2172_v11, %s3518_s25  ;;  %s3544_s25 = sld [smem:[#allocation35_spill]] }
 0x1b4   : > { %v2673_v38 = vadd.f32 %v606_v23, %v2388_v34  ;;  %v3372_v41 = vstv %s2619_s15  ;;  %v1114_v20 = vld [vmem:[#allocation2 + $0xdb] sm:$0xff]  ;;  %v3534_v54 = vstv %s3485_s27  ;;  %v3535_v51 = vstv %s3506_s24  ;;  %s3537_s27 = sld [smem:[#allocation69_spill]] }
 0x1b5   : > { %v1170_v62 = vld [vmem:[#allocation2 + $0xdc] sm:$0xff]  ;;  %v974_v63 = vmul.f32 %v3534_v54, %v971_v35  ;;  %v1029_v30 = vmul.f32 %v3535_v51, %v1026_v29  ;;  %v968_v10 = vadd.f32 %v966_v3, %v960_v53  ;;  %v1023_v34 = vadd.f32 %v1021_v18, %v1015_v36  ;;  %s3624_s5 = sld [smem:[#allocation68_spill]] }
 0x1b6   : > { %v3536_v23 = vstv %s3507_s6  ;;  %v1079_v58 = vadd.f32 %v1077_v14, %v1071_v60  ;;  %v979_v19 = vld [vmem:[#allocation2 + $0x140] sm:$0xff]  ;;  %v644_v43 = vstv %s2623_s2  ;;  %v700_v46 = vstv %s2637_s16  ;;  %v383_v35 = vpop.permute.xlu1 %382  ;;  %3547 = sst [smem:[#allocation60_spill]] %s2715_s8  ;;  %s3716_s16 = smov 32  }
 0x1b7   : > { %v1085_v52 = vmul.f32 %v3536_v23, %v1082_v49  ;;  %v1034_v2 = vld [vmem:[#allocation2 + $0x139] sm:$0xff]  ;;  %v1106_v54 = vld [vmem:[#allocation2 + $0xc3] sm:$0xff]  ;;  %v976_v29 = vadd.f32 %v974_v63, %v968_v10  ;;  %v3538_v51 = vstv %s2445_s3  ;;  %v1031_v36 = vadd.f32 %v1029_v30, %v1023_v34  ;;  %392 = vst.msk [vmem:[#allocation2 + $0x40] sm:$0x3f] %vm391_vm9, %v383_v35  ;;  %v642_v63 = vld [vmem:[#allocation2 + $0x91] sm:$0xff]  ;;  %s2701_s3 = sld [smem:[#allocation8 + $0x53]] }
 0x1b8   : > { %v1090_v25 = vld [vmem:[#allocation2 + $0x13a] sm:$0xff]  ;;  %v982_v53 = vmul.f32 %v3538_v51, %v979_v19  ;;  %v1037_v3 = vmul.f32 %v1036_v50, %v1034_v2  ;;  %v639_v11 = vadd.f32 %v637_v1, %v631_v48  ;;  %v695_v60 = vadd.f32 %v693_v40, %v687_v9  ;;  %v1162_v49 = vld [vmem:[#allocation2 + $0xc4] sm:$0xff]  ;;  %v698_v48 = vld [vmem:[#allocation2 + $0x92] sm:$0xff]  ;;  %s3633_s2 = sld [smem:[#allocation49_spill]] }
 0x1b9   : > { %v1087_v18 = vadd.f32 %v1085_v52, %v1079_v58  ;;  %v1093_v14 = vmul.f32 %v3372_v41, %v1090_v25  ;;  %v587_v23 = vld [vmem:[#allocation2 + $0x98] sm:$0xff]  ;;  %v3540_v10 = vstv %s3498_s14  ;;  %v659_v9 = vld [vmem:[#allocation2 + $0x22] sm:$0xff]  ;;  %v3543_v52 = vstv %s3539_s20  ;;  %s2727_s20 = sld [smem:[#allocation8 + $0x22]] }
 0x1ba   : > { %v1117_v30 = vmul.f32 %v3540_v10, %v1114_v20  ;;  %v3541_v34 = vstv %s3537_s27  ;;  %v984_v19 = vadd.f32 %v982_v53, %v976_v29  ;;  %v1039_v35 = vadd.f32 %v1037_v3, %v1031_v36  ;;  %v1122_v1 = vld [vmem:[#allocation2 + $0xf3] sm:$0xff]  ;;  %s3548_s27 = smov 122   ;;  %515 = vrot.lane.b32.xlu2 %v2597_v7, %s3532_s18  ;;  %s2734_s14 = sld [smem:[#allocation8 + $0x57]] }
 0x1bb   : > { %v1173_v2 = vmul.f32 %v3541_v34, %v1170_v62  ;;  %v1095_v40 = vadd.f32 %v1093_v14, %v1087_v18  ;;  %v590_v58 = vmul.f32 %v3543_v52, %v587_v23  ;;  %v645_v25 = vmul.f32 %v644_v43, %v642_v63  ;;  %528 = vrot.lane.b32.xlu1 %v2597_v7, %s3548_s27  ;;  %v1178_v36 = vld [vmem:[#allocation2 + $0xf4] sm:$0xff]  ;;  %s2739_s18 = sld [smem:[#allocation8 + $0x5e]] }
 0x1bc   : > { %v701_v51 = vmul.f32 %v700_v46, %v698_v48  ;;  %v3545_v41 = vstv %s2468_s10  ;;  %v3546_v10 = vstv %s2474_s26  ;;  %v1148_v29 = vstv %s2668_s19  ;;  %502 = vrot.lane.b32.xlu0 %v2597_v7, %s3533_s7  ;;  %s3554_s7 = sld [smem:[#allocation48_spill]] }
 0x1bd   : > { %3542 = sst [smem:[#allocation72_spill]] %s2701_s3  ;;  %v1109_v20 = vmul.f32 %v3545_v41, %v1106_v54  ;;  %v1165_v62 = vmul.f32 %v3546_v10, %v1162_v49  ;;  %v1103_v53 = vadd.f32 %v2357_v17, %v1039_v35  ;;  %v1159_v3 = vadd.f32 %v2363_v26, %v1095_v40  ;;  %v1130_v49 = vld [vmem:[#allocation2 + $0x10b] sm:$0xff] }
 0x1be   : > { %v592_v18 = vadd.f32 %v590_v58, %v2450_v57  ;;  %v647_v14 = vadd.f32 %v645_v25, %v639_v11  ;;  %v703_v23 = vadd.f32 %v701_v51, %v695_v60  ;;  %v1125_v41 = vmul.f32 %v1124_v13, %v1122_v1  ;;  %v1186_v57 = vld [vmem:[#allocation2 + $0x10c] sm:$0xff]  ;;  %v611_v48 = vld [vmem:[#allocation2 + $0x39] sm:$0xff]  ;;  %v1138_v58 = vld [vmem:[#allocation2 + $0x123] sm:$0xff]  ;;  %s3561_s19 = sld [smem:[#allocation77_spill]] }
 0x1bf   : > { %v3549_v54 = vstv %s3544_s25  ;;  %v1111_v63 = vadd.f32 %v1109_v20, %v1103_v53  ;;  %3550 = sst [smem:[#allocation34_spill]] %s2727_s20  ;;  %v2732_v26 = vadd.f32 %v2397_v39, %v984_v19  ;;  %v1167_v11 = vadd.f32 %v1165_v62, %v1159_v3  ;;  %v667_v1 = vld [vmem:[#allocation2 + $0x3a] sm:$0xff]  ;;  %v1194_v51 = vld [vmem:[#allocation2 + $0x124] sm:$0xff] }
 0x1c0   : > { %v662_v17 = vmul.f32 %v3549_v54, %v659_v9  ;;  %v656_v60 = vadd.f32 %v2395_v37, %v592_v18  ;;  %v711_v34 = vadd.f32 %v2349_v15, %v647_v14  ;;  %v767_v35 = vadd.f32 %v2353_v16, %v703_v23  ;;  %v802_v53 = vld [vmem:[#allocation2 + $0x7c] sm:$0xff]  ;;  %s2772_s25 = sld [smem:[#allocation8 + $0x5f]] }
 0x1c1   : > { %3551 = sst [smem:[#allocation33_spill]] %s2739_s18  ;;  %v1181_v7 = vmul.f32 %v1180_v59, %v1178_v36  ;;  %v1119_v39 = vadd.f32 %v1117_v30, %v1111_v63  ;;  %v3552_v19 = vstv %s3478_s28  ;;  %v3553_v40 = vstv %s3479_s4  ;;  %v1146_v36 = vld [vmem:[#allocation2 + $0x13b] sm:$0xff] }
 0x1c2   : > { %v614_v9 = vmul.f32 %v3552_v19, %v611_v48  ;;  %v670_v52 = vmul.f32 %v3553_v40, %v667_v1  ;;  %v1175_v37 = vadd.f32 %v1173_v2, %v1167_v11  ;;  %v719_v25 = vadd.f32 %v2478_v44, %v711_v34  ;;  %s3555_s4 = sld [smem:[#allocation63_spill]]  ;;  %v810_v1 = vld [vmem:[#allocation2 + $0x94] sm:$0xff]  ;;  %v1218_v19 = vld [vmem:[#allocation2 + $0xc5] sm:$0xff] }
 0x1c3   : > { %v775_v15 = vadd.f32 %v2482_v61, %v767_v35  ;;  %v664_v16 = vadd.f32 %v662_v17, %v656_v60  ;;  %v1133_v20 = vmul.f32 %v1132_v24, %v1130_v49  ;;  %v1189_v30 = vmul.f32 %v1188_v22, %v1186_v57  ;;  %s2762_s28 = sld [smem:[#allocation8 + $0x58]]  ;;  %v754_v57 = vld [vmem:[#allocation2 + $0x93] sm:$0xff] }
 0x1c4   : > { %v1127_v10 = vadd.f32 %v1125_v41, %v1119_v39  ;;  %v2754_v62 = vadd.f32 %v614_v9, %v2673_v38  ;;  %v1183_v2 = vadd.f32 %v1181_v7, %v1175_v37  ;;  %v727_v44 = vadd.f32 %v2610_v4, %v719_v25  ;;  %v1202_v38 = vld [vmem:[#allocation2 + $0x13c] sm:$0xff]  ;;  %v1775_v7 = vld [vmem:[#allocation2 + $0x10] sm:$0x3f]  ;;  %3570 = sst [smem:[#allocation77_spill]] %s2800_s9 }
 0x1c5   : > { %v783_v61 = vadd.f32 %v2627_v55, %v775_v15  ;;  %v2758_v3 = vadd.f32 %v670_v52, %v664_v16  ;;  %v3556_v18 = vstv %s3508_s30  ;;  %v1204_v23 = vstv %s2701_s3  ;;  %442 = vrot.lane.b32.xlu0 %v1775_v7, %s3548_s27  ;;  %v834_v39 = vld [vmem:[#allocation2 + $0x35] sm:$0xff]  ;;  %s2784_s30 = sld [smem:[#allocation8 + $0x5a]]  ;;  %v858_v7 = vld [vmem:[#allocation2 + $0x7d] sm:$0xff] }
 0x1c6   : > { %v1141_v14 = vmul.f32 %v3556_v18, %v1138_v58  ;;  %v1135_v41 = vadd.f32 %v1133_v20, %v1127_v10  ;;  %v756_v54 = vstv %s2715_s8  ;;  %v3557_v17 = vstv %s3554_s7  ;;  %s3560_s7 = sld [smem:[#allocation52_spill]]  ;;  %v1274_v58 = vld [vmem:[#allocation2 + $0xc6] sm:$0xff]  ;;  %v1226_v20 = vld [vmem:[#allocation2 + $0xdd] sm:$0xff] }
 0x1c7   : > { %v1197_v49 = vmul.f32 %v3557_v17, %v1194_v51  ;;  %v1191_v63 = vadd.f32 %v1189_v30, %v1183_v2  ;;  %v735_v4 = vadd.f32 %v2631_v5, %v727_v44  ;;  %v791_v55 = vadd.f32 %v2635_v45, %v783_v61  ;;  %v890_v5 = vld [vmem:[#allocation2 + $0x36] sm:$0xff]  ;;  %s3562_s27 = sld [smem:[#allocation67_spill]]  ;;  %v842_v51 = vld [vmem:[#allocation2 + $0x4d] sm:$0xff]  ;;  %v1282_v61 = vld [vmem:[#allocation2 + $0xde] sm:$0xff] }
 0x1c8   : > { %v3558_v11 = vstv %s3555_s4  ;;  %v1143_v34 = vadd.f32 %v1141_v14, %v1135_v41  ;;  %v1149_v35 = vmul.f32 %v1148_v29, %v1146_v36  ;;  %v812_v48 = vstv %s2727_s20  ;;  %s3559_s4 = sld [smem:[#allocation51_spill]] }
 0x1c9   : > { %v805_v60 = vmul.f32 %v3558_v11, %v802_v53  ;;  %v1199_v9 = vadd.f32 %v1197_v49, %v1191_v63  ;;  %v1205_v45 = vmul.f32 %v1204_v23, %v1202_v38  ;;  %v743_v40 = vadd.f32 %v2530_v12, %v735_v4  ;;  %s2788_s3 = sld [smem:[#allocation8 + $0x61]]  ;;  %v898_v38 = vld [vmem:[#allocation2 + $0x4e] sm:$0xff] }
 0x1ca   : > { %v799_v52 = vadd.f32 %v2534_v42, %v791_v55  ;;  %v1236_v37 = vstv %s2734_s14  ;;  %v1292_v25 = vstv %s2739_s18  ;;  %v1151_v15 = vadd.f32 %v1149_v35, %v1143_v34  ;;  %s3569_s8 = sld [smem:[#allocation71_spill]]  ;;  %v1234_v49 = vld [vmem:[#allocation2 + $0xf5] sm:$0xff] }
 0x1cb   : > { %v757_v16 = vmul.f32 %v756_v54, %v754_v57  ;;  %v1207_v30 = vadd.f32 %v1205_v45, %v1199_v9  ;;  %v751_v12 = vadd.f32 %v2661_v6, %v743_v40  ;;  %v813_v10 = vmul.f32 %v812_v48, %v810_v1  ;;  %s3572_s20 = sld [smem:[#allocation59_spill]]  ;;  %v1290_v35 = vld [vmem:[#allocation2 + $0xf6] sm:$0xff] }
 0x1cc   : > { %v807_v42 = vadd.f32 %v805_v60, %v799_v52  ;;  %v3567_v2 = vstv %s3560_s7  ;;  %v3568_v18 = vstv %s3561_s19  ;;  %v1215_v41 = vadd.f32 %v2367_v27, %v1151_v15  ;;  %s2810_s7 = sld [smem:[#allocation8 + $0x30]] }
 0x1cd   : > { %v893_v44 = vmul.f32 %v3567_v2, %v890_v5  ;;  %v1221_v14 = vmul.f32 %v3568_v18, %v1218_v19  ;;  %v3571_v17 = vstv %s3562_s27  ;;  %v1271_v63 = vadd.f32 %v2384_v33, %v1207_v30  ;;  %v1242_v19 = vld [vmem:[#allocation2 + $0x10d] sm:$0xff]  ;;  %s3582_s18 = sld [smem:[#allocation65_spill]] }
 0x1ce   : > { %v3566_v53 = vstv %s3559_s4  ;;  %v1277_v6 = vmul.f32 %v3571_v17, %v1274_v58  ;;  %v759_v4 = vadd.f32 %v757_v16, %v751_v12  ;;  %v815_v57 = vadd.f32 %v813_v10, %v807_v42  ;;  %s3577_s4 = sld [smem:[#allocation64_spill]]  ;;  %v1298_v16 = vld [vmem:[#allocation2 + $0x10e] sm:$0xff] }
 0x1cf   : > { %3563 = sst [smem:[#allocation35_spill]] %s2788_s3  ;;  %v837_v36 = vmul.f32 %v3566_v53, %v834_v39  ;;  %v3573_v55 = vstv %s3564_s22  ;;  %v3574_v60 = vstv %s3565_s21  ;;  %v1244_v27 = vstv %s2762_s28  ;;  %v1306_v53 = vld [vmem:[#allocation2 + $0x126] sm:$0xff] }
 0x1d0   : > { %v845_v11 = vmul.f32 %v3573_v55, %v842_v51  ;;  %v1229_v34 = vmul.f32 %v3574_v60, %v1226_v20  ;;  %v1223_v1 = vadd.f32 %v1221_v14, %v1215_v41  ;;  %v3576_v39 = vstv %s3569_s8  ;;  %v1250_v20 = vld [vmem:[#allocation2 + $0x125] sm:$0xff]  ;;  %s3579_s22 = sld [smem:[#allocation74_spill]] }
 0x1d1   : > { %v1285_v5 = vmul.f32 %v3576_v39, %v1282_v61  ;;  %v1279_v33 = vadd.f32 %v1277_v6, %v1271_v63  ;;  %v823_v9 = vadd.f32 %v2371_v28, %v759_v4  ;;  %v879_v45 = vadd.f32 %v2380_v32, %v815_v57  ;;  %v914_v14 = vld [vmem:[#allocation2 + $0x7e] sm:$0xff]  ;;  %s3681_s14 = sld [smem:[#allocation58_spill]] }
 0x1d2   : > { %3575 = sst [smem:[#allocation67_spill]] %s2810_s7  ;;  %v3578_v40 = vstv %s3572_s20  ;;  %v1237_v58 = vmul.f32 %v1236_v37, %v1234_v49  ;;  %v1300_v15 = vstv %s2772_s25  ;;  %v1231_v51 = vadd.f32 %v1229_v34, %v1223_v1  ;;  %v1314_v57 = vld [vmem:[#allocation2 + $0x13e] sm:$0xff] }
 0x1d3   : > { %v901_v52 = vmul.f32 %v3578_v40, %v898_v38  ;;  %v1293_v30 = vmul.f32 %v1292_v25, %v1290_v35  ;;  %v1287_v12 = vadd.f32 %v1285_v5, %v1279_v33  ;;  %v831_v42 = vadd.f32 %v2496_v31, %v823_v9  ;;  %s3581_s20 = sld [smem:[#allocation53_spill]]  ;;  %v1258_v38 = vld [vmem:[#allocation2 + $0x13d] sm:$0xff] }
 0x1d4   : > { %v887_v28 = vadd.f32 %v2503_v56, %v879_v45  ;;  %v3580_v10 = vstv %s3577_s4  ;;  %v1245_v2 = vmul.f32 %v1244_v27, %v1242_v19  ;;  %v1260_v61 = vstv %s2784_s30  ;;  %v922_v9 = vld [vmem:[#allocation2 + $0x96] sm:$0xff]  ;;  %s3640_s4 = sld [smem:[#allocation48_spill]]  ;;  %s3711_s30 = smov 16  }
 0x1d5   : > { %v861_v32 = vmul.f32 %v3580_v10, %v858_v7  ;;  %v1239_v18 = vadd.f32 %v1237_v58, %v1231_v51  ;;  %v1301_v41 = vmul.f32 %v1300_v15, %v1298_v16  ;;  %v1295_v17 = vadd.f32 %v1293_v30, %v1287_v12  ;;  %v866_v7 = vld [vmem:[#allocation2 + $0x95] sm:$0xff]  ;;  %s3691_s28 = sld [smem:[#allocation64_spill]] }
 0x1d6   : > { %v839_v31 = vadd.f32 %v837_v36, %v831_v42  ;;  %v895_v6 = vadd.f32 %v893_v44, %v887_v28  ;;  %v3583_v56 = vstv %s3579_s22  ;;  %v1316_v63 = vstv %s2788_s3  ;;  %s3590_s3 = sld [smem:[#allocation24_spill]] }
 0x1d7   : > { %v1253_v49 = vmul.f32 %v3583_v56, %v1250_v20  ;;  %v1247_v4 = vadd.f32 %v1245_v2, %v1239_v18  ;;  %v868_v55 = vstv %s2800_s9  ;;  %v1303_v35 = vadd.f32 %v1301_v41, %v1295_v17  ;;  %s3386_s9 = smov 32   ;;  %s3692_s25 = sld [smem:[#allocation65_spill]] }
 0x1d8   : > { %v847_v1 = vadd.f32 %v845_v11, %v839_v31  ;;  %v903_v39 = vadd.f32 %v901_v52, %v895_v6  ;;  %v3585_v5 = vstv %s3582_s18  ;;  %v1261_v36 = vmul.f32 %v1260_v61, %v1258_v38  ;;  %s3387_s18 = smov 48  }
 0x1d9   : > { %v3584_v60 = vstv %s3581_s20  ;;  %v917_v19 = vmul.f32 %v3585_v5, %v914_v14  ;;  %v1255_v33 = vadd.f32 %v1253_v49, %v1247_v4  ;;  %v924_v44 = vstv %s2810_s7  ;;  %s3385_s7 = smov 16  }
 0x1da   : > { %v1309_v34 = vmul.f32 %v3584_v60, %v1306_v53  ;;  %v1317_v40 = vmul.f32 %v1316_v63, %v1314_v57  ;;  %v855_v58 = vadd.f32 %v2538_v47, %v847_v1  ;;  %v911_v16 = vadd.f32 %v2546_v0, %v903_v39 }
 0x1db   : > { %v1263_v51 = vadd.f32 %v1261_v36, %v1255_v33  ;;  %v869_v11 = vmul.f32 %v868_v55, %v866_v7  ;;  %v925_v12 = vmul.f32 %v924_v44, %v922_v9  ;;  %v1337_v0 = vlaneseq  ;;  %v987_v33 = vld [vmem:[#allocation2 + $0xb1] sm:$0xff] }
 0x1dc   : > { %v1311_v45 = vadd.f32 %v1309_v34, %v1303_v35  ;;  %v863_v30 = vadd.f32 %v861_v32, %v855_v58  ;;  %v919_v52 = vadd.f32 %v917_v19, %v911_v16 }
 0x1dd   : > { %vm2852_vm10 = vcmp.lt.s32.totalorder %v1337_v0, 16  ;;  %vm2994_vm15 = vcmp.ge.s32.totalorder %v1337_v0, 16  ;;  %vm2999_vm1 = vcmp.lt.s32.totalorder %v1337_v0, 32  ;;  %vm3055_vm3 = vcmp.ge.s32.totalorder %v1337_v0, 32 }
 0x1de   : > { %v1319_v20 = vadd.f32 %v1317_v40, %v1311_v45  ;;  %v871_v28 = vadd.f32 %v869_v11, %v863_v30  ;;  %v927_v10 = vadd.f32 %v925_v12, %v919_v52  ;;  %v3592_v40 = vstv %s3590_s3  ;;  %s3598_s3 = sld [smem:[#allocation40_spill]]  ;;  %vm1351_vm2 = vmand %vm2994_vm15, %vm2999_vm1 }
 0x1df   : > { %v990_v58 = vmul.f32 %v3592_v40, %v987_v33  ;;  %vm3060_vm4 = vcmp.lt.s32.totalorder %v1337_v0, 48  ;;  %vm3074_vm6 = vcmp.ge.s32.totalorder %v1337_v0, 48  ;;  %vm3079_vm7 = vcmp.lt.s32.totalorder %v1337_v0, 64 }
 0x1e0   : > { %v1323_v42 = vadd.f32 %v1319_v20, %v1263_v51  ;;  %v1321_v53 = vadd.f32 %v927_v10, %v871_v28  ;;  %vm1361_vm5 = vmand %vm3055_vm3, %vm3060_vm4  ;;  %vm3135_vm0 = vcmp.ge.s32.totalorder %v1337_v0, 96 }
 0x1e1   : > { %vm3727_vm15 = vmand %vm3074_vm6, %vm3079_vm7 }
 0x1e2   : > { %v1325_v2 = vadd.f32 %v1323_v42, %v1321_v53  ;;  %v3595_v42 = vstv %s3497_s17  ;;  %s3625_s17 = sld [smem:[#allocation69_spill]] }
 0x1e4   : > { %v1327_v18 = vsub.f32 0.0, %v1325_v2  ;;  %v3604_v40 = vstv %s3598_s3  ;;  %s3642_s3 = sld [smem:[#allocation56_spill]] }
 0x1e6   : > { %v1329_v14 = vmul.f32 1.442695, %v1327_v18 }
 0x1e8   : > { %1767 = vpow2.f32 %v1329_v14 }
 0x1ee   : > { %v1768_v41 = vpop.eup %1767 }
 0x1ef   : > { %v1333_v47 = vadd.f32 1.0, %v1768_v41 }
 0x1f1   : > { %1769 = vrcp.f32 %v1333_v47 }
 0x1f7   : > { %v1770_v32 = vpop.eup %1769 }
 0x1f8   : > { %1343 = vst [vmem:[#allocation1] sm:$0xff] %v1770_v32 }
 0x1f9   : > { %1341 = vst.msk [vmem:[#allocation3] sm:$0x1] %vm2852_vm10, %v1770_v32 }
 0x1ff   : > { %v1345_v17 = vld [vmem:[#allocation1 + $0x1] ss:$9 sm:$0xff] }
 0x200   : > { %1346 = vrot.lane.b32.xlu2 %v1345_v17, %s3385_s7  ;;  %1353 = vst [vmem:[#allocation1] sm:$0xff] %v1770_v32  ;;  %s3389_s7 = smov 64  }
 0x204   : > { %v477_v6 = vpop.permute.xlu2 %476 }
 0x205   : > { %484 = vst.msk [vmem:[#allocation2 + $0xe8] sm:$0x3f] %vm391_vm9, %v477_v6  ;;  %v3599_v6 = vstv %s2509_s11  ;;  %s3609_s11 = sld [smem:[#allocation26_spill]]  ;;  %vm3091_vm9 = vcmp.lt.s32.totalorder %v1337_v0, 80 }
 0x207   : > { %v1355_v31 = vld [vmem:[#allocation1 + $0x2] ss:$9 sm:$0xff] }
 0x208   : > { %1356 = vrot.lane.b32.xlu1 %v1355_v31, %s3386_s9  ;;  %1363 = vst [vmem:[#allocation1] sm:$0xff] %v1770_v32  ;;  %s3390_s9 = smov 80  }
 0x20c   : > { %v413_v49 = vpop.permute.xlu2 %412  ;;  %v1003_v16 = vld [vmem:[#allocation2 + $0xe1] sm:$0xff] }
 0x20d   : > { %422 = vst.msk [vmem:[#allocation2 + $0x70] sm:$0x3f] %vm421_vm11, %v413_v49  ;;  %v1059_v51 = vld [vmem:[#allocation2 + $0xe2] sm:$0xff]  ;;  %v3601_v49 = vstv %s2516_s13  ;;  %s3611_s13 = sld [smem:[#allocation27_spill]] }
 0x20e   : > { %v1062_v28 = vmul.f32 %v3595_v42, %v1059_v51 }
 0x20f   : > { %v1365_v56 = vld [vmem:[#allocation1 + $0x3] ss:$9 sm:$0xff] }
 0x210   : > { %1366 = vrot.lane.b32.xlu0 %v1365_v56, %s3387_s18  ;;  %1373 = vst [vmem:[#allocation1] sm:$0xff] %v1770_v32  ;;  %s3600_s18 = sld [smem:[#allocation41_spill]] }
 0x214   : > { %v516_v57 = vpop.permute.xlu2 %515  ;;  %v683_v17 = vld [vmem:[#allocation2 + $0x6a] sm:$0xff] }
 0x215   : > { %523 = vst.msk [vmem:[#allocation2 + $0x130] sm:$0x3f] %vm436_vm12, %v516_v57 }
 0x217   : > { %v1375_v4 = vld [vmem:[#allocation1 + $0x4] ss:$9 sm:$0xff] }
 0x218   : > { %1376 = vrot.lane.b32.xlu2 %v1375_v4, %s3389_s7  ;;  %1383 = vst [vmem:[#allocation1] sm:$0xff] %v1770_v32  ;;  %s3391_s7 = smov 96  }
 0x21c   : > { %v490_v34 = vpop.permute.xlu1 %489  ;;  %v1027_v31 = vld [vmem:[#allocation2 + $0x129] sm:$0xff] }
 0x21d   : > { %497 = vst.msk [vmem:[#allocation2 + $0x100] sm:$0x3f] %vm406_vm13, %v490_v34  ;;  %v464_v35 = vpop.permute.xlu0 %463  ;;  %v1083_v57 = vld [vmem:[#allocation2 + $0x12a] sm:$0xff] }
 0x21e   : > { %471 = vst.msk [vmem:[#allocation2 + $0xd0] sm:$0x3f] %vm376_vm8, %v464_v35  ;;  %vm3086_vm8 = vcmp.ge.s32.totalorder %v1337_v0, 64 }
 0x21f   : > { %v1385_v60 = vld [vmem:[#allocation1 + $0x5] ss:$9 sm:$0xff]  ;;  %vm3729_vm1 = vmand %vm3086_vm8, %vm3091_vm9 }
 0x220   : > { %1386 = vrot.lane.b32.xlu1 %v1385_v60, %s3390_s9  ;;  %1393 = vst [vmem:[#allocation1] sm:$0xff] %v1770_v32  ;;  %s3591_s9 = sld [smem:[#allocation54_spill]] }
 0x224   : > { %v428_v7 = vpop.permute.xlu1 %427  ;;  %v1011_v10 = vld [vmem:[#allocation2 + $0xf9] sm:$0xff] }
 0x225   : > { %437 = vst.msk [vmem:[#allocation2 + $0x88] sm:$0x3f] %vm436_vm12, %v428_v7  ;;  %v398_v39 = vpop.permute.xlu0 %397  ;;  %v995_v5 = vld [vmem:[#allocation2 + $0xc9] sm:$0xff]  ;;  %v1067_v53 = vld [vmem:[#allocation2 + $0xfa] sm:$0xff]  ;;  %v1014_v56 = vmul.f32 %v3599_v6, %v1011_v10  ;;  %vm3115_vm12 = vcmp.ge.s32.totalorder %v1337_v0, 80 }
 0x226   : > { %407 = vst.msk [vmem:[#allocation2 + $0x58] sm:$0x3f] %vm406_vm13, %v398_v39  ;;  %v1051_v19 = vld [vmem:[#allocation2 + $0xca] sm:$0xff]  ;;  %v998_v36 = vmul.f32 %v996_v21, %v995_v5  ;;  %v3594_v21 = vstv %s3516_s12  ;;  %v3596_v2 = vstv %s3591_s9  ;;  %v1070_v4 = vmul.f32 %v3601_v49, %v1067_v53  ;;  %s3608_s9 = sld [smem:[#allocation25_spill]]  ;;  %v1099_v10 = vld [vmem:[#allocation2 + $0xb3] sm:$0xff] }
 0x227   : > { %v1395_v1 = vld [vmem:[#allocation1 + $0x6] ss:$9 sm:$0xff]  ;;  %v1054_v9 = vmul.f32 %v1052_v8, %v1051_v19  ;;  %v1006_v8 = vmul.f32 %v3594_v21, %v1003_v16  ;;  %v3602_v19 = vstv %s2562_s1  ;;  %v3605_v16 = vstv %s3600_s18  ;;  %s3610_s12 = sld [smem:[#allocation61_spill]] }
 0x228   : > { %1396 = vrot.lane.b32.xlu0 %v1395_v1, %s3391_s7  ;;  %1403 = vst [vmem:[#allocation1] sm:$0xff] %v1770_v32  ;;  %s3593_s7 = sld [smem:[#allocation55_spill]]  ;;  %v1000_v20 = vadd.f32 %v998_v36, %v990_v58  ;;  %v3603_v36 = vstv %s2568_s23  ;;  %v1155_v53 = vld [vmem:[#allocation2 + $0xb4] sm:$0xff]  ;;  %v3615_v49 = vstv %s3609_s11  ;;  %vm3120_vm13 = vcmp.lt.s32.totalorder %v1337_v0, 96 }
 0x229   : > { %v1056_v30 = vadd.f32 %v1054_v9, %v2732_v26  ;;  %v627_v26 = vld [vmem:[#allocation2 + $0x69] sm:$0xff]  ;;  %s3612_s23 = sld [smem:[#allocation28_spill]] }
 0x22a   : > { %v1008_v47 = vadd.f32 %v1006_v8, %v1000_v20  ;;  %v630_v58 = vmul.f32 %v3604_v40, %v627_v26  ;;  %v3606_v20 = vstv %s3506_s24  ;;  %s3620_s24 = sld [smem:[#allocation30_spill]] }
 0x22b   : > { %v1064_v32 = vadd.f32 %v1062_v28, %v1056_v30  ;;  %v1030_v30 = vmul.f32 %v3606_v20, %v1027_v31  ;;  %s3627_s1 = sld [smem:[#allocation37_spill]] }
 0x22c   : > { %v1016_v39 = vadd.f32 %v1014_v56, %v1008_v47  ;;  %v635_v21 = vld [vmem:[#allocation2 + $0x81] sm:$0xff]  ;;  %v3614_v6 = vstv %s3608_s9  ;;  %s3644_s18 = sld [smem:[#allocation57_spill]] }
 0x22d   : > { %v529_v45 = vpop.permute.xlu1 %528  ;;  %v619_v52 = vld [vmem:[#allocation2 + $0x51] sm:$0xff]  ;;  %v1072_v5 = vadd.f32 %v1070_v4, %v1064_v32  ;;  %v691_v8 = vld [vmem:[#allocation2 + $0x82] sm:$0xff]  ;;  %v3613_v32 = vstv %s2619_s15  ;;  %s3626_s15 = sld [smem:[#allocation36_spill]] }
 0x22e   : > { %536 = vst.msk [vmem:[#allocation2 + $0x148] sm:$0x3f] %vm451_vm14, %v529_v45  ;;  %v503_v11 = vpop.permute.xlu0 %502  ;;  %v675_v12 = vld [vmem:[#allocation2 + $0x52] sm:$0xff]  ;;  %v622_v18 = vmul.f32 %v3596_v2, %v619_v52  ;;  %v3597_v14 = vstv %s3593_s7  ;;  %v3607_v52 = vstv %s3507_s6  ;;  %s3621_s6 = sld [smem:[#allocation31_spill]] }
 0x22f   : > { %510 = vst.msk [vmem:[#allocation2 + $0x118] sm:$0x3f] %vm421_vm11, %v503_v11  ;;  %v678_v41 = vmul.f32 %v3597_v14, %v675_v12  ;;  %v707_v45 = vld [vmem:[#allocation2 + $0xb] sm:$0xff]  ;;  %v1086_v12 = vmul.f32 %v3607_v52, %v1083_v57  ;;  %s3639_s7 = sld [smem:[#allocation47_spill]]  ;;  %vm3394_vm11 = vmand %vm3074_vm6, %vm3079_vm7 }
 0x230   : > { %v624_v60 = vadd.f32 %v622_v18, %v2754_v62  ;;  %v686_v62 = vmul.f32 %v3605_v16, %v683_v17  ;;  %v763_v11 = vld [vmem:[#allocation2 + $0xc] sm:$0xff]  ;;  %v710_v56 = vmul.f32 %v3614_v6, %v707_v45  ;;  %v715_v45 = vld [vmem:[#allocation2 + $0x23] sm:$0xff]  ;;  %s3646_s9 = sld [smem:[#allocation43_spill]] }
 0x231   : > { %v680_v34 = vadd.f32 %v678_v41, %v2758_v3  ;;  %v1107_v14 = vld [vmem:[#allocation2 + $0xcb] sm:$0xff]  ;;  %v766_v4 = vmul.f32 %v3615_v49, %v763_v11  ;;  %s3728_s11 = sld [smem:[#allocation22_spill]] }
 0x232   : > { %v632_v2 = vadd.f32 %v630_v58, %v624_v60  ;;  %v1163_v41 = vld [vmem:[#allocation2 + $0xcc] sm:$0xff]  ;;  %v3622_v58 = vstv %s2468_s10  ;;  %v771_v52 = vld [vmem:[#allocation2 + $0x24] sm:$0xff]  ;;  %s3684_s10 = sld [smem:[#allocation44_spill]] }
 0x233   : > { %v688_v18 = vadd.f32 %v686_v62, %v680_v34  ;;  %v819_v57 = vld [vmem:[#allocation2 + $0xd] sm:$0xff]  ;;  %v1110_v16 = vmul.f32 %v3622_v58, %v1107_v14  ;;  %v3623_v62 = vstv %s2474_s26  ;;  %s3634_s26 = sld [smem:[#allocation50_spill]] }
 0x234   : > { %v875_v34 = vld [vmem:[#allocation2 + $0xe] sm:$0xff] }
 0x235   : > { %v1035_v51 = vld [vmem:[#allocation2 + $0x141] sm:$0xff] }
 0x236   : > { %v1019_v35 = vld [vmem:[#allocation2 + $0x111] sm:$0xff]  ;;  %v1091_v3 = vld [vmem:[#allocation2 + $0x142] sm:$0xff]  ;;  %v1038_v47 = vmul.f32 %v1036_v50, %v1035_v51  ;;  %v1166_v51 = vmul.f32 %v3623_v62, %v1163_v41  ;;  %v3629_v41 = vstv %s3621_s6  ;;  %v3641_v62 = vstv %s3633_s2  ;;  %s3657_s6 = sld [smem:[#allocation63_spill]] }
 0x237   : > { %v1075_v1 = vld [vmem:[#allocation2 + $0x112] sm:$0xff]  ;;  %v443_v7 = vpop.permute.xlu0 %442  ;;  %v1022_v33 = vmul.f32 %v3602_v19, %v1019_v35  ;;  %v1094_v26 = vmul.f32 %v3613_v32, %v1091_v3  ;;  %v3616_v35 = vstv %s3524_s0  ;;  %v3619_v19 = vstv %s3612_s23  ;;  %s3654_s23 = sld [smem:[#allocation32_spill]]  ;;  %s3721_s0 = smov 48  }
 0x238   : > { %v1078_v9 = vmul.f32 %v3603_v36, %v1075_v1  ;;  %452 = vst.msk [vmem:[#allocation2 + $0xa0] sm:$0x3f] %vm451_vm14, %v443_v7  ;;  %v638_v1 = vmul.f32 %v3616_v35, %v635_v21  ;;  %v3617_v7 = vstv %s3610_s12  ;;  %v1158_v50 = vmul.f32 %v3619_v19, %v1155_v53  ;;  %v1171_v36 = vld [vmem:[#allocation2 + $0xe4] sm:$0xff]  ;;  %v1179_v21 = vld [vmem:[#allocation2 + $0xfc] sm:$0xff]  ;;  %v1131_v49 = vld [vmem:[#allocation2 + $0x113] sm:$0xff]  ;;  %s3685_s2 = sld [smem:[#allocation45_spill]] }
 0x239   : > { %v1024_v42 = vadd.f32 %v1022_v33, %v1016_v39  ;;  %v694_v60 = vmul.f32 %v3617_v7, %v691_v8  ;;  %v3618_v39 = vstv %s3611_s13  ;;  %v1115_v33 = vld [vmem:[#allocation2 + $0xe3] sm:$0xff]  ;;  %v3628_v53 = vstv %s3620_s24  ;;  %s3653_s13 = sld [smem:[#allocation29_spill]]  ;;  %vm3396_vm14 = vmand %vm3115_vm12, %vm3120_vm13 }
 0x23a   : > { %v1080_v28 = vadd.f32 %v1078_v9, %v1072_v5  ;;  %v1102_v5 = vmul.f32 %v3618_v39, %v1099_v10  ;;  %v640_v3 = vadd.f32 %v638_v1, %v632_v2  ;;  %v2931_v14 = vmul.f32 %v3628_v53, %v819_v57  ;;  %v1139_v39 = vld [vmem:[#allocation2 + $0x12b] sm:$0xff]  ;;  %s3655_s24 = sld [smem:[#allocation62_spill]] }
 0x23b   : > { %v1032_v17 = vadd.f32 %v1030_v30, %v1024_v42  ;;  %v696_v11 = vadd.f32 %v694_v60, %v688_v18  ;;  %v2935_v2 = vmul.f32 %v3629_v41, %v875_v34  ;;  %v723_v18 = vld [vmem:[#allocation2 + $0x3b] sm:$0xff]  ;;  %v3635_v57 = vstv %s3626_s15  ;;  %s3667_s15 = sld [smem:[#allocation38_spill]] }
 0x23c   : > { %v1088_v31 = vadd.f32 %v1086_v12, %v1080_v28  ;;  %v1123_v12 = vld [vmem:[#allocation2 + $0xfb] sm:$0xff]  ;;  %v718_v7 = vmul.f32 %v3635_v57, %v715_v45  ;;  %v3637_v60 = vstv %s3627_s1  ;;  %v1182_v19 = vmul.f32 %v1180_v59, %v1179_v21  ;;  %v1219_v57 = vld [vmem:[#allocation2 + $0xcd] sm:$0xff]  ;;  %s3668_s1 = sld [smem:[#allocation39_spill]] }
 0x23d   : > { %v1040_v9 = vadd.f32 %v1038_v47, %v1032_v17  ;;  %v3631_v47 = vstv %s3624_s5  ;;  %v774_v34 = vmul.f32 %v3637_v60, %v771_v52  ;;  %v726_v45 = vmul.f32 %v3641_v62, %v723_v18  ;;  %v1203_v52 = vld [vmem:[#allocation2 + $0x144] sm:$0xff] }
 0x23e   : > { %v1096_v40 = vadd.f32 %v1094_v26, %v1088_v31  ;;  %v1118_v32 = vmul.f32 %v3631_v47, %v1115_v33  ;;  %v3632_v26 = vstv %s3625_s17  ;;  %v779_v31 = vld [vmem:[#allocation2 + $0x3c] sm:$0xff]  ;;  %v731_v33 = vld [vmem:[#allocation2 + $0x53] sm:$0xff]  ;;  %v3651_v41 = vstv %s3642_s3  ;;  %s1915_s3 = smov 112   ;;  %s3735_s17 = sshll.u32 %s3728_s11, 3 }
 0x23f   : > { %v643_v20 = vld [vmem:[#allocation2 + $0x99] sm:$0xff]  ;;  %v1104_v8 = vadd.f32 %v1102_v5, %v1040_v9  ;;  %v1174_v17 = vmul.f32 %v3632_v26, %v1171_v36  ;;  %v1126_v5 = vmul.f32 %v1124_v13, %v1123_v12  ;;  %v1134_v13 = vmul.f32 %v1132_v24, %v1131_v49  ;;  %v803_v26 = vld [vmem:[#allocation2 + $0x84] sm:$0xff] }
 0x240   : > { %v699_v30 = vld [vmem:[#allocation2 + $0x9a] sm:$0xff]  ;;  %v1160_v42 = vadd.f32 %v1158_v50, %v1096_v40  ;;  %v646_v28 = vmul.f32 %v644_v43, %v643_v20  ;;  %v1195_v50 = vld [vmem:[#allocation2 + $0x12c] sm:$0xff]  ;;  %v734_v24 = vmul.f32 %v3651_v41, %v731_v33  ;;  %v3652_v18 = vstv %s3644_s18  ;;  %s3724_s18 = smov 96  }
 0x241   : > { %v702_v10 = vmul.f32 %v700_v46, %v699_v30  ;;  %v1112_v6 = vadd.f32 %v1110_v16, %v1104_v8  ;;  %v1187_v43 = vld [vmem:[#allocation2 + $0x114] sm:$0xff]  ;;  %v795_v20 = vld [vmem:[#allocation2 + $0x6c] sm:$0xff]  ;;  %v1147_v30 = vld [vmem:[#allocation2 + $0x143] sm:$0xff]  ;;  %v1206_v60 = vmul.f32 %v1204_v23, %v1203_v52  ;;  %v3663_v62 = vstv %s3655_s24  ;;  %s3733_s24 = sld [smem:[#allocation81_spill]] }
 0x242   : > { %v1168_v35 = vadd.f32 %v1166_v51, %v1160_v42  ;;  %v648_v46 = vadd.f32 %v646_v28, %v640_v3  ;;  %v787_v36 = vld [vmem:[#allocation2 + $0x54] sm:$0xff]  ;;  %v3643_v51 = vstv %s3634_s26  ;;  %v1190_v59 = vmul.f32 %v1188_v22, %v1187_v43  ;;  %v1227_v23 = vld [vmem:[#allocation2 + $0xe5] sm:$0xff] }
 0x243   : > { %v704_v1 = vadd.f32 %v702_v10, %v696_v11  ;;  %v1120_v9 = vadd.f32 %v1118_v32, %v1112_v6  ;;  %v782_v3 = vmul.f32 %v3643_v51, %v779_v31  ;;  %v739_v11 = vld [vmem:[#allocation2 + $0x6b] sm:$0xff]  ;;  %v1211_v8 = vld [vmem:[#allocation2 + $0xb5] sm:$0xff]  ;;  %v3648_v42 = vstv %s3639_s7  ;;  %v747_v32 = vld [vmem:[#allocation2 + $0x83] sm:$0xff]  ;;  %s3722_s7 = smov 64  }
 0x244   : > { %v1176_v40 = vadd.f32 %v1174_v17, %v1168_v35  ;;  %v712_v58 = vadd.f32 %v710_v56, %v648_v46  ;;  %v1142_v28 = vmul.f32 %v3648_v42, %v1139_v39  ;;  %v3650_v10 = vstv %s3640_s4  ;;  %v1267_v47 = vld [vmem:[#allocation2 + $0xb6] sm:$0xff]  ;;  %v883_v42 = vld [vmem:[#allocation2 + $0x26] sm:$0xff]  ;;  %s3723_s4 = smov 80  }
 0x245   : > { %v768_v16 = vadd.f32 %v766_v4, %v704_v1  ;;  %v1128_v12 = vadd.f32 %v1126_v5, %v1120_v9  ;;  %v1198_v53 = vmul.f32 %v3650_v10, %v1195_v50  ;;  %v790_v22 = vmul.f32 %v3652_v18, %v787_v36  ;;  %v755_v50 = vld [vmem:[#allocation2 + $0x9b] sm:$0xff] }
 0x246   : > { %v1184_v21 = vadd.f32 %v1182_v19, %v1176_v40  ;;  %v720_v56 = vadd.f32 %v718_v7, %v712_v58  ;;  %v3656_v35 = vstv %s3645_s29  ;;  %v3658_v46 = vstv %s3646_s9  ;;  %v811_v36 = vld [vmem:[#allocation2 + $0x9c] sm:$0xff]  ;;  %s3725_s29 = sld [smem:[#allocation17_spill]] }
 0x247   : > { %v776_v4 = vadd.f32 %v774_v34, %v768_v16  ;;  %v1136_v17 = vadd.f32 %v1134_v13, %v1128_v12  ;;  %v742_v43 = vmul.f32 %v3656_v35, %v739_v11  ;;  %v798_v1 = vmul.f32 %v3658_v46, %v795_v20  ;;  %v1275_v34 = vld [vmem:[#allocation2 + $0xce] sm:$0xff]  ;;  %v1291_v10 = vld [vmem:[#allocation2 + $0xfe] sm:$0xff]  ;;  %s3726_s9 = sld [smem:[#allocation23_spill]] }
 0x248   : > { %v1192_v31 = vadd.f32 %v1190_v59, %v1184_v21  ;;  %v728_v6 = vadd.f32 %v726_v45, %v720_v56  ;;  %v1150_v7 = vmul.f32 %v1148_v29, %v1147_v30  ;;  %v3661_v9 = vstv %s3653_s13  ;;  %v827_v30 = vld [vmem:[#allocation2 + $0x25] sm:$0xff] }
 0x249   : > { %v784_v49 = vadd.f32 %v782_v3, %v776_v4  ;;  %v1144_v39 = vadd.f32 %v1142_v28, %v1136_v17  ;;  %v1214_v40 = vmul.f32 %v3661_v9, %v1211_v8  ;;  %v3662_v58 = vstv %s3654_s23  ;;  %v1283_v3 = vld [vmem:[#allocation2 + $0xe6] sm:$0xff]  ;;  %v1235_v28 = vld [vmem:[#allocation2 + $0xfd] sm:$0xff] }
 0x24a   : > { %v1200_v5 = vadd.f32 %v1198_v53, %v1192_v31  ;;  %v736_v19 = vadd.f32 %v734_v24, %v728_v6  ;;  %v1270_v16 = vmul.f32 %v3662_v58, %v1267_v47  ;;  %v750_v45 = vmul.f32 %v3663_v62, %v747_v32  ;;  %v891_v31 = vld [vmem:[#allocation2 + $0x3e] sm:$0xff] }
 0x24b   : > { %v792_v33 = vadd.f32 %v790_v22, %v784_v49  ;;  %v3664_v29 = vstv %s3657_s6  ;;  %v1152_v11 = vadd.f32 %v1150_v7, %v1144_v39  ;;  %v3665_v52 = vstv %s3561_s19  ;;  %v835_v22 = vld [vmem:[#allocation2 + $0x3d] sm:$0xff]  ;;  %v1243_v49 = vld [vmem:[#allocation2 + $0x115] sm:$0xff]  ;;  %v1251_v39 = vld [vmem:[#allocation2 + $0x12d] sm:$0xff] }
 0x24c   : > { %v806_v51 = vmul.f32 %v3664_v29, %v803_v26  ;;  %v1208_v13 = vadd.f32 %v1206_v60, %v1200_v5  ;;  %v744_v59 = vadd.f32 %v742_v43, %v736_v19  ;;  %v1222_v12 = vmul.f32 %v3665_v52, %v1219_v57  ;;  %v1299_v43 = vld [vmem:[#allocation2 + $0x116] sm:$0xff]  ;;  %v1307_v5 = vld [vmem:[#allocation2 + $0x12e] sm:$0xff]  ;;  %s1687_s12 = sshll.u32 %s3725_s29, 3 }
 0x24d   : > { %v800_v20 = vadd.f32 %v798_v1, %v792_v33  ;;  %v3666_v21 = vstv %s3562_s27  ;;  %v758_v4 = vmul.f32 %v756_v54, %v755_v50  ;;  %v814_v8 = vmul.f32 %v812_v48, %v811_v36  ;;  %v843_v33 = vld [vmem:[#allocation2 + $0x55] sm:$0xff]  ;;  %s3683_s27 = sld [smem:[#allocation59_spill]]  ;;  %v851_v29 = vld [vmem:[#allocation2 + $0x6d] sm:$0xff]  ;;  %s1486_s6 = scalar_lea.hbm %s3733_s24, %s1687_s12 }
 0x24e   : > { %v1278_v56 = vmul.f32 %v3666_v21, %v1275_v34  ;;  %v1216_v53 = vadd.f32 %v1214_v40, %v1152_v11  ;;  %v1272_v41 = vadd.f32 %v1270_v16, %v1208_v13  ;;  %v752_v24 = vadd.f32 %v750_v45, %v744_v59  ;;  %v899_v36 = vld [vmem:[#allocation2 + $0x56] sm:$0xff]  ;;  %s1490_s19 = sshll.u32 %s1486_s6, 4  ;;  %s1491_s19 = int_to_ptr.hbm [resolvable:$true] %s1490_s19 }
 0x24f   : > { %v808_v18 = vadd.f32 %v806_v51, %v800_v20  ;;  %v3669_v47 = vstv %s3565_s21  ;;  %v3670_v26 = vstv %s3569_s8  ;;  %s3676_s21 = sld [smem:[#allocation51_spill]]  ;;  %v3678_v57 = vstv %s3667_s15  ;;  %s175_s15 = scalar_lea.vmem [#allocation9], %s3735_s17 }
 0x250   : > { %v1230_v32 = vmul.f32 %v3669_v47, %v1227_v23  ;;  %v1286_v17 = vmul.f32 %v3670_v26, %v1283_v3  ;;  %v1224_v6 = vadd.f32 %v1222_v12, %v1216_v53  ;;  %v1280_v35 = vadd.f32 %v1278_v56, %v1272_v41  ;;  %s3677_s8 = sld [smem:[#allocation52_spill]]  ;;  %v907_v23 = vld [vmem:[#allocation2 + $0x6e] sm:$0xff]  ;;  %v1259_v3 = vld [vmem:[#allocation2 + $0x145] sm:$0xff] }
 0x251   : > { %v760_v46 = vadd.f32 %v758_v4, %v752_v24  ;;  %v816_v1 = vadd.f32 %v814_v8, %v808_v18  ;;  %v830_v7 = vmul.f32 %v3678_v57, %v827_v30  ;;  %v3679_v60 = vstv %s3668_s1  ;;  %s1488_s1 = sshll.u32 %s175_s15, 4  ;;  %s1489_s1 = int_to_ptr.vmem [resolvable:$true] %s1488_s1 }
 0x252   : > { %v886_v34 = vmul.f32 %v3679_v60, %v883_v42  ;;  %v1238_v19 = vmul.f32 %v1236_v37, %v1235_v28  ;;  %v1294_v50 = vmul.f32 %v1292_v25, %v1291_v10  ;;  %v1232_v9 = vadd.f32 %v1230_v32, %v1224_v6  ;;  %v859_v42 = vld [vmem:[#allocation2 + $0x85] sm:$0xff] }
 0x253   : > { %v1288_v40 = vadd.f32 %v1286_v17, %v1280_v35  ;;  %v824_v58 = vadd.f32 %v2931_v14, %v760_v46  ;;  %v880_v16 = vadd.f32 %v2935_v2, %v816_v1  ;;  %v1246_v51 = vmul.f32 %v1244_v27, %v1243_v49  ;;  %v1315_v2 = vld [vmem:[#allocation2 + $0x146] sm:$0xff]  ;;  %v867_v35 = vld [vmem:[#allocation2 + $0x9d] sm:$0xff] }
 0x254   : > { %v1302_v14 = vmul.f32 %v1300_v15, %v1299_v43  ;;  %v1240_v11 = vadd.f32 %v1238_v19, %v1232_v9  ;;  %v3687_v52 = vstv %s3579_s22  ;;  %v3688_v21 = vstv %s3581_s20  ;;  %v915_v28 = vld [vmem:[#allocation2 + $0x86] sm:$0xff]  ;;  %v923_v60 = vld [vmem:[#allocation2 + $0x9e] sm:$0xff] }
 0x255   : > { %v3680_v62 = vstv %s3676_s21  ;;  %v1296_v13 = vadd.f32 %v1294_v50, %v1288_v40  ;;  %v832_v59 = vadd.f32 %v830_v7, %v824_v58  ;;  %v888_v20 = vadd.f32 %v886_v34, %v880_v16  ;;  %s1475_s21 = scalar_lea.sflag [#allocation6], %s3728_s11 }
 0x256   : > { %v838_v37 = vmul.f32 %v3680_v62, %v835_v22  ;;  %v3682_v45 = vstv %s3677_s8  ;;  %v1254_v12 = vmul.f32 %v3687_v52, %v1251_v39  ;;  %v1310_v56 = vmul.f32 %v3688_v21, %v1307_v5  ;;  %s1835_s8 = sshra.s32 %s1491_s19, 4  ;;  %s1836_s8 = int_to_ptr.hbm [resolvable:$true] %s1835_s8 }
 0x257   : > { %v894_v25 = vmul.f32 %v3682_v45, %v891_v31  ;;  %v3689_v4 = vstv %s3681_s14  ;;  %v3690_v8 = vstv %s3683_s27  ;;  %v1248_v10 = vadd.f32 %v1246_v51, %v1240_v11  ;;  %s1837_s14 = scalar_lea.hbm %s1836_s8, 8  ;;  %p1842_p9 = scmp.lt.s32.totalorder %s1836_s8, %s3733_s24 }
 0x258   : > { %v846_v27 = vmul.f32 %v3689_v4, %v843_v33  ;;  %v902_v15 = vmul.f32 %v3690_v8, %v899_v36  ;;  %v1304_v53 = vadd.f32 %v1302_v14, %v1296_v13  ;;  %v840_v41 = vadd.f32 %v838_v37, %v832_v59  ;;  %p1838_p1 = scmp.ne.s32.totalorder %s1836_s8, %s1837_s14 }
 0x259   : > { %v896_v24 = vadd.f32 %v894_v25, %v888_v20  ;;  %v3693_v18 = vstv %s3684_s10  ;;  %v3694_v47 = vstv %s3685_s2  ;;  %v1262_v26 = vmul.f32 %v1260_v61, %v1259_v3  ;;  %v1405_v3 = vld [vmem:[#allocation1 + $0x7] ss:$9 sm:$0xff]  ;;  %s1841_s2 = scalar_lea.hbm %s3733_s24, 16 }
 0x25a   : > { %v1347_v30 = vpop.permute.xlu2 %1346  ;;  %v854_v22 = vmul.f32 %v3693_v18, %v851_v29  ;;  %v910_v32 = vmul.f32 %v3694_v47, %v907_v23  ;;  %v1318_v17 = vmul.f32 %v1316_v63, %v1315_v2  ;;  %v1256_v31 = vadd.f32 %v1254_v12, %v1248_v10  ;;  %p1839_p4 = pnand %p1838_p1, %p1997_p3  ;;  %p1843_p10 = scmp.lt.s32.totalorder %s1841_s2, %s1837_s14 }
 0x25b   : > { %1352 = vst.msk [vmem:[#allocation3] sm:$0x1] %vm1351_vm2, %v1347_v30  ;;  %v1312_v6 = vadd.f32 %v1310_v56, %v1304_v53  ;;  %v848_v49 = vadd.f32 %v846_v27, %v840_v41  ;;  %v904_v43 = vadd.f32 %v902_v15, %v896_v24  ;;  %v3697_v46 = vstv %s3691_s28 }
 0x25c   : > { %v862_v1 = vmul.f32 %v3697_v46, %v859_v42  ;;  %v3698_v57 = vstv %s3692_s25  ;;  %v1264_v34 = vadd.f32 %v1262_v26, %v1256_v31  ;;  %v870_v50 = vmul.f32 %v868_v55, %v867_v35  ;;  %p1840_p8 = pneg %p1839_p4  ;;  %p1844_p2 = por %p1843_p10, %p1842_p9 }
 0x25d   : > { %v918_v7 = vmul.f32 %v3698_v57, %v915_v28  ;;  %v1320_v39 = vadd.f32 %v1318_v17, %v1312_v6  ;;  %v856_v5 = vadd.f32 %v854_v22, %v848_v49  ;;  %v912_v19 = vadd.f32 %v910_v32, %v904_v43  ;;  %v1465_v32 = vld [vmem:[%s3726_s9] sm:$0xff] }
 0x25e   : > { %v926_v36 = vmul.f32 %v924_v44, %v923_v60  ;;  %v3719_v56 = vmov 0  ;;  %p1845_p11 = pnand %p1844_p2, %p1840_p8 }
 0x25f   : > { %v1324_v61 = vadd.f32 %v1320_v39, %v1264_v34  ;;  %v864_v33 = vadd.f32 %v862_v1, %v856_v5  ;;  %v920_v63 = vadd.f32 %v918_v7, %v912_v19 }
 0x261   : > { %v872_v9 = vadd.f32 %v870_v50, %v864_v33  ;;  %v928_v40 = vadd.f32 %v926_v36, %v920_v63 }
 0x263   : > { %v1322_v58 = vadd.f32 %v928_v40, %v872_v9 }
 0x265   : > { %v1326_v16 = vadd.f32 %v1324_v61, %v1322_v58 }
 0x267   : > { %v1328_v62 = vsub.f32 0.0, %v1326_v16 }
 0x269   : > { %v1331_v37 = vmul.f32 1.442695, %v1328_v62 }
 0x26b   : > { %1771 = vpow2.f32 %v1331_v37 }
 0x271   : > { %v1772_v45 = vpop.eup %1771 }
 0x272   : > { %v1334_v25 = vadd.f32 1.0, %v1772_v45  ;;  %v1377_v13 = vpop.permute.xlu2 %1376 }
 0x274   : > { %1773 = vrcp.f32 %v1334_v25 }
 0x27a   : > { %v1357_v44 = vpop.permute.xlu1 %1356  ;;  %v1774_v51 = vpop.eup %1773 }
 0x27b   : > { %1362 = vst.msk [vmem:[#allocation3] sm:$0x1] %vm1361_vm5, %v1357_v44 }
 0x27c   : > { %1413 = vst.msk [vmem:[#allocation3 + $0x1] sm:$0x1] %vm2852_vm10, %v1774_v51  ;;  %vm3393_vm10 = vmand %vm3086_vm8, %vm3091_vm9 }
 0x27d   : > { %1415 = vst [vmem:[#allocation1] sm:$0xff] %v1774_v51 }
 0x282   : > { %v1367_v38 = vpop.permute.xlu0 %1366 }
 0x283   : > { %1372 = vst.msk [vmem:[#allocation3] sm:$0x1] %vm3394_vm11, %v1367_v38 }
 0x284   : > { %1382 = vst.msk [vmem:[#allocation3] sm:$0x1] %vm3393_vm10, %v1377_v13  ;;  %v1417_v59 = vld [vmem:[#allocation1 + $0x1] ss:$9 sm:$0xff]  ;;  %vm3140_vm10 = vcmp.lt.s32.totalorder %v1337_v0, 112 }
 0x285   : > { %1418 = vrot.lane.b32.xlu0 %v1417_v59, %s3711_s30  ;;  %1422 = vst [vmem:[#allocation1] sm:$0xff] %v1774_v51  ;;  %v3720_v56 = vsel %vm3140_vm10, 4294967295, %v3719_v56  ;;  %vm3395_vm11 = vmand %vm3135_vm0, %vm3140_vm10 }
 0x286   : > { %vm3731_vm3 = vnez %v3720_v56 }
 0x287   : > { %vm3732_vm4 = vmand %vm3135_vm0, %vm3731_vm3  ;;  %vm3736_vm0 = vcmask 1043456  }
 0x28c   : > { %v1424_v52 = vld [vmem:[#allocation1 + $0x2] ss:$9 sm:$0xff] }
 0x28d   : > { %1425 = vrot.lane.b32.xlu2 %v1424_v52, %s3716_s16  ;;  %1429 = vst [vmem:[#allocation1] sm:$0xff] %v1774_v51 }
 0x292   : > { %v1387_v12 = vpop.permute.xlu1 %1386 }
 0x293   : > { %1392 = vst.msk [vmem:[#allocation3] sm:$0x1] %vm3396_vm14, %v1387_v12  ;;  %vm1410_vm14 = vcmp.lt.s32.totalorder %v1337_v0, 128 }
 0x294   : > { %v1431_v4 = vld [vmem:[#allocation1 + $0x3] ss:$9 sm:$0xff] }
 0x295   : > { %1432 = vrot.lane.b32.xlu1 %v1431_v4, %s3721_s0  ;;  %1436 = vst [vmem:[#allocation1] sm:$0xff] %v1774_v51 }
 0x29a   : > { %v1397_v27 = vpop.permute.xlu0 %1396 }
 0x29b   : > { %1402 = vst.msk [vmem:[#allocation3] sm:$0x1] %vm3395_vm11, %v1397_v27  ;;  %vm1409_vm11 = vcmp.ge.s32.totalorder %v1337_v0, 112 }
 0x29c   : > { %v1438_v8 = vld [vmem:[#allocation1 + $0x4] ss:$9 sm:$0xff]  ;;  %vm1411_vm10 = vmand %vm1409_vm11, %vm1410_vm14 }
 0x29d   : > { %1439 = vrot.lane.b32.xlu0 %v1438_v8, %s3722_s7  ;;  %1443 = vst [vmem:[#allocation1] sm:$0xff] %v1774_v51 }
 0x2a4   : > { %v1445_v15 = vld [vmem:[#allocation1 + $0x5] ss:$9 sm:$0xff] }
 0x2a5   : > { %1446 = vrot.lane.b32.xlu2 %v1445_v15, %s3723_s4  ;;  %1450 = vst [vmem:[#allocation1] sm:$0xff] %v1774_v51 }
 0x2ac   : > { %v1452_v42 = vld [vmem:[#allocation1 + $0x6] ss:$9 sm:$0xff] }
 0x2ad   : > { %1406 = vrot.lane.b32.xlu2 %v1405_v3, %s1915_s3  ;;  %1453 = vrot.lane.b32.xlu1 %v1452_v42, %s3724_s18  ;;  %1457 = vst [vmem:[#allocation1] sm:$0xff] %v1774_v51 }
 0x2b4   : > { %v1459_v28 = vld [vmem:[#allocation1 + $0x7] ss:$9 sm:$0xff] }
 0x2b5   : > { %1460 = vrot.lane.b32.xlu0 %v1459_v28, %s1915_s3 }
 0x2e7   : > { %v1426_v10 = vpop.permute.xlu2 %1425 }
 0x2f7   : > { %v1419_v53 = vpop.permute.xlu0 %1418 }
 0x2f8   : > { %1421 = vst.msk [vmem:[#allocation3 + $0x1] sm:$0x1] %vm1351_vm2, %v1419_v53  ;;  %vm3730_vm2 = vmand %vm3115_vm12, %vm3120_vm13 }
 0x2f9   : > { %1428 = vst.msk [vmem:[#allocation3 + $0x1] sm:$0x1] %vm1361_vm5, %v1426_v10 }
 0x2ff   : > { %v1447_v41 = vpop.permute.xlu2 %1446 }
 0x307   : > { %v1433_v24 = vpop.permute.xlu1 %1432  ;;  %v1407_v54 = vpop.permute.xlu2 %1406 }
 0x308   : > { %1435 = vst.msk [vmem:[#allocation3 + $0x1] sm:$0x1] %vm3727_vm15, %v1433_v24 }
 0x309   : > { %1412 = vst.msk [vmem:[#allocation3] sm:$0x1] %vm1411_vm10, %v1407_v54 }
 0x30f   : > { %v1440_v48 = vpop.permute.xlu0 %1439 }
 0x310   : > { %1442 = vst.msk [vmem:[#allocation3 + $0x1] sm:$0x1] %vm3729_vm1, %v1440_v48 }
 0x311   : > { %1449 = vst.msk [vmem:[#allocation3 + $0x1] sm:$0x1] %vm3730_vm2, %v1447_v41 }
 0x31f   : > { %v1454_v0 = vpop.permute.xlu1 %1453 }
 0x320   : > { %1456 = vst.msk [vmem:[#allocation3 + $0x1] sm:$0x1] %vm3732_vm4, %v1454_v0 }
 0x327   : > { %v1461_v18 = vpop.permute.xlu0 %1460 }
 0x328   : > { %1463 = vst.msk [vmem:[#allocation3 + $0x1] sm:$0x1] %vm1411_vm10, %v1461_v18 }
 0x32f   : > { %v1464_v22 = vld [vmem:[#allocation3] sm:$0x3] }
 0x330   : > { %v1468_v47 = vperm.slane %v1464_v22, 1  ;;  %v1467_v26 = vperm.slane %v1464_v22, 0 }
 0x332   : > { %v1469_v17 = vrot.slane %v1468_v47, 4 }
 0x334   : > { %v1470_v31 = vsel %vm3736_vm0, %v1467_v26, %v1469_v17 }
 0x335   : > { %v1472_v6 = vmul.f32 %v1470_v31, %v1465_v32 }
 0x337   : > { %1473 = vst [vmem:[%s175_s15] sm:$0xff] %v1472_v6 }
 0x338   : > { %1848 = shalt.err (!%p1845_p11)
}
 0x339   : > { %1694 = dma.vmem_to_hbm [thread:$0]  (%p1997_p3), %s1489_s1, 128, %s1491_s19, %s1475_s21  }
 0x33a PF: > { %s3737_s25 = sld [smem:[#allocation13_spill]] }
 0x33b   : > { %s3739_s20 = sld [smem:[#allocation16_spill]] }
 0x340   : > { %s1502_s30 = sand.u32 1, %s3737_s25  }
 0x341   : > { %p3740_p12 = scmp.ge.s32.totalorder %s3739_s20, 2  ;;  %s1503_s16 = scalar_lea.sflag [#allocation6], %s1502_s30 }
 0x343   : > { %p1705_p13 = pnand %p3740_p12, %p1966_p6 }
 0x345   : > { %p1706_p0 = pneg %p1705_p13 }
 0x347   : > { %1874 = dma.done.wait (%p1706_p0), %s1503_s16, 128  }
 0x348   : > { %1876 = vsyncadd (%p1706_p0), %s1503_s16, 4294967168  ;;  %s3741_s12 = sld [smem:[#allocation19_spill]] }
 0x349   : > { %s3742_s9 = sld [smem:[#allocation14_spill]] }
 0x34a   : > { %s3743_s10 = sld [smem:[#allocation15_spill]] }
 0x34b   : > { %s3744_s11 = sld [smem:[#allocation20_spill]] }
 0x34e   : > { %p16_p5 = scmp.ge.s32.totalorder %s3741_s12, 4  }
 0x350   :  { %18 = sbr.rel (!%p16_p5) target bundleno = 10 (0xa), region = 105 }
 0x355   :  { %1509 = vsyncpa [#allocation5], 1 }
 0x356   :  { %1511 = vsyncpa [#allocation5 + $0x1], 1 }
 0x357   :  { %1512 = vsyncpa [#allocation6], 1 }
 0x358   :  { %1514 = vsyncpa [#allocation6 + $0x1], 1 }
 0x359   :  { %1515 = vsyncpa [#allocation7], 1 }
 0x35a   :  { %1517 = vsyncpa [#allocation7 + $0x1], 1 }

</bundles_post_ra>
